<compile_context>
chip_gen: v7x
topology: tpu7x:2x2x1
jax: 0.10.0
libtpu: 0.0.40
codegen_flags: <defaults>
</compile_context>

<pallas_src>
import jax
import jax.numpy as jnp
from jax import lax
from jax.experimental import pallas as pl
from jax.experimental.pallas import tpu as pltpu


def _round_up(n, m):
    return ((n + m - 1) // m) * m


def _lstm_chunk_kernel(x_ref, wih_ref, whh_ref, b_ref,
                       out_ref, hn_ref, cn_ref,
                       pre_sc, h_sc, c_sc):
    """One grid step = TT timesteps of the recurrence for the whole (padded) batch.

    x_ref    : (TT*Bp, I)     time-major flattened input chunk
    wih_ref  : (I, 4*Hp)      W_ih^T, gate columns in (i,f,o,g) order, lane-padded
    whh_ref  : (Hp, 4*Hp)     W_hh^T, same column layout, rows padded H -> Hp
    b_ref    : (1, 4*Hp)      fused bias (b_ih + b_hh), same layout
    out_ref  : (TT*Bp, Hp)    hidden outputs for this chunk
    hn_ref   : (Bp, Hp)       final hidden state (resident block, rewritten per chunk)
    cn_ref   : (Bp, Hp)       final cell state
    pre_sc   : (TT*Bp, 4*Hp)  staged input projection (VMEM scratch)
    h_sc/c_sc: (Bp, Hp)       recurrent state carried across chunks
    """
    Bp, Hp = h_sc.shape
    TT = x_ref.shape[0] // Bp

    @pl.when(pl.program_id(0) == 0)
    def _():
        h_sc[...] = jnp.zeros_like(h_sc)
        c_sc[...] = jnp.zeros_like(c_sc)

    # Hoisted input projection: one (TT*Bp, I) x (I, 4*Hp) MXU matmul per chunk
    # with the bias fused, staged into VMEM so the serial recurrence below only
    # keeps a single (Bp, 4*Hp) slice live per step.
    pre_sc[...] = (
        jnp.dot(x_ref[...], wih_ref[...], preferred_element_type=jnp.float32)
        + b_ref[...])

    whh = whh_ref[...]  # resident recurrent weights, loaded once per chunk
    # TODO(synk): at tiny M (=Bp) the recurrent matmul re-streams W_hh^T through
    # the MXU each step; pltpu.matmul_push_rhs / matmul_acc_lhs / matmul_pop
    # would hold it in the staging registers across all TT steps.

    def step(t, carry):
        h, c = carry
        base = pl.multiple_of(t * Bp, 8)                  # Bp is a multiple of 8
        gates = pre_sc[pl.ds(base, Bp), :] + jnp.dot(
            h.astype(whh.dtype), whh, preferred_element_type=jnp.float32)
        # Gate columns are pre-permuted to (i, f, o, g) and padded to Hp (a
        # multiple of 128): sigmoid / tanh each hit one contiguous lane-aligned
        # slice (no intra-vreg gate slicing on the serial path).
        sig = jax.nn.sigmoid(gates[:, :3 * Hp])
        i_g = sig[:, 0 * Hp:1 * Hp]
        f_g = sig[:, 1 * Hp:2 * Hp]
        o_g = sig[:, 2 * Hp:3 * Hp]
        g_g = jnp.tanh(gates[:, 3 * Hp:4 * Hp])
        c = f_g * c + i_g * g_g
        h = o_g * jnp.tanh(c)
        # Per-step aligned store: free filler under the matmul/EUP latency
        # chain, and no TT-long live list / in-kernel concatenate.
        out_ref[pl.ds(base, Bp), :] = h.astype(out_ref.dtype)
        return (h, c)

    h, c = lax.fori_loop(0, TT, step, (h_sc[...], c_sc[...]),
                         unroll=min(TT, 8))

    # Carry state to the next chunk; publish final h/c every chunk (robust, no
    # reliance on last-iteration-only writes to a resident output block).
    h_sc[...] = h
    c_sc[...] = c
    hn_ref[...] = h.astype(hn_ref.dtype)
    cn_ref[...] = c.astype(cn_ref.dtype)


def _pick_time_chunk(T, Bp, I, Hp, budget_bytes=24 * 1024 * 1024):
    """Largest TT dividing T whose per-chunk VMEM footprint fits the budget."""
    def chunk_bytes(tt):
        # pre scratch + double-buffered x / out blocks (f32 worst case).
        return 4 * tt * Bp * (4 * Hp + 2 * I + 2 * Hp)
    best = 1
    for tt in range(1, min(T, 64) + 1):
        if T % tt == 0 and chunk_bytes(tt) <= budget_bytes:
            best = tt
    return best


def lstm_encoder_forward(x, w_ih, w_hh, b_ih, b_hh, *, use_bf16_matmul=False):
    """x: (B, T, I) float32.  Returns (outputs (B,T,H), (h_n (1,B,H), c_n (1,B,H)))."""
    B, T, I = x.shape
    H = w_hh.shape[1]
    Hp = _round_up(H, 128)            # lane-dense gates / outputs
    Bp = _round_up(B, 8)              # sublane-aligned batch
    TT = _pick_time_chunk(T, Bp, I, Hp)
    assert T % TT == 0

    # ---- layout glue (wrapper / XLA side) ---------------------------------
    # Permute gate blocks from PyTorch's (i, f, g, o) to (i, f, o, g) and pad
    # each gate's columns H -> Hp (zeros), so the kernel sees lane-aligned gates.
    gate_order = (0, 1, 3, 2)

    def pack_cols(w, rows_to=None):
        # w: (4H, K) -> (K [padded to rows_to], 4*Hp)
        blocks = []
        for k in gate_order:
            gt = w[k * H:(k + 1) * H].T                    # (K, H)
            blocks.append(jnp.pad(gt, ((0, 0), (0, Hp - H))))
        out = jnp.concatenate(blocks, axis=1)              # (K, 4*Hp)
        if rows_to is not None:
            out = jnp.pad(out, ((0, rows_to - out.shape[0]), (0, 0)))
        return out

    wih_t = pack_cols(w_ih)                  # (I, 4*Hp)
    whh_t = pack_cols(w_hh, rows_to=Hp)      # (Hp, 4*Hp); padded h cols hit zero rows
    b = b_ih + b_hh
    bias = jnp.concatenate(
        [jnp.pad(b[k * H:(k + 1) * H], (0, Hp - H)) for k in gate_order]
    ).reshape(1, 4 * Hp).astype(jnp.float32)

    # Time-major, batch padded to Bp, flattened to (T*Bp, I): each timestep is
    # then one aligned (Bp, .) sublane block inside the kernel.
    x_tm = jnp.transpose(x, (1, 0, 2))                       # (T, B, I)
    x_tm = jnp.pad(x_tm, ((0, 0), (0, Bp - B), (0, 0)))      # (T, Bp, I)
    x_tm = x_tm.reshape(T * Bp, I)
    # TODO(synk): the wrapper transposes (x in, outputs out) are each an HBM
    # round-trip; for production sizes fold them into the producer/consumer —
    # the recurrence kernel itself wants this time-major layout.

    mm_dtype = jnp.bfloat16 if use_bf16_matmul else x.dtype
    x_tm = x_tm.astype(mm_dtype)
    wih_t = wih_t.astype(mm_dtype)
    whh_t = whh_t.astype(mm_dtype)

    out_shapes = (
        jax.ShapeDtypeStruct((T * Bp, Hp), jnp.float32),     # outputs (time-major)
        jax.ShapeDtypeStruct((Bp, Hp), jnp.float32),         # h_n
        jax.ShapeDtypeStruct((Bp, Hp), jnp.float32),         # c_n
    )
    scratch_shapes = [
        pltpu.VMEM((TT * Bp, 4 * Hp), jnp.float32),          # staged projection
        pltpu.VMEM((Bp, Hp), jnp.float32),                   # h state
        pltpu.VMEM((Bp, Hp), jnp.float32),                   # c state
    ]

    def run(weight_mode):
        def wspec(shape):
            if weight_mode is None:
                return pl.BlockSpec(shape, lambda c: (0, 0))
            return pl.BlockSpec(shape, lambda c: (0, 0), pipeline_mode=weight_mode)

        grid_spec = pltpu.PrefetchScalarGridSpec(
            num_scalar_prefetch=0,
            grid=(T // TT,),
            in_specs=[
                pl.BlockSpec((TT * Bp, I), lambda c: (c, 0)),   # x chunk
                wspec((I, 4 * Hp)),                             # W_ih^T (resident)
                wspec((Hp, 4 * Hp)),                            # W_hh^T (resident)
                wspec((1, 4 * Hp)),                             # fused bias
            ],
            out_specs=[
                pl.BlockSpec((TT * Bp, Hp), lambda c: (c, 0)),  # outputs chunk
                pl.BlockSpec((Bp, Hp), lambda c: (0, 0)),       # h_n
                pl.BlockSpec((Bp, Hp), lambda c: (0, 0)),       # c_n
            ],
            scratch_shapes=scratch_shapes,
        )
        return pl.pallas_call(
            _lstm_chunk_kernel,
            grid_spec=grid_spec,
            out_shape=out_shapes,
            compiler_params=pltpu.CompilerParams(
                dimension_semantics=("arbitrary",),             # recurrent axis
                vmem_limit_bytes=48 * 1024 * 1024,
            ),
        )(x_tm, wih_t, whh_t, bias)

    try:
        # Single-buffer the constant-index weight/bias blocks: halves their VMEM
        # footprint (matters on v7x's 64 MiB VMEM).
        out_tm, h_n, c_n = run(pl.Buffered(1))
    except Exception:
        # pipeline_mode / Buffered(1) not supported by this JAX build — fall back
        # to default double-buffered resident blocks (correctness identical).
        out_tm, h_n, c_n = run(None)

    outputs = jnp.transpose(out_tm.reshape(T, Bp, Hp), (1, 0, 2))[:B, :, :H]
    h_n = h_n[:B, :H][None]
    c_n = c_n[:B, :H][None]
    return outputs, (h_n, c_n)


def _lstm_reference(x, w_ih, w_hh, b_ih, b_hh):
    """Pure-JAX reference matching torch.nn.LSTM (single layer, unidirectional)."""
    B, T, I = x.shape
    H = w_hh.shape[1]

    def step(carry, x_t):
        h, c = carry
        gates = x_t @ w_ih.T + b_ih + h @ w_hh.T + b_hh
        i = jax.nn.sigmoid(gates[:, 0 * H:1 * H])
        f = jax.nn.sigmoid(gates[:, 1 * H:2 * H])
        g = jnp.tanh(gates[:, 2 * H:3 * H])
        o = jax.nn.sigmoid(gates[:, 3 * H:4 * H])
        c = f * c + i * g
        h = o * jnp.tanh(c)
        return (h, c), h

    h0 = jnp.zeros((B, H), jnp.float32)
    c0 = jnp.zeros((B, H), jnp.float32)
    (h_n, c_n), ys = jax.lax.scan(step, (h0, c0), jnp.transpose(x, (1, 0, 2)))
    return jnp.transpose(ys, (1, 0, 2)), (h_n[None], c_n[None])


if __name__ == "__main__":
    # Small shapes implied by the forward: (batch, seq_len, input_size)
    B, T, I, H = 2, 8, 16, 32
    key = jax.random.PRNGKey(0)
    k_x, k1, k2, k3, k4 = jax.random.split(key, 5)

    # PyTorch LSTM default init: U(-1/sqrt(H), 1/sqrt(H))
    bound = 1.0 / jnp.sqrt(jnp.float32(H))
    w_ih = jax.random.uniform(k1, (4 * H, I), jnp.float32, -bound, bound)
    w_hh = jax.random.uniform(k2, (4 * H, H), jnp.float32, -bound, bound)
    b_ih = jax.random.uniform(k3, (4 * H,), jnp.float32, -bound, bound)
    b_hh = jax.random.uniform(k4, (4 * H,), jnp.float32, -bound, bound)

    x = jax.random.normal(k_x, (B, T, I), jnp.float32)

    outputs, (h_n, c_n) = lstm_encoder_forward(x, w_ih, w_hh, b_ih, b_hh)
    jax.block_until_ready((outputs, h_n, c_n))

    ref_out, (ref_h, ref_c) = _lstm_reference(x, w_ih, w_hh, b_ih, b_hh)
    assert outputs.shape == (B, T, H)
    assert h_n.shape == (1, B, H) and c_n.shape == (1, B, H)
    assert jnp.allclose(outputs, ref_out, atol=1e-5, rtol=1e-5)
    assert jnp.allclose(h_n, ref_h, atol=1e-5, rtol=1e-5)
    assert jnp.allclose(c_n, ref_c, atol=1e-5, rtol=1e-5)

    print("KERNEL_OK")
</pallas_src>

<mosaic_0001>
module attributes {stable_mosaic.version = 11 : i64} {
  func.func @_lstm_chunk_kernel(%arg0: i32, %arg1: memref<64x16xf32, #tpu.memory_space<vmem>>, %arg2: memref<16x512xf32, #tpu.memory_space<vmem>>, %arg3: memref<128x512xf32, #tpu.memory_space<vmem>>, %arg4: memref<1x512xf32, #tpu.memory_space<vmem>>, %arg5: memref<64x128xf32, #tpu.memory_space<vmem>>, %arg6: memref<8x128xf32, #tpu.memory_space<vmem>>, %arg7: memref<8x128xf32, #tpu.memory_space<vmem>>, %arg8: memref<64x512xf32, #tpu.memory_space<vmem>>, %arg9: memref<8x128xf32, #tpu.memory_space<vmem>>, %arg10: memref<8x128xf32, #tpu.memory_space<vmem>>) attributes {dimension_semantics = [#tpu.dimension_semantics<arbitrary>], iteration_bounds = array<i64: 1>, scalar_prefetch = 0 : i64, scratch_operands = 3 : i64, tpu.core_type = #tpu.core_type<tc>, window_params = [{transform_indices = @transform_0, window_bounds = array<i64: 64, 16>}, {pipeline_mode = #tpu.pipeline_mode<synchronous>, transform_indices = @transform_1, window_bounds = array<i64: 16, 512>}, {pipeline_mode = #tpu.pipeline_mode<synchronous>, transform_indices = @transform_2, window_bounds = array<i64: 128, 512>}, {pipeline_mode = #tpu.pipeline_mode<synchronous>, transform_indices = @transform_3, window_bounds = array<i64: 1, 512>}, {transform_indices = @transform_4, window_bounds = array<i64: 64, 128>}, {pipeline_mode = #tpu.pipeline_mode<synchronous>, transform_indices = @transform_5, window_bounds = array<i64: 8, 128>}, {pipeline_mode = #tpu.pipeline_mode<synchronous>, transform_indices = @transform_6, window_bounds = array<i64: 8, 128>}]} {
    %c0_i32 = arith.constant 0 : i32
    %0 = arith.cmpi eq, %arg0, %c0_i32 : i32
    %1 = arith.extui %0 : i1 to i32
    %c0_i32_0 = arith.constant 0 : i32
    %2 = arith.cmpi ne, %1, %c0_i32_0 : i32
    scf.if %2 {
      %cst_63 = arith.constant 0.000000e+00 : f32
      %209 = vector.broadcast %cst_63 : f32 to vector<8x128xf32>
      %c0_64 = arith.constant 0 : index
      %c0_65 = arith.constant 0 : index
      %210 = vector.load %arg9[%c0_64, %c0_65] : memref<8x128xf32, #tpu.memory_space<vmem>>, vector<8x128xf32>
      tpu.vector_store %arg9[%c0_64, %c0_65], %209 {strides = array<i32>} : memref<8x128xf32, #tpu.memory_space<vmem>>, vector<8x128xf32>,
      %cst_66 = arith.constant 0.000000e+00 : f32
      %211 = vector.broadcast %cst_66 : f32 to vector<8x128xf32>
      %c0_67 = arith.constant 0 : index
      %c0_68 = arith.constant 0 : index
      %212 = vector.load %arg10[%c0_67, %c0_68] : memref<8x128xf32, #tpu.memory_space<vmem>>, vector<8x128xf32>
      tpu.vector_store %arg10[%c0_67, %c0_68], %211 {strides = array<i32>} : memref<8x128xf32, #tpu.memory_space<vmem>>, vector<8x128xf32>,
    } else {
    }
    %c0 = arith.constant 0 : index
    %c0_1 = arith.constant 0 : index
    %3 = vector.load %arg1[%c0, %c0_1] : memref<64x16xf32, #tpu.memory_space<vmem>>, vector<64x16xf32>
    %c0_2 = arith.constant 0 : index
    %c0_3 = arith.constant 0 : index
    %4 = vector.load %arg2[%c0_2, %c0_3] : memref<16x512xf32, #tpu.memory_space<vmem>>, vector<16x512xf32>
    %cst = arith.constant dense<0.000000e+00> : vector<64x512xf32>
    %5 = tpu.matmul %3, %4, %cst {dimension_numbers = #tpu.dot_dimension_numbers<[1], [0], [0], [1], [0, 0, 1, 1], [], []>} : vector<64x16xf32>, vector<16x512xf32>, vector<64x512xf32> -> vector<64x512xf32>
    %c0_4 = arith.constant 0 : index
    %c0_5 = arith.constant 0 : index
    %6 = vector.load %arg4[%c0_4, %c0_5] : memref<1x512xf32, #tpu.memory_space<vmem>>, vector<1x512xf32>
    %7 = vector.broadcast %6 : vector<1x512xf32> to vector<64x512xf32>
    %8 = arith.addf %5, %7 : vector<64x512xf32>
    %c0_6 = arith.constant 0 : index
    %c0_7 = arith.constant 0 : index
    %9 = vector.load %arg8[%c0_6, %c0_7] : memref<64x512xf32, #tpu.memory_space<vmem>>, vector<64x512xf32>
    tpu.vector_store %arg8[%c0_6, %c0_7], %8 {strides = array<i32>} : memref<64x512xf32, #tpu.memory_space<vmem>>, vector<64x512xf32>,
    %c0_8 = arith.constant 0 : index
    %c0_9 = arith.constant 0 : index
    %10 = vector.load %arg3[%c0_8, %c0_9] : memref<128x512xf32, #tpu.memory_space<vmem>>, vector<128x512xf32>
    %c0_10 = arith.constant 0 : index
    %c0_11 = arith.constant 0 : index
    %11 = vector.load %arg9[%c0_10, %c0_11] : memref<8x128xf32, #tpu.memory_space<vmem>>, vector<8x128xf32>
    %c0_12 = arith.constant 0 : index
    %c0_13 = arith.constant 0 : index
    %12 = vector.load %arg10[%c0_12, %c0_13] : memref<8x128xf32, #tpu.memory_space<vmem>>, vector<8x128xf32>
    %c0_i32_14 = arith.constant 0 : i32
    %c8_i32 = arith.constant 8 : i32
    %13 = arith.muli %c0_i32_14, %c8_i32 : i32
    %14 = tpu.assume_multiple %13, 8 : i32
    %15 = arith.index_cast %14 : i32 to index
    %c0_15 = arith.constant 0 : index
    %16 = vector.load %arg8[%15, %c0_15] : memref<64x512xf32, #tpu.memory_space<vmem>>, vector<8x512xf32>
    %cst_16 = arith.constant dense<0.000000e+00> : vector<8x512xf32>
    %17 = tpu.matmul %11, %10, %cst_16 {dimension_numbers = #tpu.dot_dimension_numbers<[1], [0], [0], [1], [0, 0, 1, 1], [], []>} : vector<8x128xf32>, vector<128x512xf32>, vector<8x512xf32> -> vector<8x512xf32>
    %18 = arith.addf %16, %17 : vector<8x512xf32>
    %19 = vector.extract_strided_slice %18 {offsets = [0, 0], sizes = [8, 384], strides = [1, 1]} : vector<8x512xf32> to vector<8x384xf32>
    %20 = arith.negf %19 : vector<8x384xf32>
    %21 = math.exp %20 : vector<8x384xf32>
    %cst_17 = arith.constant 1.000000e+00 : f32
    %22 = vector.broadcast %cst_17 : f32 to vector<8x384xf32>
    %23 = arith.addf %22, %21 : vector<8x384xf32>
    %24 = arith.divf %22, %23 : vector<8x384xf32>
    %25 = vector.extract_strided_slice %24 {offsets = [0, 0], sizes = [8, 128], strides = [1, 1]} : vector<8x384xf32> to vector<8x128xf32>
    %26 = vector.extract_strided_slice %24 {offsets = [0, 128], sizes = [8, 128], strides = [1, 1]} : vector<8x384xf32> to vector<8x128xf32>
    %27 = vector.extract_strided_slice %24 {offsets = [0, 256], sizes = [8, 128], strides = [1, 1]} : vector<8x384xf32> to vector<8x128xf32>
    %28 = vector.extract_strided_slice %18 {offsets = [0, 384], sizes = [8, 128], strides = [1, 1]} : vector<8x512xf32> to vector<8x128xf32>
    %29 = math.tanh %28 : vector<8x128xf32>
    %30 = arith.mulf %26, %12 : vector<8x128xf32>
    %31 = arith.mulf %25, %29 : vector<8x128xf32>
    %32 = arith.addf %30, %31 : vector<8x128xf32>
    %33 = math.tanh %32 : vector<8x128xf32>
    %34 = arith.mulf %27, %33 : vector<8x128xf32>
    %35 = arith.index_cast %14 : i32 to index
    %c0_18 = arith.constant 0 : index
    %36 = vector.load %arg5[%35, %c0_18] : memref<64x128xf32, #tpu.memory_space<vmem>>, vector<8x128xf32>
    tpu.vector_store %arg5[%35, %c0_18], %34 {strides = array<i32>} : memref<64x128xf32, #tpu.memory_space<vmem>>, vector<8x128xf32>,
    %c1_i32 = arith.constant 1 : i32
    %c8_i32_19 = arith.constant 8 : i32
    %37 = arith.muli %c1_i32, %c8_i32_19 : i32
    %38 = tpu.assume_multiple %37, 8 : i32
    %39 = arith.index_cast %38 : i32 to index
    %c0_20 = arith.constant 0 : index
    %40 = vector.load %arg8[%39, %c0_20] : memref<64x512xf32, #tpu.memory_space<vmem>>, vector<8x512xf32>
    %cst_21 = arith.constant dense<0.000000e+00> : vector<8x512xf32>
    %41 = tpu.matmul %34, %10, %cst_21 {dimension_numbers = #tpu.dot_dimension_numbers<[1], [0], [0], [1], [0, 0, 1, 1], [], []>} : vector<8x128xf32>, vector<128x512xf32>, vector<8x512xf32> -> vector<8x512xf32>
    %42 = arith.addf %40, %41 : vector<8x512xf32>
    %43 = vector.extract_strided_slice %42 {offsets = [0, 0], sizes = [8, 384], strides = [1, 1]} : vector<8x512xf32> to vector<8x384xf32>
    %44 = arith.negf %43 : vector<8x384xf32>
    %45 = math.exp %44 : vector<8x384xf32>
    %cst_22 = arith.constant 1.000000e+00 : f32
    %46 = vector.broadcast %cst_22 : f32 to vector<8x384xf32>
    %47 = arith.addf %46, %45 : vector<8x384xf32>
    %48 = arith.divf %46, %47 : vector<8x384xf32>
    %49 = vector.extract_strided_slice %48 {offsets = [0, 0], sizes = [8, 128], strides = [1, 1]} : vector<8x384xf32> to vector<8x128xf32>
    %50 = vector.extract_strided_slice %48 {offsets = [0, 128], sizes = [8, 128], strides = [1, 1]} : vector<8x384xf32> to vector<8x128xf32>
    %51 = vector.extract_strided_slice %48 {offsets = [0, 256], sizes = [8, 128], strides = [1, 1]} : vector<8x384xf32> to vector<8x128xf32>
    %52 = vector.extract_strided_slice %42 {offsets = [0, 384], sizes = [8, 128], strides = [1, 1]} : vector<8x512xf32> to vector<8x128xf32>
    %53 = math.tanh %52 : vector<8x128xf32>
    %54 = arith.mulf %50, %32 : vector<8x128xf32>
    %55 = arith.mulf %49, %53 : vector<8x128xf32>
    %56 = arith.addf %54, %55 : vector<8x128xf32>
    %57 = math.tanh %56 : vector<8x128xf32>
    %58 = arith.mulf %51, %57 : vector<8x128xf32>
    %59 = arith.index_cast %38 : i32 to index
    %c0_23 = arith.constant 0 : index
    %60 = vector.load %arg5[%59, %c0_23] : memref<64x128xf32, #tpu.memory_space<vmem>>, vector<8x128xf32>
    tpu.vector_store %arg5[%59, %c0_23], %58 {strides = array<i32>} : memref<64x128xf32, #tpu.memory_space<vmem>>, vector<8x128xf32>,
    %c2_i32 = arith.constant 2 : i32
    %c8_i32_24 = arith.constant 8 : i32
    %61 = arith.muli %c2_i32, %c8_i32_24 : i32
    %62 = tpu.assume_multiple %61, 8 : i32
    %63 = arith.index_cast %62 : i32 to index
    %c0_25 = arith.constant 0 : index
    %64 = vector.load %arg8[%63, %c0_25] : memref<64x512xf32, #tpu.memory_space<vmem>>, vector<8x512xf32>
    %cst_26 = arith.constant dense<0.000000e+00> : vector<8x512xf32>
    %65 = tpu.matmul %58, %10, %cst_26 {dimension_numbers = #tpu.dot_dimension_numbers<[1], [0], [0], [1], [0, 0, 1, 1], [], []>} : vector<8x128xf32>, vector<128x512xf32>, vector<8x512xf32> -> vector<8x512xf32>
    %66 = arith.addf %64, %65 : vector<8x512xf32>
    %67 = vector.extract_strided_slice %66 {offsets = [0, 0], sizes = [8, 384], strides = [1, 1]} : vector<8x512xf32> to vector<8x384xf32>
    %68 = arith.negf %67 : vector<8x384xf32>
    %69 = math.exp %68 : vector<8x384xf32>
    %cst_27 = arith.constant 1.000000e+00 : f32
    %70 = vector.broadcast %cst_27 : f32 to vector<8x384xf32>
    %71 = arith.addf %70, %69 : vector<8x384xf32>
    %72 = arith.divf %70, %71 : vector<8x384xf32>
    %73 = vector.extract_strided_slice %72 {offsets = [0, 0], sizes = [8, 128], strides = [1, 1]} : vector<8x384xf32> to vector<8x128xf32>
    %74 = vector.extract_strided_slice %72 {offsets = [0, 128], sizes = [8, 128], strides = [1, 1]} : vector<8x384xf32> to vector<8x128xf32>
    %75 = vector.extract_strided_slice %72 {offsets = [0, 256], sizes = [8, 128], strides = [1, 1]} : vector<8x384xf32> to vector<8x128xf32>
    %76 = vector.extract_strided_slice %66 {offsets = [0, 384], sizes = [8, 128], strides = [1, 1]} : vector<8x512xf32> to vector<8x128xf32>
    %77 = math.tanh %76 : vector<8x128xf32>
    %78 = arith.mulf %74, %56 : vector<8x128xf32>
    %79 = arith.mulf %73, %77 : vector<8x128xf32>
    %80 = arith.addf %78, %79 : vector<8x128xf32>
    %81 = math.tanh %80 : vector<8x128xf32>
    %82 = arith.mulf %75, %81 : vector<8x128xf32>
    %83 = arith.index_cast %62 : i32 to index
    %c0_28 = arith.constant 0 : index
    %84 = vector.load %arg5[%83, %c0_28] : memref<64x128xf32, #tpu.memory_space<vmem>>, vector<8x128xf32>
    tpu.vector_store %arg5[%83, %c0_28], %82 {strides = array<i32>} : memref<64x128xf32, #tpu.memory_space<vmem>>, vector<8x128xf32>,
    %c3_i32 = arith.constant 3 : i32
    %c8_i32_29 = arith.constant 8 : i32
    %85 = arith.muli %c3_i32, %c8_i32_29 : i32
    %86 = tpu.assume_multiple %85, 8 : i32
    %87 = arith.index_cast %86 : i32 to index
    %c0_30 = arith.constant 0 : index
    %88 = vector.load %arg8[%87, %c0_30] : memref<64x512xf32, #tpu.memory_space<vmem>>, vector<8x512xf32>
    %cst_31 = arith.constant dense<0.000000e+00> : vector<8x512xf32>
    %89 = tpu.matmul %82, %10, %cst_31 {dimension_numbers = #tpu.dot_dimension_numbers<[1], [0], [0], [1], [0, 0, 1, 1], [], []>} : vector<8x128xf32>, vector<128x512xf32>, vector<8x512xf32> -> vector<8x512xf32>
    %90 = arith.addf %88, %89 : vector<8x512xf32>
    %91 = vector.extract_strided_slice %90 {offsets = [0, 0], sizes = [8, 384], strides = [1, 1]} : vector<8x512xf32> to vector<8x384xf32>
    %92 = arith.negf %91 : vector<8x384xf32>
    %93 = math.exp %92 : vector<8x384xf32>
    %cst_32 = arith.constant 1.000000e+00 : f32
    %94 = vector.broadcast %cst_32 : f32 to vector<8x384xf32>
    %95 = arith.addf %94, %93 : vector<8x384xf32>
    %96 = arith.divf %94, %95 : vector<8x384xf32>
    %97 = vector.extract_strided_slice %96 {offsets = [0, 0], sizes = [8, 128], strides = [1, 1]} : vector<8x384xf32> to vector<8x128xf32>
    %98 = vector.extract_strided_slice %96 {offsets = [0, 128], sizes = [8, 128], strides = [1, 1]} : vector<8x384xf32> to vector<8x128xf32>
    %99 = vector.extract_strided_slice %96 {offsets = [0, 256], sizes = [8, 128], strides = [1, 1]} : vector<8x384xf32> to vector<8x128xf32>
    %100 = vector.extract_strided_slice %90 {offsets = [0, 384], sizes = [8, 128], strides = [1, 1]} : vector<8x512xf32> to vector<8x128xf32>
    %101 = math.tanh %100 : vector<8x128xf32>
    %102 = arith.mulf %98, %80 : vector<8x128xf32>
    %103 = arith.mulf %97, %101 : vector<8x128xf32>
    %104 = arith.addf %102, %103 : vector<8x128xf32>
    %105 = math.tanh %104 : vector<8x128xf32>
    %106 = arith.mulf %99, %105 : vector<8x128xf32>
    %107 = arith.index_cast %86 : i32 to index
    %c0_33 = arith.constant 0 : index
    %108 = vector.load %arg5[%107, %c0_33] : memref<64x128xf32, #tpu.memory_space<vmem>>, vector<8x128xf32>
    tpu.vector_store %arg5[%107, %c0_33], %106 {strides = array<i32>} : memref<64x128xf32, #tpu.memory_space<vmem>>, vector<8x128xf32>,
    %c4_i32 = arith.constant 4 : i32
    %c8_i32_34 = arith.constant 8 : i32
    %109 = arith.muli %c4_i32, %c8_i32_34 : i32
    %110 = tpu.assume_multiple %109, 8 : i32
    %111 = arith.index_cast %110 : i32 to index
    %c0_35 = arith.constant 0 : index
    %112 = vector.load %arg8[%111, %c0_35] : memref<64x512xf32, #tpu.memory_space<vmem>>, vector<8x512xf32>
    %cst_36 = arith.constant dense<0.000000e+00> : vector<8x512xf32>
    %113 = tpu.matmul %106, %10, %cst_36 {dimension_numbers = #tpu.dot_dimension_numbers<[1], [0], [0], [1], [0, 0, 1, 1], [], []>} : vector<8x128xf32>, vector<128x512xf32>, vector<8x512xf32> -> vector<8x512xf32>
    %114 = arith.addf %112, %113 : vector<8x512xf32>
    %115 = vector.extract_strided_slice %114 {offsets = [0, 0], sizes = [8, 384], strides = [1, 1]} : vector<8x512xf32> to vector<8x384xf32>
    %116 = arith.negf %115 : vector<8x384xf32>
    %117 = math.exp %116 : vector<8x384xf32>
    %cst_37 = arith.constant 1.000000e+00 : f32
    %118 = vector.broadcast %cst_37 : f32 to vector<8x384xf32>
    %119 = arith.addf %118, %117 : vector<8x384xf32>
    %120 = arith.divf %118, %119 : vector<8x384xf32>
    %121 = vector.extract_strided_slice %120 {offsets = [0, 0], sizes = [8, 128], strides = [1, 1]} : vector<8x384xf32> to vector<8x128xf32>
    %122 = vector.extract_strided_slice %120 {offsets = [0, 128], sizes = [8, 128], strides = [1, 1]} : vector<8x384xf32> to vector<8x128xf32>
    %123 = vector.extract_strided_slice %120 {offsets = [0, 256], sizes = [8, 128], strides = [1, 1]} : vector<8x384xf32> to vector<8x128xf32>
    %124 = vector.extract_strided_slice %114 {offsets = [0, 384], sizes = [8, 128], strides = [1, 1]} : vector<8x512xf32> to vector<8x128xf32>
    %125 = math.tanh %124 : vector<8x128xf32>
    %126 = arith.mulf %122, %104 : vector<8x128xf32>
    %127 = arith.mulf %121, %125 : vector<8x128xf32>
    %128 = arith.addf %126, %127 : vector<8x128xf32>
    %129 = math.tanh %128 : vector<8x128xf32>
    %130 = arith.mulf %123, %129 : vector<8x128xf32>
    %131 = arith.index_cast %110 : i32 to index
    %c0_38 = arith.constant 0 : index
    %132 = vector.load %arg5[%131, %c0_38] : memref<64x128xf32, #tpu.memory_space<vmem>>, vector<8x128xf32>
    tpu.vector_store %arg5[%131, %c0_38], %130 {strides = array<i32>} : memref<64x128xf32, #tpu.memory_space<vmem>>, vector<8x128xf32>,
    %c5_i32 = arith.constant 5 : i32
    %c8_i32_39 = arith.constant 8 : i32
    %133 = arith.muli %c5_i32, %c8_i32_39 : i32
    %134 = tpu.assume_multiple %133, 8 : i32
    %135 = arith.index_cast %134 : i32 to index
    %c0_40 = arith.constant 0 : index
    %136 = vector.load %arg8[%135, %c0_40] : memref<64x512xf32, #tpu.memory_space<vmem>>, vector<8x512xf32>
    %cst_41 = arith.constant dense<0.000000e+00> : vector<8x512xf32>
    %137 = tpu.matmul %130, %10, %cst_41 {dimension_numbers = #tpu.dot_dimension_numbers<[1], [0], [0], [1], [0, 0, 1, 1], [], []>} : vector<8x128xf32>, vector<128x512xf32>, vector<8x512xf32> -> vector<8x512xf32>
    %138 = arith.addf %136, %137 : vector<8x512xf32>
    %139 = vector.extract_strided_slice %138 {offsets = [0, 0], sizes = [8, 384], strides = [1, 1]} : vector<8x512xf32> to vector<8x384xf32>
    %140 = arith.negf %139 : vector<8x384xf32>
    %141 = math.exp %140 : vector<8x384xf32>
    %cst_42 = arith.constant 1.000000e+00 : f32
    %142 = vector.broadcast %cst_42 : f32 to vector<8x384xf32>
    %143 = arith.addf %142, %141 : vector<8x384xf32>
    %144 = arith.divf %142, %143 : vector<8x384xf32>
    %145 = vector.extract_strided_slice %144 {offsets = [0, 0], sizes = [8, 128], strides = [1, 1]} : vector<8x384xf32> to vector<8x128xf32>
    %146 = vector.extract_strided_slice %144 {offsets = [0, 128], sizes = [8, 128], strides = [1, 1]} : vector<8x384xf32> to vector<8x128xf32>
    %147 = vector.extract_strided_slice %144 {offsets = [0, 256], sizes = [8, 128], strides = [1, 1]} : vector<8x384xf32> to vector<8x128xf32>
    %148 = vector.extract_strided_slice %138 {offsets = [0, 384], sizes = [8, 128], strides = [1, 1]} : vector<8x512xf32> to vector<8x128xf32>
    %149 = math.tanh %148 : vector<8x128xf32>
    %150 = arith.mulf %146, %128 : vector<8x128xf32>
    %151 = arith.mulf %145, %149 : vector<8x128xf32>
    %152 = arith.addf %150, %151 : vector<8x128xf32>
    %153 = math.tanh %152 : vector<8x128xf32>
    %154 = arith.mulf %147, %153 : vector<8x128xf32>
    %155 = arith.index_cast %134 : i32 to index
    %c0_43 = arith.constant 0 : index
    %156 = vector.load %arg5[%155, %c0_43] : memref<64x128xf32, #tpu.memory_space<vmem>>, vector<8x128xf32>
    tpu.vector_store %arg5[%155, %c0_43], %154 {strides = array<i32>} : memref<64x128xf32, #tpu.memory_space<vmem>>, vector<8x128xf32>,
    %c6_i32 = arith.constant 6 : i32
    %c8_i32_44 = arith.constant 8 : i32
    %157 = arith.muli %c6_i32, %c8_i32_44 : i32
    %158 = tpu.assume_multiple %157, 8 : i32
    %159 = arith.index_cast %158 : i32 to index
    %c0_45 = arith.constant 0 : index
    %160 = vector.load %arg8[%159, %c0_45] : memref<64x512xf32, #tpu.memory_space<vmem>>, vector<8x512xf32>
    %cst_46 = arith.constant dense<0.000000e+00> : vector<8x512xf32>
    %161 = tpu.matmul %154, %10, %cst_46 {dimension_numbers = #tpu.dot_dimension_numbers<[1], [0], [0], [1], [0, 0, 1, 1], [], []>} : vector<8x128xf32>, vector<128x512xf32>, vector<8x512xf32> -> vector<8x512xf32>
    %162 = arith.addf %160, %161 : vector<8x512xf32>
    %163 = vector.extract_strided_slice %162 {offsets = [0, 0], sizes = [8, 384], strides = [1, 1]} : vector<8x512xf32> to vector<8x384xf32>
    %164 = arith.negf %163 : vector<8x384xf32>
    %165 = math.exp %164 : vector<8x384xf32>
    %cst_47 = arith.constant 1.000000e+00 : f32
    %166 = vector.broadcast %cst_47 : f32 to vector<8x384xf32>
    %167 = arith.addf %166, %165 : vector<8x384xf32>
    %168 = arith.divf %166, %167 : vector<8x384xf32>
    %169 = vector.extract_strided_slice %168 {offsets = [0, 0], sizes = [8, 128], strides = [1, 1]} : vector<8x384xf32> to vector<8x128xf32>
    %170 = vector.extract_strided_slice %168 {offsets = [0, 128], sizes = [8, 128], strides = [1, 1]} : vector<8x384xf32> to vector<8x128xf32>
    %171 = vector.extract_strided_slice %168 {offsets = [0, 256], sizes = [8, 128], strides = [1, 1]} : vector<8x384xf32> to vector<8x128xf32>
    %172 = vector.extract_strided_slice %162 {offsets = [0, 384], sizes = [8, 128], strides = [1, 1]} : vector<8x512xf32> to vector<8x128xf32>
    %173 = math.tanh %172 : vector<8x128xf32>
    %174 = arith.mulf %170, %152 : vector<8x128xf32>
    %175 = arith.mulf %169, %173 : vector<8x128xf32>
    %176 = arith.addf %174, %175 : vector<8x128xf32>
    %177 = math.tanh %176 : vector<8x128xf32>
    %178 = arith.mulf %171, %177 : vector<8x128xf32>
    %179 = arith.index_cast %158 : i32 to index
    %c0_48 = arith.constant 0 : index
    %180 = vector.load %arg5[%179, %c0_48] : memref<64x128xf32, #tpu.memory_space<vmem>>, vector<8x128xf32>
    tpu.vector_store %arg5[%179, %c0_48], %178 {strides = array<i32>} : memref<64x128xf32, #tpu.memory_space<vmem>>, vector<8x128xf32>,
    %c7_i32 = arith.constant 7 : i32
    %c8_i32_49 = arith.constant 8 : i32
    %181 = arith.muli %c7_i32, %c8_i32_49 : i32
    %182 = tpu.assume_multiple %181, 8 : i32
    %183 = arith.index_cast %182 : i32 to index
    %c0_50 = arith.constant 0 : index
    %184 = vector.load %arg8[%183, %c0_50] : memref<64x512xf32, #tpu.memory_space<vmem>>, vector<8x512xf32>
    %cst_51 = arith.constant dense<0.000000e+00> : vector<8x512xf32>
    %185 = tpu.matmul %178, %10, %cst_51 {dimension_numbers = #tpu.dot_dimension_numbers<[1], [0], [0], [1], [0, 0, 1, 1], [], []>} : vector<8x128xf32>, vector<128x512xf32>, vector<8x512xf32> -> vector<8x512xf32>
    %186 = arith.addf %184, %185 : vector<8x512xf32>
    %187 = vector.extract_strided_slice %186 {offsets = [0, 0], sizes = [8, 384], strides = [1, 1]} : vector<8x512xf32> to vector<8x384xf32>
    %188 = arith.negf %187 : vector<8x384xf32>
    %189 = math.exp %188 : vector<8x384xf32>
    %cst_52 = arith.constant 1.000000e+00 : f32
    %190 = vector.broadcast %cst_52 : f32 to vector<8x384xf32>
    %191 = arith.addf %190, %189 : vector<8x384xf32>
    %192 = arith.divf %190, %191 : vector<8x384xf32>
    %193 = vector.extract_strided_slice %192 {offsets = [0, 0], sizes = [8, 128], strides = [1, 1]} : vector<8x384xf32> to vector<8x128xf32>
    %194 = vector.extract_strided_slice %192 {offsets = [0, 128], sizes = [8, 128], strides = [1, 1]} : vector<8x384xf32> to vector<8x128xf32>
    %195 = vector.extract_strided_slice %192 {offsets = [0, 256], sizes = [8, 128], strides = [1, 1]} : vector<8x384xf32> to vector<8x128xf32>
    %196 = vector.extract_strided_slice %186 {offsets = [0, 384], sizes = [8, 128], strides = [1, 1]} : vector<8x512xf32> to vector<8x128xf32>
    %197 = math.tanh %196 : vector<8x128xf32>
    %198 = arith.mulf %194, %176 : vector<8x128xf32>
    %199 = arith.mulf %193, %197 : vector<8x128xf32>
    %200 = arith.addf %198, %199 : vector<8x128xf32>
    %201 = math.tanh %200 : vector<8x128xf32>
    %202 = arith.mulf %195, %201 : vector<8x128xf32>
    %203 = arith.index_cast %182 : i32 to index
    %c0_53 = arith.constant 0 : index
    %204 = vector.load %arg5[%203, %c0_53] : memref<64x128xf32, #tpu.memory_space<vmem>>, vector<8x128xf32>
    tpu.vector_store %arg5[%203, %c0_53], %202 {strides = array<i32>} : memref<64x128xf32, #tpu.memory_space<vmem>>, vector<8x128xf32>,
    %c8_i32_54 = arith.constant 8 : i32
    %c0_55 = arith.constant 0 : index
    %c0_56 = arith.constant 0 : index
    %205 = vector.load %arg9[%c0_55, %c0_56] : memref<8x128xf32, #tpu.memory_space<vmem>>, vector<8x128xf32>
    tpu.vector_store %arg9[%c0_55, %c0_56], %202 {strides = array<i32>} : memref<8x128xf32, #tpu.memory_space<vmem>>, vector<8x128xf32>,
    %c0_57 = arith.constant 0 : index
    %c0_58 = arith.constant 0 : index
    %206 = vector.load %arg10[%c0_57, %c0_58] : memref<8x128xf32, #tpu.memory_space<vmem>>, vector<8x128xf32>
    tpu.vector_store %arg10[%c0_57, %c0_58], %200 {strides = array<i32>} : memref<8x128xf32, #tpu.memory_space<vmem>>, vector<8x128xf32>,
    %c0_59 = arith.constant 0 : index
    %c0_60 = arith.constant 0 : index
    %207 = vector.load %arg6[%c0_59, %c0_60] : memref<8x128xf32, #tpu.memory_space<vmem>>, vector<8x128xf32>
    tpu.vector_store %arg6[%c0_59, %c0_60], %202 {strides = array<i32>} : memref<8x128xf32, #tpu.memory_space<vmem>>, vector<8x128xf32>,
    %c0_61 = arith.constant 0 : index
    %c0_62 = arith.constant 0 : index
    %208 = vector.load %arg7[%c0_61, %c0_62] : memref<8x128xf32, #tpu.memory_space<vmem>>, vector<8x128xf32>
    tpu.vector_store %arg7[%c0_61, %c0_62], %200 {strides = array<i32>} : memref<8x128xf32, #tpu.memory_space<vmem>>, vector<8x128xf32>,
    return
  }
  func.func @transform_0(%arg0: i32) -> (i32, i32) {
    %c0_i32 = arith.constant 0 : i32
    %c0_i32_0 = arith.constant 0 : i32
    return %arg0, %c0_i32 : i32, i32
  }
  func.func @transform_1(%arg0: i32) -> (i32, i32) {
    %c0_i32 = arith.constant 0 : i32
    %c0_i32_0 = arith.constant 0 : i32
    %c0_i32_1 = arith.constant 0 : i32
    return %c0_i32, %c0_i32_0 : i32, i32
  }
  func.func @transform_2(%arg0: i32) -> (i32, i32) {
    %c0_i32 = arith.constant 0 : i32
    %c0_i32_0 = arith.constant 0 : i32
    %c0_i32_1 = arith.constant 0 : i32
    return %c0_i32, %c0_i32_0 : i32, i32
  }
  func.func @transform_3(%arg0: i32) -> (i32, i32) {
    %c0_i32 = arith.constant 0 : i32
    %c0_i32_0 = arith.constant 0 : i32
    %c0_i32_1 = arith.constant 0 : i32
    return %c0_i32, %c0_i32_0 : i32, i32
  }
  func.func @transform_4(%arg0: i32) -> (i32, i32) {
    %c0_i32 = arith.constant 0 : i32
    %c0_i32_0 = arith.constant 0 : i32
    return %arg0, %c0_i32 : i32, i32
  }
  func.func @transform_5(%arg0: i32) -> (i32, i32) {
    %c0_i32 = arith.constant 0 : i32
    %c0_i32_0 = arith.constant 0 : i32
    %c0_i32_1 = arith.constant 0 : i32
    return %c0_i32, %c0_i32_0 : i32, i32
  }
  func.func @transform_6(%arg0: i32) -> (i32, i32) {
    %c0_i32 = arith.constant 0 : i32
    %c0_i32_0 = arith.constant 0 : i32
    %c0_i32_1 = arith.constant 0 : i32
    return %c0_i32, %c0_i32_0 : i32, i32
  }
}

module attributes {stable_mosaic.version = 11 : i64} {
  func.func @_lstm_chunk_kernel(%arg0: i32, %arg1: memref<64x16xf32, #tpu.memory_space<vmem>>, %arg2: memref<16x512xf32, #tpu.memory_space<vmem>>, %arg3: memref<128x512xf32, #tpu.memory_space<vmem>>, %arg4: memref<1x512xf32, #tpu.memory_space<vmem>>, %arg5: memref<64x128xf32, #tpu.memory_space<vmem>>, %arg6: memref<8x128xf32, #tpu.memory_space<vmem>>, %arg7: memref<8x128xf32, #tpu.memory_space<vmem>>, %arg8: memref<64x512xf32, #tpu.memory_space<vmem>>, %arg9: memref<8x128xf32, #tpu.memory_space<vmem>>, %arg10: memref<8x128xf32, #tpu.memory_space<vmem>>) attributes {dimension_semantics = [#tpu.dimension_semantics<arbitrary>], iteration_bounds = array<i64: 1>, scalar_prefetch = 0 : i64, scratch_operands = 3 : i64, tpu.core_type = #tpu.core_type<tc>, window_params = [{transform_indices = @transform_0, window_bounds = array<i64: 64, 16>}, {pipeline_mode = #tpu.pipeline_mode<synchronous>, transform_indices = @transform_1, window_bounds = array<i64: 16, 512>}, {pipeline_mode = #tpu.pipeline_mode<synchronous>, transform_indices = @transform_2, window_bounds = array<i64: 128, 512>}, {pipeline_mode = #tpu.pipeline_mode<synchronous>, transform_indices = @transform_3, window_bounds = array<i64: 1, 512>}, {transform_indices = @transform_4, window_bounds = array<i64: 64, 128>}, {pipeline_mode = #tpu.pipeline_mode<synchronous>, transform_indices = @transform_5, window_bounds = array<i64: 8, 128>}, {pipeline_mode = #tpu.pipeline_mode<synchronous>, transform_indices = @transform_6, window_bounds = array<i64: 8, 128>}]} {
    %c0_i32 = arith.constant 0 : i32
    %0 = arith.cmpi eq, %arg0, %c0_i32 : i32
    %1 = arith.extui %0 : i1 to i32
    %c0_i32_0 = arith.constant 0 : i32
    %2 = arith.cmpi ne, %1, %c0_i32_0 : i32
    scf.if %2 {
      %cst_63 = arith.constant 0.000000e+00 : f32
      %209 = vector.broadcast %cst_63 : f32 to vector<8x128xf32>
      %c0_64 = arith.constant 0 : index
      %c0_65 = arith.constant 0 : index
      %210 = vector.load %arg9[%c0_64, %c0_65] : memref<8x128xf32, #tpu.memory_space<vmem>>, vector<8x128xf32>
      tpu.vector_store %arg9[%c0_64, %c0_65], %209 {strides = array<i32>} : memref<8x128xf32, #tpu.memory_space<vmem>>, vector<8x128xf32>,
      %cst_66 = arith.constant 0.000000e+00 : f32
      %211 = vector.broadcast %cst_66 : f32 to vector<8x128xf32>
      %c0_67 = arith.constant 0 : index
      %c0_68 = arith.constant 0 : index
      %212 = vector.load %arg10[%c0_67, %c0_68] : memref<8x128xf32, #tpu.memory_space<vmem>>, vector<8x128xf32>
      tpu.vector_store %arg10[%c0_67, %c0_68], %211 {strides = array<i32>} : memref<8x128xf32, #tpu.memory_space<vmem>>, vector<8x128xf32>,
    } else {
    }
    %c0 = arith.constant 0 : index
    %c0_1 = arith.constant 0 : index
    %3 = vector.load %arg1[%c0, %c0_1] : memref<64x16xf32, #tpu.memory_space<vmem>>, vector<64x16xf32>
    %c0_2 = arith.constant 0 : index
    %c0_3 = arith.constant 0 : index
    %4 = vector.load %arg2[%c0_2, %c0_3] : memref<16x512xf32, #tpu.memory_space<vmem>>, vector<16x512xf32>
    %cst = arith.constant dense<0.000000e+00> : vector<64x512xf32>
    %5 = tpu.matmul %3, %4, %cst {dimension_numbers = #tpu.dot_dimension_numbers<[1], [0], [0], [1], [0, 0, 1, 1], [], []>} : vector<64x16xf32>, vector<16x512xf32>, vector<64x512xf32> -> vector<64x512xf32>
    %c0_4 = arith.constant 0 : index
    %c0_5 = arith.constant 0 : index
    %6 = vector.load %arg4[%c0_4, %c0_5] : memref<1x512xf32, #tpu.memory_space<vmem>>, vector<1x512xf32>
    %7 = vector.broadcast %6 : vector<1x512xf32> to vector<64x512xf32>
    %8 = arith.addf %5, %7 : vector<64x512xf32>
    %c0_6 = arith.constant 0 : index
    %c0_7 = arith.constant 0 : index
    %9 = vector.load %arg8[%c0_6, %c0_7] : memref<64x512xf32, #tpu.memory_space<vmem>>, vector<64x512xf32>
    tpu.vector_store %arg8[%c0_6, %c0_7], %8 {strides = array<i32>} : memref<64x512xf32, #tpu.memory_space<vmem>>, vector<64x512xf32>,
    %c0_8 = arith.constant 0 : index
    %c0_9 = arith.constant 0 : index
    %10 = vector.load %arg3[%c0_8, %c0_9] : memref<128x512xf32, #tpu.memory_space<vmem>>, vector<128x512xf32>
    %c0_10 = arith.constant 0 : index
    %c0_11 = arith.constant 0 : index
    %11 = vector.load %arg9[%c0_10, %c0_11] : memref<8x128xf32, #tpu.memory_space<vmem>>, vector<8x128xf32>
    %c0_12 = arith.constant 0 : index
    %c0_13 = arith.constant 0 : index
    %12 = vector.load %arg10[%c0_12, %c0_13] : memref<8x128xf32, #tpu.memory_space<vmem>>, vector<8x128xf32>
    %c0_i32_14 = arith.constant 0 : i32
    %c8_i32 = arith.constant 8 : i32
    %13 = arith.muli %c0_i32_14, %c8_i32 : i32
    %14 = tpu.assume_multiple %13, 8 : i32
    %15 = arith.index_cast %14 : i32 to index
    %c0_15 = arith.constant 0 : index
    %16 = vector.load %arg8[%15, %c0_15] : memref<64x512xf32, #tpu.memory_space<vmem>>, vector<8x512xf32>
    %cst_16 = arith.constant dense<0.000000e+00> : vector<8x512xf32>
    %17 = tpu.matmul %11, %10, %cst_16 {dimension_numbers = #tpu.dot_dimension_numbers<[1], [0], [0], [1], [0, 0, 1, 1], [], []>} : vector<8x128xf32>, vector<128x512xf32>, vector<8x512xf32> -> vector<8x512xf32>
    %18 = arith.addf %16, %17 : vector<8x512xf32>
    %19 = vector.extract_strided_slice %18 {offsets = [0, 0], sizes = [8, 384], strides = [1, 1]} : vector<8x512xf32> to vector<8x384xf32>
    %20 = arith.negf %19 : vector<8x384xf32>
    %21 = math.exp %20 : vector<8x384xf32>
    %cst_17 = arith.constant 1.000000e+00 : f32
    %22 = vector.broadcast %cst_17 : f32 to vector<8x384xf32>
    %23 = arith.addf %22, %21 : vector<8x384xf32>
    %24 = arith.divf %22, %23 : vector<8x384xf32>
    %25 = vector.extract_strided_slice %24 {offsets = [0, 0], sizes = [8, 128], strides = [1, 1]} : vector<8x384xf32> to vector<8x128xf32>
    %26 = vector.extract_strided_slice %24 {offsets = [0, 128], sizes = [8, 128], strides = [1, 1]} : vector<8x384xf32> to vector<8x128xf32>
    %27 = vector.extract_strided_slice %24 {offsets = [0, 256], sizes = [8, 128], strides = [1, 1]} : vector<8x384xf32> to vector<8x128xf32>
    %28 = vector.extract_strided_slice %18 {offsets = [0, 384], sizes = [8, 128], strides = [1, 1]} : vector<8x512xf32> to vector<8x128xf32>
    %29 = math.tanh %28 : vector<8x128xf32>
    %30 = arith.mulf %26, %12 : vector<8x128xf32>
    %31 = arith.mulf %25, %29 : vector<8x128xf32>
    %32 = arith.addf %30, %31 : vector<8x128xf32>
    %33 = math.tanh %32 : vector<8x128xf32>
    %34 = arith.mulf %27, %33 : vector<8x128xf32>
    %35 = arith.index_cast %14 : i32 to index
    %c0_18 = arith.constant 0 : index
    %36 = vector.load %arg5[%35, %c0_18] : memref<64x128xf32, #tpu.memory_space<vmem>>, vector<8x128xf32>
    tpu.vector_store %arg5[%35, %c0_18], %34 {strides = array<i32>} : memref<64x128xf32, #tpu.memory_space<vmem>>, vector<8x128xf32>,
    %c1_i32 = arith.constant 1 : i32
    %c8_i32_19 = arith.constant 8 : i32
    %37 = arith.muli %c1_i32, %c8_i32_19 : i32
    %38 = tpu.assume_multiple %37, 8 : i32
    %39 = arith.index_cast %38 : i32 to index
    %c0_20 = arith.constant 0 : index
    %40 = vector.load %arg8[%39, %c0_20] : memref<64x512xf32, #tpu.memory_space<vmem>>, vector<8x512xf32>
    %cst_21 = arith.constant dense<0.000000e+00> : vector<8x512xf32>
    %41 = tpu.matmul %34, %10, %cst_21 {dimension_numbers = #tpu.dot_dimension_numbers<[1], [0], [0], [1], [0, 0, 1, 1], [], []>} : vector<8x128xf32>, vector<128x512xf32>, vector<8x512xf32> -> vector<8x512xf32>
    %42 = arith.addf %40, %41 : vector<8x512xf32>
    %43 = vector.extract_strided_slice %42 {offsets = [0, 0], sizes = [8, 384], strides = [1, 1]} : vector<8x512xf32> to vector<8x384xf32>
    %44 = arith.negf %43 : vector<8x384xf32>
    %45 = math.exp %44 : vector<8x384xf32>
    %cst_22 = arith.constant 1.000000e+00 : f32
    %46 = vector.broadcast %cst_22 : f32 to vector<8x384xf32>
    %47 = arith.addf %46, %45 : vector<8x384xf32>
    %48 = arith.divf %46, %47 : vector<8x384xf32>
    %49 = vector.extract_strided_slice %48 {offsets = [0, 0], sizes = [8, 128], strides = [1, 1]} : vector<8x384xf32> to vector<8x128xf32>
    %50 = vector.extract_strided_slice %48 {offsets = [0, 128], sizes = [8, 128], strides = [1, 1]} : vector<8x384xf32> to vector<8x128xf32>
    %51 = vector.extract_strided_slice %48 {offsets = [0, 256], sizes = [8, 128], strides = [1, 1]} : vector<8x384xf32> to vector<8x128xf32>
    %52 = vector.extract_strided_slice %42 {offsets = [0, 384], sizes = [8, 128], strides = [1, 1]} : vector<8x512xf32> to vector<8x128xf32>
    %53 = math.tanh %52 : vector<8x128xf32>
    %54 = arith.mulf %50, %32 : vector<8x128xf32>
    %55 = arith.mulf %49, %53 : vector<8x128xf32>
    %56 = arith.addf %54, %55 : vector<8x128xf32>
    %57 = math.tanh %56 : vector<8x128xf32>
    %58 = arith.mulf %51, %57 : vector<8x128xf32>
    %59 = arith.index_cast %38 : i32 to index
    %c0_23 = arith.constant 0 : index
    %60 = vector.load %arg5[%59, %c0_23] : memref<64x128xf32, #tpu.memory_space<vmem>>, vector<8x128xf32>
    tpu.vector_store %arg5[%59, %c0_23], %58 {strides = array<i32>} : memref<64x128xf32, #tpu.memory_space<vmem>>, vector<8x128xf32>,
    %c2_i32 = arith.constant 2 : i32
    %c8_i32_24 = arith.constant 8 : i32
    %61 = arith.muli %c2_i32, %c8_i32_24 : i32
    %62 = tpu.assume_multiple %61, 8 : i32
    %63 = arith.index_cast %62 : i32 to index
    %c0_25 = arith.constant 0 : index
    %64 = vector.load %arg8[%63, %c0_25] : memref<64x512xf32, #tpu.memory_space<vmem>>, vector<8x512xf32>
    %cst_26 = arith.constant dense<0.000000e+00> : vector<8x512xf32>
    %65 = tpu.matmul %58, %10, %cst_26 {dimension_numbers = #tpu.dot_dimension_numbers<[1], [0], [0], [1], [0, 0, 1, 1], [], []>} : vector<8x128xf32>, vector<128x512xf32>, vector<8x512xf32> -> vector<8x512xf32>
    %66 = arith.addf %64, %65 : vector<8x512xf32>
    %67 = vector.extract_strided_slice %66 {offsets = [0, 0], sizes = [8, 384], strides = [1, 1]} : vector<8x512xf32> to vector<8x384xf32>
    %68 = arith.negf %67 : vector<8x384xf32>
    %69 = math.exp %68 : vector<8x384xf32>
    %cst_27 = arith.constant 1.000000e+00 : f32
    %70 = vector.broadcast %cst_27 : f32 to vector<8x384xf32>
    %71 = arith.addf %70, %69 : vector<8x384xf32>
    %72 = arith.divf %70, %71 : vector<8x384xf32>
    %73 = vector.extract_strided_slice %72 {offsets = [0, 0], sizes = [8, 128], strides = [1, 1]} : vector<8x384xf32> to vector<8x128xf32>
    %74 = vector.extract_strided_slice %72 {offsets = [0, 128], sizes = [8, 128], strides = [1, 1]} : vector<8x384xf32> to vector<8x128xf32>
    %75 = vector.extract_strided_slice %72 {offsets = [0, 256], sizes = [8, 128], strides = [1, 1]} : vector<8x384xf32> to vector<8x128xf32>
    %76 = vector.extract_strided_slice %66 {offsets = [0, 384], sizes = [8, 128], strides = [1, 1]} : vector<8x512xf32> to vector<8x128xf32>
    %77 = math.tanh %76 : vector<8x128xf32>
    %78 = arith.mulf %74, %56 : vector<8x128xf32>
    %79 = arith.mulf %73, %77 : vector<8x128xf32>
    %80 = arith.addf %78, %79 : vector<8x128xf32>
    %81 = math.tanh %80 : vector<8x128xf32>
    %82 = arith.mulf %75, %81 : vector<8x128xf32>
    %83 = arith.index_cast %62 : i32 to index
    %c0_28 = arith.constant 0 : index
    %84 = vector.load %arg5[%83, %c0_28] : memref<64x128xf32, #tpu.memory_space<vmem>>, vector<8x128xf32>
    tpu.vector_store %arg5[%83, %c0_28], %82 {strides = array<i32>} : memref<64x128xf32, #tpu.memory_space<vmem>>, vector<8x128xf32>,
    %c3_i32 = arith.constant 3 : i32
    %c8_i32_29 = arith.constant 8 : i32
    %85 = arith.muli %c3_i32, %c8_i32_29 : i32
    %86 = tpu.assume_multiple %85, 8 : i32
    %87 = arith.index_cast %86 : i32 to index
    %c0_30 = arith.constant 0 : index
    %88 = vector.load %arg8[%87, %c0_30] : memref<64x512xf32, #tpu.memory_space<vmem>>, vector<8x512xf32>
    %cst_31 = arith.constant dense<0.000000e+00> : vector<8x512xf32>
    %89 = tpu.matmul %82, %10, %cst_31 {dimension_numbers = #tpu.dot_dimension_numbers<[1], [0], [0], [1], [0, 0, 1, 1], [], []>} : vector<8x128xf32>, vector<128x512xf32>, vector<8x512xf32> -> vector<8x512xf32>
    %90 = arith.addf %88, %89 : vector<8x512xf32>
    %91 = vector.extract_strided_slice %90 {offsets = [0, 0], sizes = [8, 384], strides = [1, 1]} : vector<8x512xf32> to vector<8x384xf32>
    %92 = arith.negf %91 : vector<8x384xf32>
    %93 = math.exp %92 : vector<8x384xf32>
    %cst_32 = arith.constant 1.000000e+00 : f32
    %94 = vector.broadcast %cst_32 : f32 to vector<8x384xf32>
    %95 = arith.addf %94, %93 : vector<8x384xf32>
    %96 = arith.divf %94, %95 : vector<8x384xf32>
    %97 = vector.extract_strided_slice %96 {offsets = [0, 0], sizes = [8, 128], strides = [1, 1]} : vector<8x384xf32> to vector<8x128xf32>
    %98 = vector.extract_strided_slice %96 {offsets = [0, 128], sizes = [8, 128], strides = [1, 1]} : vector<8x384xf32> to vector<8x128xf32>
    %99 = vector.extract_strided_slice %96 {offsets = [0, 256], sizes = [8, 128], strides = [1, 1]} : vector<8x384xf32> to vector<8x128xf32>
    %100 = vector.extract_strided_slice %90 {offsets = [0, 384], sizes = [8, 128], strides = [1, 1]} : vector<8x512xf32> to vector<8x128xf32>
    %101 = math.tanh %100 : vector<8x128xf32>
    %102 = arith.mulf %98, %80 : vector<8x128xf32>
    %103 = arith.mulf %97, %101 : vector<8x128xf32>
    %104 = arith.addf %102, %103 : vector<8x128xf32>
    %105 = math.tanh %104 : vector<8x128xf32>
    %106 = arith.mulf %99, %105 : vector<8x128xf32>
    %107 = arith.index_cast %86 : i32 to index
    %c0_33 = arith.constant 0 : index
    %108 = vector.load %arg5[%107, %c0_33] : memref<64x128xf32, #tpu.memory_space<vmem>>, vector<8x128xf32>
    tpu.vector_store %arg5[%107, %c0_33], %106 {strides = array<i32>} : memref<64x128xf32, #tpu.memory_space<vmem>>, vector<8x128xf32>,
    %c4_i32 = arith.constant 4 : i32
    %c8_i32_34 = arith.constant 8 : i32
    %109 = arith.muli %c4_i32, %c8_i32_34 : i32
    %110 = tpu.assume_multiple %109, 8 : i32
    %111 = arith.index_cast %110 : i32 to index
    %c0_35 = arith.constant 0 : index
    %112 = vector.load %arg8[%111, %c0_35] : memref<64x512xf32, #tpu.memory_space<vmem>>, vector<8x512xf32>
    %cst_36 = arith.constant dense<0.000000e+00> : vector<8x512xf32>
    %113 = tpu.matmul %106, %10, %cst_36 {dimension_numbers = #tpu.dot_dimension_numbers<[1], [0], [0], [1], [0, 0, 1, 1], [], []>} : vector<8x128xf32>, vector<128x512xf32>, vector<8x512xf32> -> vector<8x512xf32>
    %114 = arith.addf %112, %113 : vector<8x512xf32>
    %115 = vector.extract_strided_slice %114 {offsets = [0, 0], sizes = [8, 384], strides = [1, 1]} : vector<8x512xf32> to vector<8x384xf32>
    %116 = arith.negf %115 : vector<8x384xf32>
    %117 = math.exp %116 : vector<8x384xf32>
    %cst_37 = arith.constant 1.000000e+00 : f32
    %118 = vector.broadcast %cst_37 : f32 to vector<8x384xf32>
    %119 = arith.addf %118, %117 : vector<8x384xf32>
    %120 = arith.divf %118, %119 : vector<8x384xf32>
    %121 = vector.extract_strided_slice %120 {offsets = [0, 0], sizes = [8, 128], strides = [1, 1]} : vector<8x384xf32> to vector<8x128xf32>
    %122 = vector.extract_strided_slice %120 {offsets = [0, 128], sizes = [8, 128], strides = [1, 1]} : vector<8x384xf32> to vector<8x128xf32>
    %123 = vector.extract_strided_slice %120 {offsets = [0, 256], sizes = [8, 128], strides = [1, 1]} : vector<8x384xf32> to vector<8x128xf32>
    %124 = vector.extract_strided_slice %114 {offsets = [0, 384], sizes = [8, 128], strides = [1, 1]} : vector<8x512xf32> to vector<8x128xf32>
    %125 = math.tanh %124 : vector<8x128xf32>
    %126 = arith.mulf %122, %104 : vector<8x128xf32>
    %127 = arith.mulf %121, %125 : vector<8x128xf32>
    %128 = arith.addf %126, %127 : vector<8x128xf32>
    %129 = math.tanh %128 : vector<8x128xf32>
    %130 = arith.mulf %123, %129 : vector<8x128xf32>
    %131 = arith.index_cast %110 : i32 to index
    %c0_38 = arith.constant 0 : index
    %132 = vector.load %arg5[%131, %c0_38] : memref<64x128xf32, #tpu.memory_space<vmem>>, vector<8x128xf32>
    tpu.vector_store %arg5[%131, %c0_38], %130 {strides = array<i32>} : memref<64x128xf32, #tpu.memory_space<vmem>>, vector<8x128xf32>,
    %c5_i32 = arith.constant 5 : i32
    %c8_i32_39 = arith.constant 8 : i32
    %133 = arith.muli %c5_i32, %c8_i32_39 : i32
    %134 = tpu.assume_multiple %133, 8 : i32
    %135 = arith.index_cast %134 : i32 to index
    %c0_40 = arith.constant 0 : index
    %136 = vector.load %arg8[%135, %c0_40] : memref<64x512xf32, #tpu.memory_space<vmem>>, vector<8x512xf32>
    %cst_41 = arith.constant dense<0.000000e+00> : vector<8x512xf32>
    %137 = tpu.matmul %130, %10, %cst_41 {dimension_numbers = #tpu.dot_dimension_numbers<[1], [0], [0], [1], [0, 0, 1, 1], [], []>} : vector<8x128xf32>, vector<128x512xf32>, vector<8x512xf32> -> vector<8x512xf32>
    %138 = arith.addf %136, %137 : vector<8x512xf32>
    %139 = vector.extract_strided_slice %138 {offsets = [0, 0], sizes = [8, 384], strides = [1, 1]} : vector<8x512xf32> to vector<8x384xf32>
    %140 = arith.negf %139 : vector<8x384xf32>
    %141 = math.exp %140 : vector<8x384xf32>
    %cst_42 = arith.constant 1.000000e+00 : f32
    %142 = vector.broadcast %cst_42 : f32 to vector<8x384xf32>
    %143 = arith.addf %142, %141 : vector<8x384xf32>
    %144 = arith.divf %142, %143 : vector<8x384xf32>
    %145 = vector.extract_strided_slice %144 {offsets = [0, 0], sizes = [8, 128], strides = [1, 1]} : vector<8x384xf32> to vector<8x128xf32>
    %146 = vector.extract_strided_slice %144 {offsets = [0, 128], sizes = [8, 128], strides = [1, 1]} : vector<8x384xf32> to vector<8x128xf32>
    %147 = vector.extract_strided_slice %144 {offsets = [0, 256], sizes = [8, 128], strides = [1, 1]} : vector<8x384xf32> to vector<8x128xf32>
    %148 = vector.extract_strided_slice %138 {offsets = [0, 384], sizes = [8, 128], strides = [1, 1]} : vector<8x512xf32> to vector<8x128xf32>
    %149 = math.tanh %148 : vector<8x128xf32>
    %150 = arith.mulf %146, %128 : vector<8x128xf32>
    %151 = arith.mulf %145, %149 : vector<8x128xf32>
    %152 = arith.addf %150, %151 : vector<8x128xf32>
    %153 = math.tanh %152 : vector<8x128xf32>
    %154 = arith.mulf %147, %153 : vector<8x128xf32>
    %155 = arith.index_cast %134 : i32 to index
    %c0_43 = arith.constant 0 : index
    %156 = vector.load %arg5[%155, %c0_43] : memref<64x128xf32, #tpu.memory_space<vmem>>, vector<8x128xf32>
    tpu.vector_store %arg5[%155, %c0_43], %154 {strides = array<i32>} : memref<64x128xf32, #tpu.memory_space<vmem>>, vector<8x128xf32>,
    %c6_i32 = arith.constant 6 : i32
    %c8_i32_44 = arith.constant 8 : i32
    %157 = arith.muli %c6_i32, %c8_i32_44 : i32
    %158 = tpu.assume_multiple %157, 8 : i32
    %159 = arith.index_cast %158 : i32 to index
    %c0_45 = arith.constant 0 : index
    %160 = vector.load %arg8[%159, %c0_45] : memref<64x512xf32, #tpu.memory_space<vmem>>, vector<8x512xf32>
    %cst_46 = arith.constant dense<0.000000e+00> : vector<8x512xf32>
    %161 = tpu.matmul %154, %10, %cst_46 {dimension_numbers = #tpu.dot_dimension_numbers<[1], [0], [0], [1], [0, 0, 1, 1], [], []>} : vector<8x128xf32>, vector<128x512xf32>, vector<8x512xf32> -> vector<8x512xf32>
    %162 = arith.addf %160, %161 : vector<8x512xf32>
    %163 = vector.extract_strided_slice %162 {offsets = [0, 0], sizes = [8, 384], strides = [1, 1]} : vector<8x512xf32> to vector<8x384xf32>
    %164 = arith.negf %163 : vector<8x384xf32>
    %165 = math.exp %164 : vector<8x384xf32>
    %cst_47 = arith.constant 1.000000e+00 : f32
    %166 = vector.broadcast %cst_47 : f32 to vector<8x384xf32>
    %167 = arith.addf %166, %165 : vector<8x384xf32>
    %168 = arith.divf %166, %167 : vector<8x384xf32>
    %169 = vector.extract_strided_slice %168 {offsets = [0, 0], sizes = [8, 128], strides = [1, 1]} : vector<8x384xf32> to vector<8x128xf32>
    %170 = vector.extract_strided_slice %168 {offsets = [0, 128], sizes = [8, 128], strides = [1, 1]} : vector<8x384xf32> to vector<8x128xf32>
    %171 = vector.extract_strided_slice %168 {offsets = [0, 256], sizes = [8, 128], strides = [1, 1]} : vector<8x384xf32> to vector<8x128xf32>
    %172 = vector.extract_strided_slice %162 {offsets = [0, 384], sizes = [8, 128], strides = [1, 1]} : vector<8x512xf32> to vector<8x128xf32>
    %173 = math.tanh %172 : vector<8x128xf32>
    %174 = arith.mulf %170, %152 : vector<8x128xf32>
    %175 = arith.mulf %169, %173 : vector<8x128xf32>
    %176 = arith.addf %174, %175 : vector<8x128xf32>
    %177 = math.tanh %176 : vector<8x128xf32>
    %178 = arith.mulf %171, %177 : vector<8x128xf32>
    %179 = arith.index_cast %158 : i32 to index
    %c0_48 = arith.constant 0 : index
    %180 = vector.load %arg5[%179, %c0_48] : memref<64x128xf32, #tpu.memory_space<vmem>>, vector<8x128xf32>
    tpu.vector_store %arg5[%179, %c0_48], %178 {strides = array<i32>} : memref<64x128xf32, #tpu.memory_space<vmem>>, vector<8x128xf32>,
    %c7_i32 = arith.constant 7 : i32
    %c8_i32_49 = arith.constant 8 : i32
    %181 = arith.muli %c7_i32, %c8_i32_49 : i32
    %182 = tpu.assume_multiple %181, 8 : i32
    %183 = arith.index_cast %182 : i32 to index
    %c0_50 = arith.constant 0 : index
    %184 = vector.load %arg8[%183, %c0_50] : memref<64x512xf32, #tpu.memory_space<vmem>>, vector<8x512xf32>
    %cst_51 = arith.constant dense<0.000000e+00> : vector<8x512xf32>
    %185 = tpu.matmul %178, %10, %cst_51 {dimension_numbers = #tpu.dot_dimension_numbers<[1], [0], [0], [1], [0, 0, 1, 1], [], []>} : vector<8x128xf32>, vector<128x512xf32>, vector<8x512xf32> -> vector<8x512xf32>
    %186 = arith.addf %184, %185 : vector<8x512xf32>
    %187 = vector.extract_strided_slice %186 {offsets = [0, 0], sizes = [8, 384], strides = [1, 1]} : vector<8x512xf32> to vector<8x384xf32>
    %188 = arith.negf %187 : vector<8x384xf32>
    %189 = math.exp %188 : vector<8x384xf32>
    %cst_52 = arith.constant 1.000000e+00 : f32
    %190 = vector.broadcast %cst_52 : f32 to vector<8x384xf32>
    %191 = arith.addf %190, %189 : vector<8x384xf32>
    %192 = arith.divf %190, %191 : vector<8x384xf32>
    %193 = vector.extract_strided_slice %192 {offsets = [0, 0], sizes = [8, 128], strides = [1, 1]} : vector<8x384xf32> to vector<8x128xf32>
    %194 = vector.extract_strided_slice %192 {offsets = [0, 128], sizes = [8, 128], strides = [1, 1]} : vector<8x384xf32> to vector<8x128xf32>
    %195 = vector.extract_strided_slice %192 {offsets = [0, 256], sizes = [8, 128], strides = [1, 1]} : vector<8x384xf32> to vector<8x128xf32>
    %196 = vector.extract_strided_slice %186 {offsets = [0, 384], sizes = [8, 128], strides = [1, 1]} : vector<8x512xf32> to vector<8x128xf32>
    %197 = math.tanh %196 : vector<8x128xf32>
    %198 = arith.mulf %194, %176 : vector<8x128xf32>
    %199 = arith.mulf %193, %197 : vector<8x128xf32>
    %200 = arith.addf %198, %199 : vector<8x128xf32>
    %201 = math.tanh %200 : vector<8x128xf32>
    %202 = arith.mulf %195, %201 : vector<8x128xf32>
    %203 = arith.index_cast %182 : i32 to index
    %c0_53 = arith.constant 0 : index
    %204 = vector.load %arg5[%203, %c0_53] : memref<64x128xf32, #tpu.memory_space<vmem>>, vector<8x128xf32>
    tpu.vector_store %arg5[%203, %c0_53], %202 {strides = array<i32>} : memref<64x128xf32, #tpu.memory_space<vmem>>, vector<8x128xf32>,
    %c8_i32_54 = arith.constant 8 : i32
    %c0_55 = arith.constant 0 : index
    %c0_56 = arith.constant 0 : index
    %205 = vector.load %arg9[%c0_55, %c0_56] : memref<8x128xf32, #tpu.memory_space<vmem>>, vector<8x128xf32>
    tpu.vector_store %arg9[%c0_55, %c0_56], %202 {strides = array<i32>} : memref<8x128xf32, #tpu.memory_space<vmem>>, vector<8x128xf32>,
    %c0_57 = arith.constant 0 : index
    %c0_58 = arith.constant 0 : index
    %206 = vector.load %arg10[%c0_57, %c0_58] : memref<8x128xf32, #tpu.memory_space<vmem>>, vector<8x128xf32>
    tpu.vector_store %arg10[%c0_57, %c0_58], %200 {strides = array<i32>} : memref<8x128xf32, #tpu.memory_space<vmem>>, vector<8x128xf32>,
    %c0_59 = arith.constant 0 : index
    %c0_60 = arith.constant 0 : index
    %207 = vector.load %arg6[%c0_59, %c0_60] : memref<8x128xf32, #tpu.memory_space<vmem>>, vector<8x128xf32>
    tpu.vector_store %arg6[%c0_59, %c0_60], %202 {strides = array<i32>} : memref<8x128xf32, #tpu.memory_space<vmem>>, vector<8x128xf32>,
    %c0_61 = arith.constant 0 : index
    %c0_62 = arith.constant 0 : index
    %208 = vector.load %arg7[%c0_61, %c0_62] : memref<8x128xf32, #tpu.memory_space<vmem>>, vector<8x128xf32>
    tpu.vector_store %arg7[%c0_61, %c0_62], %200 {strides = array<i32>} : memref<8x128xf32, #tpu.memory_space<vmem>>, vector<8x128xf32>,
    return
  }
  func.func @transform_0(%arg0: i32) -> (i32, i32) {
    %c0_i32 = arith.constant 0 : i32
    %c0_i32_0 = arith.constant 0 : i32
    return %arg0, %c0_i32 : i32, i32
  }
  func.func @transform_1(%arg0: i32) -> (i32, i32) {
    %c0_i32 = arith.constant 0 : i32
    %c0_i32_0 = arith.constant 0 : i32
    %c0_i32_1 = arith.constant 0 : i32
    return %c0_i32, %c0_i32_0 : i32, i32
  }
  func.func @transform_2(%arg0: i32) -> (i32, i32) {
    %c0_i32 = arith.constant 0 : i32
    %c0_i32_0 = arith.constant 0 : i32
    %c0_i32_1 = arith.constant 0 : i32
    return %c0_i32, %c0_i32_0 : i32, i32
  }
  func.func @transform_3(%arg0: i32) -> (i32, i32) {
    %c0_i32 = arith.constant 0 : i32
    %c0_i32_0 = arith.constant 0 : i32
    %c0_i32_1 = arith.constant 0 : i32
    return %c0_i32, %c0_i32_0 : i32, i32
  }
  func.func @transform_4(%arg0: i32) -> (i32, i32) {
    %c0_i32 = arith.constant 0 : i32
    %c0_i32_0 = arith.constant 0 : i32
    return %arg0, %c0_i32 : i32, i32
  }
  func.func @transform_5(%arg0: i32) -> (i32, i32) {
    %c0_i32 = arith.constant 0 : i32
    %c0_i32_0 = arith.constant 0 : i32
    %c0_i32_1 = arith.constant 0 : i32
    return %c0_i32, %c0_i32_0 : i32, i32
  }
  func.func @transform_6(%arg0: i32) -> (i32, i32) {
    %c0_i32 = arith.constant 0 : i32
    %c0_i32_0 = arith.constant 0 : i32
    %c0_i32_1 = arith.constant 0 : i32
    return %c0_i32, %c0_i32_0 : i32, i32
  }
}

</mosaic_0001>

<bundles_post_ra>
// kernel: tpu_custom_call.1
= control target key start
LH: loop header
LB: loop body
LE: loop exit
PB: predicated region body
PF: predicated region fallthrough
CT: control target
= control target key end

     0   :  { %12 = vsyncpa [#allocation6], 0  ;;  %s3361_s0 = inlined_call_operand.vmem [shape: f32[64,16], index: 0, kind: input, shape index: {}]   ;;  %s3362_s1 = inlined_call_operand.vmem [shape: f32[16,512], index: 1, kind: input, shape index: {}]   ;;  %s3363_s2 = inlined_call_operand.hbm [shape: f32[128,512], index: 2, kind: input, shape index: {}]   ;;  %s3364_s3 = inlined_call_operand.vmem [shape: f32[1,512], index: 3, kind: input, shape index: {}]   ;;  %s3365_s4 = inlined_call_operand.hbm [shape: f32[64,128], index: 4, kind: output, shape index: {0}]   ;;  %s3366_s5 = inlined_call_operand.hbm [shape: f32[8,128], index: 5, kind: output, shape index: {1}]   ;;  %s3367_s6 = inlined_call_operand.hbm [shape: f32[8,128], index: 6, kind: output, shape index: {2}]  }
   0x1   :  { %13 = vsyncpa [#allocation7], 0 }
   0x2   :  { %14 = vsyncpa [#allocation10], 0  ;;  %s2770_s21 = smov [#allocation5]   ;;  %s2676_s25 = scalar_lea.hbm %s3363_s2, 8192 }
   0x3   :  { %s24_s22 = sshll.u32 %s2770_s21, 4  ;;  %p2677_p0 = scmp.ne.s32.totalorder %s3363_s2, %s2676_s25  ;;  %s25_s22 = int_to_ptr.vmem [resolvable:$true] %s24_s22 }
   0x4   :  { %p2680_p1 = scmp.lt.u32.totalorder %s2676_s25, %s3363_s2 }
   0x6   :  { %p2682_p2 = pnand %p2680_p1, %p2677_p0 }
   0x8   :  { %2685 = shalt.err (!%p2682_p2)
}
   0x9   :  { %s2686_s30 = scalar_lea.vmem %s25_s22, 8192  ;;  %p2691_p4 = scmp.lt.s32.totalorder %s25_s22, %s25_s22 }
   0xa   :  { %p2687_p3 = scmp.ne.s32.totalorder %s25_s22, %s2686_s30  ;;  %p2692_p5 = scmp.lt.s32.totalorder %s2686_s30, %s2686_s30 }
   0xc   :  { %p2693_p6 = por %p2692_p5, %p2691_p4 }
   0xe   :  { %p2694_p7 = pnand %p2693_p6, %p2687_p3 }
  0x10   :  { %2697 = shalt.err (!%p2694_p7)
}
  0x11   :  { %s2771_s7 = smov 512   ;;  %s2772_s8 = smov 32  }
  0x12   :  { %30 = dma.hbm_to_vmem [thread:$0]  %s3363_s2, 8192, %s25_s22, [#allocation6], %s2771_s7, %s2771_s7, %s2772_s8  }
  0x13   :  { %2764 = dma.done.wait [#allocation6], 8192  }
  0x14   :  { %2765 = vsyncadd [#allocation6], 4294959104  ;;  %v2773_v0 = vmov 0.0   ;;  %v51_v1 = vld [vmem:[%s3362_s1 + $0x8] sm:$0xff]  ;;  %v53_v3 = vld [vmem:[%s3362_s1 + $0x18] sm:$0xff]  ;;  %vm80_vm0 = vcmask 130048  }
  0x15   :  { %169 = vmatprep.mubr.f32.mxu0 %v2773_v0  ;;  %282 = vmatprep.mubr.f32.mxu1 %v2773_v0  ;;  %v55_v2 = vld [vmem:[%s3362_s1 + $0x28] sm:$0xff]  ;;  %v57_v5 = vld [vmem:[%s3362_s1 + $0x38] sm:$0xff]  ;;  %v50_v6 = vld [vmem:[%s3362_s1] sm:$0xff]  ;;  %s2775_s18 = smov [#allocation8]   ;;  %s2776_s20 = smov [#allocation11]  }
  0x16   :  { %v1955_v4 = vpack.c.bf16 %v55_v2, %v51_v1  ;;  %v54_v7 = vld [vmem:[%s3362_s1 + $0x20] sm:$0xff]  ;;  %v1959_v8 = vpack.c.bf16 %v57_v5, %v53_v3  ;;  %v52_v10 = vld [vmem:[%s3362_s1 + $0x10] sm:$0xff]  ;;  %v364_v14 = vld [vmem:[#allocation5 + $0x8] sm:$0xff]  ;;  %s1869_s19 = sshll.u32 %s2775_s18, 4  ;;  %s1892_s21 = sshll.u32 %s2776_s20, 4  ;;  %s3311_s19 = int_to_ptr.vmem [resolvable:$true] %s1869_s19  ;;  %s3313_s21 = int_to_ptr.vmem [resolvable:$true] %s1892_s21 }
  0x17   :  { %v1957_v9 = vpack.c.bf16 %v54_v7, %v50_v6  ;;  %v56_v11 = vld [vmem:[%s3362_s1 + $0x30] sm:$0xff]  ;;  %v42_v12 = vld [vmem:[%s3361_s0] sm:$0xff]  ;;  %v368_v15 = vld [vmem:[#allocation5 + $0x28] sm:$0xff] }
  0x18   :  { %1956 = vmatprep.subr.bf16.mxu0 %v1955_v4  ;;  %v1961_v13 = vpack.c.bf16 %v56_v11, %v52_v10  ;;  %v366_v16 = vld [vmem:[#allocation5 + $0x18] sm:$0xff]  ;;  %1960 = vmatprep.subr.bf16.mxu1 %v1959_v8  ;;  %v2855_v17 = vpack.c.bf16 %v368_v15, %v364_v14  ;;  %v363_v19 = vld [vmem:[#allocation5] sm:$0xff]  ;;  %v365_v23 = vld [vmem:[#allocation5 + $0x10] sm:$0xff] }
  0x19   :  { %1958 = vmatpush1.bf16.msra.mxu0 %v1957_v9  ;;  %v370_v18 = vld [vmem:[#allocation5 + $0x38] sm:$0xff]  ;;  %v367_v20 = vld [vmem:[#allocation5 + $0x20] sm:$0xff]  ;;  %v369_v24 = vld [vmem:[#allocation5 + $0x30] sm:$0xff] }
  0x1a   :  { %1962 = vmatpush1.bf16.msra.mxu1 %v1961_v13  ;;  %v2857_v21 = vpack.c.bf16 %v370_v18, %v366_v16  ;;  %v2859_v22 = vpack.c.bf16 %v367_v20, %v363_v19  ;;  %1964 = vmatprep.subr.bf16.mxu0 %v2855_v17  ;;  %v2862_v25 = vpack.c.bf16 %v369_v24, %v365_v23  ;;  %v372_v26 = vld [vmem:[#allocation5 + $0x48] sm:$0xff]  ;;  %v374_v28 = vld [vmem:[#allocation5 + $0x58] sm:$0xff]  ;;  %v371_v31 = vld [vmem:[#allocation5 + $0x40] sm:$0xff] }
  0x1b   :  { %v376_v27 = vld [vmem:[#allocation5 + $0x68] sm:$0xff]  ;;  %v378_v30 = vld [vmem:[#allocation5 + $0x78] sm:$0xff]  ;;  %v375_v32 = vld [vmem:[#allocation5 + $0x60] sm:$0xff] }
  0x1c   :  { %1915 = vmatmul.mubr.msk.f32.vlgmr.msra.gmra.mrb[0].mxu0 %vm80_vm0, %v42_v12  ;;  %1996 = vmatprep.subr.bf16.mxu1 %v2857_v21  ;;  %v2866_v29 = vpack.c.bf16 %v376_v27, %v372_v26  ;;  %v43_v33 = vld [vmem:[%s3361_s0 + $0x8] sm:$0xff]  ;;  %v2873_v34 = vpack.c.bf16 %v378_v30, %v374_v28  ;;  %v2875_v35 = vpack.c.bf16 %v375_v32, %v371_v31  ;;  %v373_v36 = vld [vmem:[#allocation5 + $0x50] sm:$0xff]  ;;  %v382_v41 = vld [vmem:[#allocation5 + $0x98] sm:$0xff] }
  0x1d   :  { %1923 = vmatmul.mubr.msk.f32.vlgmr.msra.gmra.mrb[0].mxu1 %vm80_vm0, %v42_v12  ;;  %1966 = vmatpush1.bf16.msra.mxu0 %v2859_v22  ;;  %v377_v37 = vld [vmem:[#allocation5 + $0x70] sm:$0xff]  ;;  %v380_v39 = vld [vmem:[#allocation5 + $0x88] sm:$0xff]  ;;  %v386_v43 = vld [vmem:[#allocation5 + $0xb8] sm:$0xff] }
  0x1e   :  { %1998 = vmatpush1.bf16.msra.mxu1 %v2862_v25  ;;  %175 = vmatprep.mubr.f32.mxu0 %v2773_v0  ;;  %v2879_v38 = vpack.c.bf16 %v377_v37, %v373_v36  ;;  %v384_v40 = vld [vmem:[#allocation5 + $0xa8] sm:$0xff]  ;;  %v379_v44 = vld [vmem:[#allocation5 + $0x80] sm:$0xff]  ;;  %v44_v46 = vld [vmem:[%s3361_s0 + $0x10] sm:$0xff]  ;;  %v2890_v47 = vpack.c.bf16 %v386_v43, %v382_v41 }
  0x1f   :  { %288 = vmatprep.mubr.f32.mxu1 %v2773_v0  ;;  %1968 = vmatprep.subr.bf16.mxu0 %v2866_v29  ;;  %v2883_v42 = vpack.c.bf16 %v384_v40, %v380_v39  ;;  %v383_v45 = vld [vmem:[#allocation5 + $0xa0] sm:$0xff]  ;;  %v381_v48 = vld [vmem:[#allocation5 + $0x90] sm:$0xff]  ;;  %v388_v51 = vld [vmem:[#allocation5 + $0xc8] sm:$0xff] }
  0x20   :  { %1916 = vmatmul.mubr.msk.f32.gmra.mrb[2].mxu0 %vm80_vm0, %v43_v33  ;;  %2000 = vmatprep.subr.bf16.mxu1 %v2873_v34  ;;  %v385_v49 = vld [vmem:[#allocation5 + $0xb0] sm:$0xff]  ;;  %v2894_v50 = vpack.c.bf16 %v383_v45, %v379_v44  ;;  %v392_v52 = vld [vmem:[#allocation5 + $0xe8] sm:$0xff]  ;;  %v390_v53 = vld [vmem:[#allocation5 + $0xd8] sm:$0xff] }
  0x21   :  { %1924 = vmatmul.mubr.msk.f32.gmra.mrb[2].mxu1 %vm80_vm0, %v43_v33  ;;  %1970 = vmatpush1.bf16.msra.mxu0 %v2875_v35  ;;  %v2898_v54 = vpack.c.bf16 %v385_v49, %v381_v48  ;;  %v394_v55 = vld [vmem:[#allocation5 + $0xf8] sm:$0xff]  ;;  %v387_v56 = vld [vmem:[#allocation5 + $0xc0] sm:$0xff]  ;;  %v2902_v58 = vpack.c.bf16 %v392_v52, %v388_v51  ;;  %v389_v59 = vld [vmem:[#allocation5 + $0xd0] sm:$0xff] }
  0x22   :  { %2002 = vmatpush1.bf16.msra.mxu1 %v2879_v38  ;;  %181 = vmatprep.mubr.f32.mxu0 %v2773_v0  ;;  %v391_v57 = vld [vmem:[#allocation5 + $0xe0] sm:$0xff]  ;;  %v393_v60 = vld [vmem:[#allocation5 + $0xf0] sm:$0xff]  ;;  %v2906_v61 = vpack.c.bf16 %v394_v55, %v390_v53  ;;  %v396_v62 = vld [vmem:[#allocation5 + $0x108] sm:$0xff] }
  0x23   :  { %294 = vmatprep.mubr.f32.mxu1 %v2773_v0  ;;  %1972 = vmatprep.subr.bf16.mxu0 %v2883_v42  ;;  %v400_v63 = vld [vmem:[#allocation5 + $0x128] sm:$0xff]  ;;  %v45_v1 = vld [vmem:[%s3361_s0 + $0x18] sm:$0xff]  ;;  %v2913_v2 = vpack.c.bf16 %v391_v57, %v387_v56  ;;  %v2917_v5 = vpack.c.bf16 %v393_v60, %v389_v59  ;;  %v395_v6 = vld [vmem:[#allocation5 + $0x100] sm:$0xff] }
  0x24   :  { %1917 = vmatmul.mubr.msk.f32.gmra.mrb[4].mxu0 %vm80_vm0, %v44_v46  ;;  %2004 = vmatprep.subr.bf16.mxu1 %v2890_v47  ;;  %v398_v3 = vld [vmem:[#allocation5 + $0x118] sm:$0xff]  ;;  %v399_v7 = vld [vmem:[#allocation5 + $0x120] sm:$0xff]  ;;  %v2921_v8 = vpack.c.bf16 %v400_v63, %v396_v62  ;;  %v397_v9 = vld [vmem:[#allocation5 + $0x110] sm:$0xff] }
  0x25   :  { %1925 = vmatmul.mubr.msk.f32.gmra.mrb[4].mxu1 %vm80_vm0, %v44_v46  ;;  %1974 = vmatpush1.bf16.msra.mxu0 %v2894_v50  ;;  %v402_v4 = vld [vmem:[#allocation5 + $0x138] sm:$0xff]  ;;  %v401_v10 = vld [vmem:[#allocation5 + $0x130] sm:$0xff]  ;;  %v404_v12 = vld [vmem:[#allocation5 + $0x148] sm:$0xff]  ;;  %v2932_v15 = vpack.c.bf16 %v399_v7, %v395_v6  ;;  %v60_v7 = vlaneseq }
  0x26   :  { %2006 = vmatpush1.bf16.msra.mxu1 %v2898_v54  ;;  %187 = vmatprep.mubr.f32.mxu0 %v2773_v0  ;;  %v2925_v11 = vpack.c.bf16 %v402_v4, %v398_v3  ;;  %v408_v13 = vld [vmem:[#allocation5 + $0x168] sm:$0xff]  ;;  %v46_v14 = vld [vmem:[%s3361_s0 + $0x20] sm:$0xff]  ;;  %v406_v16 = vld [vmem:[#allocation5 + $0x158] sm:$0xff]  ;;  %v2936_v19 = vpack.c.bf16 %v401_v10, %v397_v9 }
  0x27   :  { %300 = vmatprep.mubr.f32.mxu1 %v2773_v0  ;;  %1976 = vmatprep.subr.bf16.mxu0 %v2902_v58  ;;  %v410_v18 = vld [vmem:[#allocation5 + $0x178] sm:$0xff]  ;;  %v403_v20 = vld [vmem:[#allocation5 + $0x140] sm:$0xff]  ;;  %v2940_v24 = vpack.c.bf16 %v408_v13, %v404_v12  ;;  %v405_v26 = vld [vmem:[#allocation5 + $0x150] sm:$0xff]  ;;  %v61_v9 = vshrl.u32 %v60_v7, 7 }
  0x28   :  { %1918 = vmatmul.mubr.msk.f32.gmra.mrb[6].mxu0 %vm80_vm0, %v45_v1  ;;  %2008 = vmatprep.subr.bf16.mxu1 %v2906_v61  ;;  %v407_v23 = vld [vmem:[#allocation5 + $0x160] sm:$0xff]  ;;  %v409_v27 = vld [vmem:[#allocation5 + $0x170] sm:$0xff]  ;;  %v2944_v28 = vpack.c.bf16 %v410_v18, %v406_v16  ;;  %v412_v30 = vld [vmem:[#allocation5 + $0x188] sm:$0xff] }
  0x29   :  { %1926 = vmatmul.mubr.msk.f32.gmra.mrb[6].mxu1 %vm80_vm0, %v45_v1  ;;  %1978 = vmatpush1.bf16.msra.mxu0 %v2913_v2  ;;  %v416_v31 = vld [vmem:[#allocation5 + $0x1a8] sm:$0xff]  ;;  %v2951_v33 = vpack.c.bf16 %v407_v23, %v403_v20  ;;  %v414_v36 = vld [vmem:[#allocation5 + $0x198] sm:$0xff]  ;;  %v2955_v39 = vpack.c.bf16 %v409_v27, %v405_v26  ;;  %v411_v40 = vld [vmem:[#allocation5 + $0x180] sm:$0xff]  ;;  %v62_v10 = vsub.s32 0, %v61_v9  ;;  %v66_v13 = vsub.s32 1, %v61_v9 }
  0x2a   :  { %2010 = vmatpush1.bf16.msra.mxu1 %v2917_v5  ;;  %193 = vmatprep.mubr.f32.mxu0 %v2773_v0  ;;  %v47_v32 = vld [vmem:[%s3361_s0 + $0x28] sm:$0xff]  ;;  %v418_v37 = vld [vmem:[#allocation5 + $0x1b8] sm:$0xff]  ;;  %v415_v41 = vld [vmem:[#allocation5 + $0x1a0] sm:$0xff]  ;;  %v2959_v43 = vpack.c.bf16 %v416_v31, %v412_v30  ;;  %v70_v20 = vsub.s32 2, %v61_v9 }
  0x2b   :  { %306 = vmatprep.mubr.f32.mxu1 %v2773_v0  ;;  %1980 = vmatprep.subr.bf16.mxu0 %v2921_v8  ;;  %v413_v44 = vld [vmem:[#allocation5 + $0x190] sm:$0xff]  ;;  %v2963_v46 = vpack.c.bf16 %v418_v37, %v414_v36  ;;  %v420_v48 = vld [vmem:[#allocation5 + $0x1c8] sm:$0xff]  ;;  %v2970_v52 = vpack.c.bf16 %v415_v41, %v411_v40  ;;  %v422_v53 = vld [vmem:[#allocation5 + $0x1d8] sm:$0xff]  ;;  %v74_v40 = vsub.s32 3, %v61_v9 }
  0x2c   :  { %1919 = vmatmul.mubr.msk.f32.gmra.mrb[8].mxu0 %vm80_vm0, %v46_v14  ;;  %2012 = vmatprep.subr.bf16.mxu1 %v2925_v11  ;;  %v417_v45 = vld [vmem:[#allocation5 + $0x1b0] sm:$0xff]  ;;  %v424_v49 = vld [vmem:[#allocation5 + $0x1e8] sm:$0xff]  ;;  %v426_v55 = vld [vmem:[#allocation5 + $0x1f8] sm:$0xff] }
  0x2d   :  { %1927 = vmatmul.mubr.msk.f32.gmra.mrb[8].mxu1 %vm80_vm0, %v46_v14  ;;  %1982 = vmatpush1.bf16.msra.mxu0 %v2932_v15  ;;  %v48_v51 = vld [vmem:[%s3361_s0 + $0x30] sm:$0xff]  ;;  %v2974_v56 = vpack.c.bf16 %v417_v45, %v413_v44  ;;  %v419_v57 = vld [vmem:[#allocation5 + $0x1c0] sm:$0xff]  ;;  %v2978_v60 = vpack.c.bf16 %v424_v49, %v420_v48  ;;  %v2982_v1 = vpack.c.bf16 %v426_v55, %v422_v53  ;;  %v49_v3 = vld [vmem:[%s3361_s0 + $0x38] sm:$0xff] }
  0x2e   :  { %2014 = vmatpush1.bf16.msra.mxu1 %v2936_v19  ;;  %199 = vmatprep.mubr.f32.mxu0 %v2773_v0  ;;  %v423_v59 = vld [vmem:[#allocation5 + $0x1e0] sm:$0xff]  ;;  %v421_v62 = vld [vmem:[#allocation5 + $0x1d0] sm:$0xff] }
  0x2f   :  { %312 = vmatprep.mubr.f32.mxu1 %v2773_v0  ;;  %1984 = vmatprep.subr.bf16.mxu0 %v2940_v24  ;;  %v425_v63 = vld [vmem:[#allocation5 + $0x1f0] sm:$0xff]  ;;  %v2989_v4 = vpack.c.bf16 %v423_v59, %v419_v57  ;;  %v58_v12 = vld [vmem:[%s3364_s3] sm:$0xf]  ;;  %s2774_s3 = smov [#allocation9]  }
  0x30   :  { %1920 = vmatmul.mubr.msk.f32.gmra.mrb[10].mxu0 %vm80_vm0, %v47_v32  ;;  %2016 = vmatprep.subr.bf16.mxu1 %v2944_v28  ;;  %v2993_v6 = vpack.c.bf16 %v425_v63, %v421_v62  ;;  %v3045_v14 = vrot.slane %v58_v12, %v62_v10  ;;  %v3047_v16 = vrot.slane %v58_v12, %v66_v13  ;;  %s1882_s17 = sshll.u32 %s2774_s3, 4  ;;  %s1883_s17 = int_to_ptr.vmem [resolvable:$true] %s1882_s17 }
  0x31   :  { %1928 = vmatmul.mubr.msk.f32.gmra.mrb[10].mxu1 %vm80_vm0, %v47_v32  ;;  %1986 = vmatpush1.bf16.msra.mxu0 %v2951_v33  ;;  %v3051_v36 = vrot.slane %v58_v12, %v70_v20  ;;  %v3054_v44 = vrot.slane %v58_v12, %v74_v40  ;;  %s2698_s22 = scalar_lea.vmem %s1883_s17, 128  ;;  %p2703_p9 = scmp.lt.s32.totalorder %s1883_s17, %s1883_s17 }
  0x32   :  { %2018 = vmatpush1.bf16.msra.mxu1 %v2955_v39  ;;  %205 = vmatprep.mubr.f32.mxu0 %v2773_v0  ;;  %p2699_p8 = scmp.ne.s32.totalorder %s1883_s17, %s2698_s22  ;;  %p2704_p10 = scmp.lt.s32.totalorder %s2698_s22, %s2698_s22 }
  0x33   :  { %318 = vmatprep.mubr.f32.mxu1 %v2773_v0  ;;  %1988 = vmatprep.subr.bf16.mxu0 %v2959_v43 }
  0x34   :  { %1921 = vmatmul.mubr.msk.f32.gmra.mrb[12].mxu0 %vm80_vm0, %v48_v51  ;;  %2020 = vmatprep.subr.bf16.mxu1 %v2963_v46  ;;  %p2705_p11 = por %p2704_p10, %p2703_p9 }
  0x35   :  { %1929 = vmatmul.mubr.msk.f32.gmra.mrb[12].mxu1 %vm80_vm0, %v48_v51  ;;  %1990 = vmatpush1.bf16.msra.mxu0 %v2970_v52 }
  0x36   :  { %2022 = vmatpush1.bf16.msra.mxu1 %v2974_v56  ;;  %211 = vmatprep.mubr.f32.mxu0 %v2773_v0  ;;  %p2706_p12 = pnand %p2705_p11, %p2699_p8 }
  0x37   :  { %324 = vmatprep.mubr.f32.mxu1 %v2773_v0  ;;  %1992 = vmatprep.subr.bf16.mxu0 %v2978_v60 }
  0x38   :  { %1922 = vmatmul.mubr.msk.f32.gmra.mrb[14].mxu0 %vm80_vm0, %v49_v3  ;;  %2024 = vmatprep.subr.bf16.mxu1 %v2982_v1 }
  0x39   :  { %1930 = vmatmul.mubr.msk.f32.gmra.mrb[14].mxu1 %vm80_vm0, %v49_v3  ;;  %1994 = vmatpush1.bf16.msra.mxu0 %v2989_v4 }
  0x3a   :  { %2026 = vmatpush1.bf16.msra.mxu1 %v2993_v6  ;;  %500 = vmatprep.mubr.f32.mxu0 %v2773_v0 }
  0x3b   :  { %571 = vmatprep.mubr.f32.mxu1 %v2773_v0  ;;  %2028 = vmatprep.subr.bf16.mxu0 %v2855_v17 }
  0x3c   :  { %501 = vmatmul.mubr.f32.vlgmr.msra.gmra.mrb[0].mxu0 %v2773_v0  ;;  %2060 = vmatprep.subr.bf16.mxu1 %v2857_v21 }
  0x3d   :  { %572 = vmatmul.mubr.f32.vlgmr.msra.gmra.mrb[0].mxu1 %v2773_v0  ;;  %2030 = vmatpush1.bf16.msra.mxu0 %v2859_v22 }
  0x3e   :  { %2062 = vmatpush1.bf16.msra.mxu1 %v2862_v25  ;;  %2032 = vmatprep.subr.bf16.mxu0 %v2866_v29 }
  0x3f   :  { %2064 = vmatprep.subr.bf16.mxu1 %v2873_v34  ;;  %678 = vmatprep.mubr.f32.mxu0 %v2773_v0 }
  0x40   :  { %749 = vmatprep.mubr.f32.mxu1 %v2773_v0 }
  0x41   :  { %2034 = vmatpush1.bf16.msra.mxu0 %v2875_v35 }
  0x42   :  { %2066 = vmatpush1.bf16.msra.mxu1 %v2879_v38  ;;  %2036 = vmatprep.subr.bf16.mxu0 %v2883_v42 }
  0x43   :  { %2068 = vmatprep.subr.bf16.mxu1 %v2890_v47 }
  0x45   :  { %2038 = vmatpush1.bf16.msra.mxu0 %v2894_v50 }
  0x46   :  { %2070 = vmatpush1.bf16.msra.mxu1 %v2898_v54  ;;  %2040 = vmatprep.subr.bf16.mxu0 %v2902_v58 }
  0x47   :  { %2072 = vmatprep.subr.bf16.mxu1 %v2906_v61 }
  0x49   :  { %2042 = vmatpush1.bf16.msra.mxu0 %v2913_v2 }
  0x4a   :  { %2074 = vmatpush1.bf16.msra.mxu1 %v2917_v5  ;;  %2044 = vmatprep.subr.bf16.mxu0 %v2921_v8 }
  0x4b   :  { %2076 = vmatprep.subr.bf16.mxu1 %v2925_v11 }
  0x4d   :  { %2046 = vmatpush1.bf16.msra.mxu0 %v2932_v15 }
  0x4e   :  { %2078 = vmatpush1.bf16.msra.mxu1 %v2936_v19  ;;  %2048 = vmatprep.subr.bf16.mxu0 %v2940_v24 }
  0x4f   :  { %2080 = vmatprep.subr.bf16.mxu1 %v2944_v28 }
  0x51   :  { %2050 = vmatpush1.bf16.msra.mxu0 %v2951_v33 }
  0x52   :  { %2082 = vmatpush1.bf16.msra.mxu1 %v2955_v39  ;;  %2052 = vmatprep.subr.bf16.mxu0 %v2959_v43 }
  0x53   :  { %2084 = vmatprep.subr.bf16.mxu1 %v2963_v46 }
  0x55   :  { %2054 = vmatpush1.bf16.msra.mxu0 %v2970_v52 }
  0x56   :  { %2086 = vmatpush1.bf16.msra.mxu1 %v2974_v56  ;;  %2056 = vmatprep.subr.bf16.mxu0 %v2978_v60 }
  0x57   :  { %2088 = vmatprep.subr.bf16.mxu1 %v2982_v1 }
  0x59   :  { %2058 = vmatpush1.bf16.msra.mxu0 %v2989_v4 }
  0x5a   :  { %2090 = vmatpush1.bf16.msra.mxu1 %v2993_v6  ;;  %2092 = vmatprep.subr.bf16.mxu0 %v2855_v17 }
  0x5b   :  { %2124 = vmatprep.subr.bf16.mxu1 %v2857_v21 }
 0x10f   :  { %v502_v18 = vpop.f32.mrb[0].mxu0 }
 0x110   :  { %v2475_v23 = vadd.f32 %v502_v18, %v3045_v14  ;;  %v573_v26 = vpop.f32.mrb[0].mxu1  ;;  %v504_v27 = vpop.f32.mrb[1].mxu0 }
 0x111   :  { %v2476_v30 = vadd.f32 %v504_v27, %v3047_v16  ;;  %v575_v31 = vpop.f32.mrb[1].mxu1  ;;  %v2491_v41 = vadd.f32 %v573_v26, %v3051_v36 }
 0x112   :  { %v1931_v32 = vmul.f32 -1.442695, %v2475_v23  ;;  %v2492_v48 = vadd.f32 %v575_v31, %v3054_v44 }
 0x113   :  { %v1932_v37 = vmul.f32 -1.442695, %v2476_v30  ;;  %v1933_v45 = vmul.f32 -1.442695, %v2491_v41 }
 0x114   :  { %2548 = vpow2.f32 %v1931_v32 }
 0x115   :  { %2550 = vpow2.f32 %v1932_v37 }
 0x116   :  { %2552 = vpow2.f32 %v1933_v45 }
 0x117   :  { %2554 = vtanh.f32 %v2492_v48 }
 0x11e   :  { %v2549_v49 = vpop.eup %2548 }
 0x11f   :  { %v591_v51 = vadd.f32 1.0, %v2549_v49  ;;  %v2551_v53 = vpop.eup %2550 }
 0x120   :  { %v592_v55 = vadd.f32 1.0, %v2551_v53  ;;  %v2553_v57 = vpop.eup %2552 }
 0x121   :  { %2556 = vrcp.f32 %v591_v51  ;;  %v2555_v59 = vpop.eup %2554  ;;  %v593_v7 = vadd.f32 1.0, %v2553_v57 }
 0x122   :  { %2558 = vrcp.f32 %v592_v55 }
 0x123   :  { %2560 = vrcp.f32 %v593_v7 }
 0x12b   :  { %v2557_v62 = vpop.eup %2556 }
 0x12c   :  { %v602_v63 = vmul.f32 %v2557_v62, %v2555_v59  ;;  %v2559_v3 = vpop.eup %2558 }
 0x12d   :  { %v601_v9 = vmul.f32 0.0, %v2559_v3  ;;  %v2561_v12 = vpop.eup %2560 }
 0x12f   :  { %v3057_v10 = vadd.f32 %v602_v63, %v601_v9 }
 0x131   :  { %2562 = vtanh.f32 %v3057_v10 }
 0x13b   :  { %v2563_v13 = vpop.eup %2562 }
 0x13c   :  { %v605_v18 = vmul.f32 %v2563_v13, %v2561_v12 }
 0x13e   :  { %606 = vst [vmem:[#allocation8] sm:$0xff] %v605_v18  ;;  %679 = vmatmul.mubr.f32.vlgmr.msra.gmra.mrb[2].mxu0 %v605_v18  ;;  %750 = vmatmul.mubr.f32.vlgmr.msra.gmra.mrb[2].mxu1 %v605_v18 }
 0x13f   :  { %2094 = vmatpush1.bf16.msra.mxu0 %v2859_v22  ;;  %2126 = vmatpush1.bf16.msra.mxu1 %v2862_v25 }
 0x140   :  { %2096 = vmatprep.subr.bf16.mxu0 %v2866_v29  ;;  %2128 = vmatprep.subr.bf16.mxu1 %v2873_v34 }
 0x141   :  { %857 = vmatprep.mubr.f32.mxu0 %v2773_v0  ;;  %928 = vmatprep.mubr.f32.mxu1 %v2773_v0 }
 0x143   :  { %2098 = vmatpush1.bf16.msra.mxu0 %v2875_v35  ;;  %2130 = vmatpush1.bf16.msra.mxu1 %v2879_v38 }
 0x144   :  { %2100 = vmatprep.subr.bf16.mxu0 %v2883_v42  ;;  %2132 = vmatprep.subr.bf16.mxu1 %v2890_v47 }
 0x147   :  { %2102 = vmatpush1.bf16.msra.mxu0 %v2894_v50  ;;  %2134 = vmatpush1.bf16.msra.mxu1 %v2898_v54 }
 0x148   :  { %2104 = vmatprep.subr.bf16.mxu0 %v2902_v58  ;;  %2136 = vmatprep.subr.bf16.mxu1 %v2906_v61 }
 0x14b   :  { %2106 = vmatpush1.bf16.msra.mxu0 %v2913_v2  ;;  %2138 = vmatpush1.bf16.msra.mxu1 %v2917_v5 }
 0x14c   :  { %2108 = vmatprep.subr.bf16.mxu0 %v2921_v8  ;;  %2140 = vmatprep.subr.bf16.mxu1 %v2925_v11 }
 0x14f   :  { %2110 = vmatpush1.bf16.msra.mxu0 %v2932_v15  ;;  %2142 = vmatpush1.bf16.msra.mxu1 %v2936_v19 }
 0x150   :  { %2112 = vmatprep.subr.bf16.mxu0 %v2940_v24  ;;  %2144 = vmatprep.subr.bf16.mxu1 %v2944_v28 }
 0x153   :  { %2114 = vmatpush1.bf16.msra.mxu0 %v2951_v33  ;;  %2146 = vmatpush1.bf16.msra.mxu1 %v2955_v39 }
 0x154   :  { %2116 = vmatprep.subr.bf16.mxu0 %v2959_v43  ;;  %2148 = vmatprep.subr.bf16.mxu1 %v2963_v46 }
 0x157   :  { %2118 = vmatpush1.bf16.msra.mxu0 %v2970_v52  ;;  %2150 = vmatpush1.bf16.msra.mxu1 %v2974_v56 }
 0x158   :  { %2120 = vmatprep.subr.bf16.mxu0 %v2978_v60  ;;  %2152 = vmatprep.subr.bf16.mxu1 %v2982_v1 }
 0x15b   :  { %2122 = vmatpush1.bf16.msra.mxu0 %v2989_v4  ;;  %2154 = vmatpush1.bf16.msra.mxu1 %v2993_v6 }
 0x15c   :  { %2156 = vmatprep.subr.bf16.mxu0 %v2855_v17  ;;  %2188 = vmatprep.subr.bf16.mxu1 %v2857_v21 }
 0x211   :  { %v680_v20 = vpop.f32.mrb[2].mxu0  ;;  %v751_v23 = vpop.f32.mrb[2].mxu1 }
 0x212   :  { %v2477_v26 = vadd.f32 %v680_v20, %v3045_v14  ;;  %v682_v27 = vpop.f32.mrb[3].mxu0  ;;  %v753_v30 = vpop.f32.mrb[3].mxu1  ;;  %v2493_v40 = vadd.f32 %v751_v23, %v3051_v36 }
 0x213   :  { %v2478_v31 = vadd.f32 %v682_v27, %v3047_v16  ;;  %v2494_v41 = vadd.f32 %v753_v30, %v3054_v44 }
 0x214   :  { %v1934_v32 = vmul.f32 -1.442695, %v2477_v26  ;;  %v1936_v45 = vmul.f32 -1.442695, %v2493_v40 }
 0x215   :  { %v1935_v37 = vmul.f32 -1.442695, %v2478_v31 }
 0x216   :  { %2564 = vpow2.f32 %v1934_v32 }
 0x217   :  { %2566 = vpow2.f32 %v1935_v37 }
 0x218   :  { %2568 = vtanh.f32 %v2494_v41 }
 0x219   :  { %2570 = vpow2.f32 %v1936_v45 }
 0x220   :  { %v2565_v48 = vpop.eup %2564 }
 0x221   :  { %v769_v49 = vadd.f32 1.0, %v2565_v48  ;;  %v2567_v51 = vpop.eup %2566 }
 0x222   :  { %v770_v53 = vadd.f32 1.0, %v2567_v51  ;;  %v2569_v55 = vpop.eup %2568 }
 0x223   :  { %2572 = vrcp.f32 %v769_v49  ;;  %v2571_v57 = vpop.eup %2570 }
 0x224   :  { %2574 = vrcp.f32 %v770_v53  ;;  %v771_v3 = vadd.f32 1.0, %v2571_v57 }
 0x226   :  { %2576 = vrcp.f32 %v771_v3 }
 0x22d   :  { %v2573_v59 = vpop.eup %2572 }
 0x22e   :  { %v780_v62 = vmul.f32 %v2573_v59, %v2569_v55  ;;  %v2575_v63 = vpop.eup %2574 }
 0x22f   :  { %v779_v7 = vmul.f32 %v2575_v63, %v3057_v10 }
 0x230   :  { %v2577_v12 = vpop.eup %2576 }
 0x231   :  { %v3099_v9 = vadd.f32 %v780_v62, %v779_v7 }
 0x233   :  { %2578 = vtanh.f32 %v3099_v9 }
 0x23d   :  { %v2579_v13 = vpop.eup %2578 }
 0x23e   :  { %v783_v18 = vmul.f32 %v2579_v13, %v2577_v12 }
 0x240   :  { %785 = vst [vmem:[#allocation8 + $0x8] sm:$0xff] %v783_v18  ;;  %858 = vmatmul.mubr.f32.vlgmr.msra.gmra.mrb[4].mxu0 %v783_v18  ;;  %929 = vmatmul.mubr.f32.vlgmr.msra.gmra.mrb[4].mxu1 %v783_v18 }
 0x241   :  { %2158 = vmatpush1.bf16.msra.mxu0 %v2859_v22  ;;  %2190 = vmatpush1.bf16.msra.mxu1 %v2862_v25 }
 0x242   :  { %2160 = vmatprep.subr.bf16.mxu0 %v2866_v29  ;;  %2192 = vmatprep.subr.bf16.mxu1 %v2873_v34 }
 0x243   :  { %1036 = vmatprep.mubr.f32.mxu0 %v2773_v0  ;;  %1107 = vmatprep.mubr.f32.mxu1 %v2773_v0 }
 0x245   :  { %2162 = vmatpush1.bf16.msra.mxu0 %v2875_v35  ;;  %2194 = vmatpush1.bf16.msra.mxu1 %v2879_v38 }
 0x246   :  { %2164 = vmatprep.subr.bf16.mxu0 %v2883_v42  ;;  %2196 = vmatprep.subr.bf16.mxu1 %v2890_v47 }
 0x249   :  { %2166 = vmatpush1.bf16.msra.mxu0 %v2894_v50  ;;  %2198 = vmatpush1.bf16.msra.mxu1 %v2898_v54 }
 0x24a   :  { %2168 = vmatprep.subr.bf16.mxu0 %v2902_v58  ;;  %2200 = vmatprep.subr.bf16.mxu1 %v2906_v61 }
 0x24d   :  { %2170 = vmatpush1.bf16.msra.mxu0 %v2913_v2  ;;  %2202 = vmatpush1.bf16.msra.mxu1 %v2917_v5 }
 0x24e   :  { %2172 = vmatprep.subr.bf16.mxu0 %v2921_v8  ;;  %2204 = vmatprep.subr.bf16.mxu1 %v2925_v11 }
 0x251   :  { %2174 = vmatpush1.bf16.msra.mxu0 %v2932_v15  ;;  %2206 = vmatpush1.bf16.msra.mxu1 %v2936_v19 }
 0x252   :  { %2176 = vmatprep.subr.bf16.mxu0 %v2940_v24  ;;  %2208 = vmatprep.subr.bf16.mxu1 %v2944_v28 }
 0x255   :  { %2178 = vmatpush1.bf16.msra.mxu0 %v2951_v33  ;;  %2210 = vmatpush1.bf16.msra.mxu1 %v2955_v39 }
 0x256   :  { %2180 = vmatprep.subr.bf16.mxu0 %v2959_v43  ;;  %2212 = vmatprep.subr.bf16.mxu1 %v2963_v46 }
 0x259   :  { %2182 = vmatpush1.bf16.msra.mxu0 %v2970_v52  ;;  %2214 = vmatpush1.bf16.msra.mxu1 %v2974_v56 }
 0x25a   :  { %2184 = vmatprep.subr.bf16.mxu0 %v2978_v60  ;;  %2216 = vmatprep.subr.bf16.mxu1 %v2982_v1 }
 0x25d   :  { %2186 = vmatpush1.bf16.msra.mxu0 %v2989_v4  ;;  %2218 = vmatpush1.bf16.msra.mxu1 %v2993_v6 }
 0x25e   :  { %2220 = vmatprep.subr.bf16.mxu0 %v2855_v17  ;;  %2252 = vmatprep.subr.bf16.mxu1 %v2857_v21 }
 0x313   :  { %v859_v10 = vpop.f32.mrb[4].mxu0  ;;  %v930_v20 = vpop.f32.mrb[4].mxu1 }
 0x314   :  { %v2479_v23 = vadd.f32 %v859_v10, %v3045_v14  ;;  %v861_v26 = vpop.f32.mrb[5].mxu0  ;;  %v932_v27 = vpop.f32.mrb[5].mxu1  ;;  %v2495_v37 = vadd.f32 %v930_v20, %v3051_v36 }
 0x315   :  { %v2480_v30 = vadd.f32 %v861_v26, %v3047_v16  ;;  %v2496_v40 = vadd.f32 %v932_v27, %v3054_v44 }
 0x316   :  { %v1937_v31 = vmul.f32 -1.442695, %v2479_v23  ;;  %v1939_v41 = vmul.f32 -1.442695, %v2495_v37 }
 0x317   :  { %v1938_v32 = vmul.f32 -1.442695, %v2480_v30 }
 0x318   :  { %2580 = vpow2.f32 %v1937_v31 }
 0x319   :  { %2582 = vpow2.f32 %v1938_v32 }
 0x31a   :  { %2584 = vtanh.f32 %v2496_v40 }
 0x31b   :  { %2586 = vpow2.f32 %v1939_v41 }
 0x322   :  { %v2581_v45 = vpop.eup %2580 }
 0x323   :  { %v948_v48 = vadd.f32 1.0, %v2581_v45  ;;  %v2583_v49 = vpop.eup %2582 }
 0x324   :  { %v949_v51 = vadd.f32 1.0, %v2583_v49  ;;  %v2585_v53 = vpop.eup %2584 }
 0x325   :  { %2588 = vrcp.f32 %v948_v48  ;;  %v2587_v55 = vpop.eup %2586 }
 0x326   :  { %2590 = vrcp.f32 %v949_v51  ;;  %v950_v63 = vadd.f32 1.0, %v2587_v55 }
 0x328   :  { %2592 = vrcp.f32 %v950_v63 }
 0x32f   :  { %v2589_v57 = vpop.eup %2588 }
 0x330   :  { %v959_v59 = vmul.f32 %v2589_v57, %v2585_v53  ;;  %v2591_v62 = vpop.eup %2590 }
 0x331   :  { %v958_v3 = vmul.f32 %v2591_v62, %v3099_v9 }
 0x332   :  { %v2593_v12 = vpop.eup %2592 }
 0x333   :  { %v3141_v7 = vadd.f32 %v959_v59, %v958_v3 }
 0x335   :  { %2594 = vtanh.f32 %v3141_v7 }
 0x33f   :  { %v2595_v13 = vpop.eup %2594 }
 0x340   :  { %v962_v18 = vmul.f32 %v2595_v13, %v2593_v12 }
 0x342   :  { %964 = vst [vmem:[#allocation8 + $0x10] sm:$0xff] %v962_v18  ;;  %1037 = vmatmul.mubr.f32.vlgmr.msra.gmra.mrb[6].mxu0 %v962_v18  ;;  %1108 = vmatmul.mubr.f32.vlgmr.msra.gmra.mrb[6].mxu1 %v962_v18 }
 0x343   :  { %2222 = vmatpush1.bf16.msra.mxu0 %v2859_v22  ;;  %2254 = vmatpush1.bf16.msra.mxu1 %v2862_v25 }
 0x344   :  { %2224 = vmatprep.subr.bf16.mxu0 %v2866_v29  ;;  %2256 = vmatprep.subr.bf16.mxu1 %v2873_v34 }
 0x345   :  { %1215 = vmatprep.mubr.f32.mxu0 %v2773_v0  ;;  %1286 = vmatprep.mubr.f32.mxu1 %v2773_v0 }
 0x347   :  { %2226 = vmatpush1.bf16.msra.mxu0 %v2875_v35  ;;  %2258 = vmatpush1.bf16.msra.mxu1 %v2879_v38 }
 0x348   :  { %2228 = vmatprep.subr.bf16.mxu0 %v2883_v42  ;;  %2260 = vmatprep.subr.bf16.mxu1 %v2890_v47 }
 0x34b   :  { %2230 = vmatpush1.bf16.msra.mxu0 %v2894_v50  ;;  %2262 = vmatpush1.bf16.msra.mxu1 %v2898_v54 }
 0x34c   :  { %2232 = vmatprep.subr.bf16.mxu0 %v2902_v58  ;;  %2264 = vmatprep.subr.bf16.mxu1 %v2906_v61 }
 0x34f   :  { %2234 = vmatpush1.bf16.msra.mxu0 %v2913_v2  ;;  %2266 = vmatpush1.bf16.msra.mxu1 %v2917_v5 }
 0x350   :  { %2236 = vmatprep.subr.bf16.mxu0 %v2921_v8  ;;  %2268 = vmatprep.subr.bf16.mxu1 %v2925_v11 }
 0x353   :  { %2238 = vmatpush1.bf16.msra.mxu0 %v2932_v15  ;;  %2270 = vmatpush1.bf16.msra.mxu1 %v2936_v19 }
 0x354   :  { %2240 = vmatprep.subr.bf16.mxu0 %v2940_v24  ;;  %2272 = vmatprep.subr.bf16.mxu1 %v2944_v28 }
 0x357   :  { %2242 = vmatpush1.bf16.msra.mxu0 %v2951_v33  ;;  %2274 = vmatpush1.bf16.msra.mxu1 %v2955_v39 }
 0x358   :  { %2244 = vmatprep.subr.bf16.mxu0 %v2959_v43  ;;  %2276 = vmatprep.subr.bf16.mxu1 %v2963_v46 }
 0x35b   :  { %2246 = vmatpush1.bf16.msra.mxu0 %v2970_v52  ;;  %2278 = vmatpush1.bf16.msra.mxu1 %v2974_v56 }
 0x35c   :  { %2248 = vmatprep.subr.bf16.mxu0 %v2978_v60  ;;  %2280 = vmatprep.subr.bf16.mxu1 %v2982_v1 }
 0x35f   :  { %2250 = vmatpush1.bf16.msra.mxu0 %v2989_v4  ;;  %2282 = vmatpush1.bf16.msra.mxu1 %v2993_v6 }
 0x360   :  { %2284 = vmatprep.subr.bf16.mxu0 %v2855_v17  ;;  %2316 = vmatprep.subr.bf16.mxu1 %v2857_v21 }
 0x415   :  { %v1038_v9 = vpop.f32.mrb[6].mxu0  ;;  %v1109_v10 = vpop.f32.mrb[6].mxu1 }
 0x416   :  { %v2481_v20 = vadd.f32 %v1038_v9, %v3045_v14  ;;  %v1040_v23 = vpop.f32.mrb[7].mxu0  ;;  %v1111_v26 = vpop.f32.mrb[7].mxu1  ;;  %v2497_v32 = vadd.f32 %v1109_v10, %v3051_v36 }
 0x417   :  { %v2482_v27 = vadd.f32 %v1040_v23, %v3047_v16  ;;  %v2498_v37 = vadd.f32 %v1111_v26, %v3054_v44 }
 0x418   :  { %v1940_v30 = vmul.f32 -1.442695, %v2481_v20  ;;  %v1942_v40 = vmul.f32 -1.442695, %v2497_v32 }
 0x419   :  { %v1941_v31 = vmul.f32 -1.442695, %v2482_v27 }
 0x41a   :  { %2596 = vpow2.f32 %v1940_v30 }
 0x41b   :  { %2598 = vpow2.f32 %v1941_v31 }
 0x41c   :  { %2600 = vtanh.f32 %v2498_v37 }
 0x41d   :  { %2602 = vpow2.f32 %v1942_v40 }
 0x424   :  { %v2597_v41 = vpop.eup %2596 }
 0x425   :  { %v1127_v45 = vadd.f32 1.0, %v2597_v41  ;;  %v2599_v48 = vpop.eup %2598 }
 0x426   :  { %v1128_v49 = vadd.f32 1.0, %v2599_v48  ;;  %v2601_v51 = vpop.eup %2600 }
 0x427   :  { %2604 = vrcp.f32 %v1127_v45  ;;  %v2603_v53 = vpop.eup %2602 }
 0x428   :  { %2606 = vrcp.f32 %v1128_v49  ;;  %v1129_v62 = vadd.f32 1.0, %v2603_v53 }
 0x42a   :  { %2608 = vrcp.f32 %v1129_v62 }
 0x431   :  { %v2605_v55 = vpop.eup %2604 }
 0x432   :  { %v1138_v57 = vmul.f32 %v2605_v55, %v2601_v51  ;;  %v2607_v59 = vpop.eup %2606 }
 0x433   :  { %v1137_v63 = vmul.f32 %v2607_v59, %v3141_v7 }
 0x434   :  { %v2609_v12 = vpop.eup %2608 }
 0x435   :  { %v3183_v3 = vadd.f32 %v1138_v57, %v1137_v63 }
 0x437   :  { %2610 = vtanh.f32 %v3183_v3 }
 0x441   :  { %v2611_v13 = vpop.eup %2610 }
 0x442   :  { %v1141_v18 = vmul.f32 %v2611_v13, %v2609_v12 }
 0x444   :  { %1143 = vst [vmem:[#allocation8 + $0x18] sm:$0xff] %v1141_v18  ;;  %1216 = vmatmul.mubr.f32.vlgmr.msra.gmra.mrb[8].mxu0 %v1141_v18  ;;  %1287 = vmatmul.mubr.f32.vlgmr.msra.gmra.mrb[8].mxu1 %v1141_v18 }
 0x445   :  { %2286 = vmatpush1.bf16.msra.mxu0 %v2859_v22  ;;  %2318 = vmatpush1.bf16.msra.mxu1 %v2862_v25 }
 0x446   :  { %2288 = vmatprep.subr.bf16.mxu0 %v2866_v29  ;;  %2320 = vmatprep.subr.bf16.mxu1 %v2873_v34 }
 0x447   :  { %1394 = vmatprep.mubr.f32.mxu0 %v2773_v0  ;;  %1465 = vmatprep.mubr.f32.mxu1 %v2773_v0 }
 0x449   :  { %2290 = vmatpush1.bf16.msra.mxu0 %v2875_v35  ;;  %2322 = vmatpush1.bf16.msra.mxu1 %v2879_v38 }
 0x44a   :  { %2292 = vmatprep.subr.bf16.mxu0 %v2883_v42  ;;  %2324 = vmatprep.subr.bf16.mxu1 %v2890_v47 }
 0x44d   :  { %2294 = vmatpush1.bf16.msra.mxu0 %v2894_v50  ;;  %2326 = vmatpush1.bf16.msra.mxu1 %v2898_v54 }
 0x44e   :  { %2296 = vmatprep.subr.bf16.mxu0 %v2902_v58  ;;  %2328 = vmatprep.subr.bf16.mxu1 %v2906_v61 }
 0x451   :  { %2298 = vmatpush1.bf16.msra.mxu0 %v2913_v2  ;;  %2330 = vmatpush1.bf16.msra.mxu1 %v2917_v5 }
 0x452   :  { %2300 = vmatprep.subr.bf16.mxu0 %v2921_v8  ;;  %2332 = vmatprep.subr.bf16.mxu1 %v2925_v11 }
 0x455   :  { %2302 = vmatpush1.bf16.msra.mxu0 %v2932_v15  ;;  %2334 = vmatpush1.bf16.msra.mxu1 %v2936_v19 }
 0x456   :  { %2304 = vmatprep.subr.bf16.mxu0 %v2940_v24  ;;  %2336 = vmatprep.subr.bf16.mxu1 %v2944_v28 }
 0x459   :  { %2306 = vmatpush1.bf16.msra.mxu0 %v2951_v33  ;;  %2338 = vmatpush1.bf16.msra.mxu1 %v2955_v39 }
 0x45a   :  { %2308 = vmatprep.subr.bf16.mxu0 %v2959_v43  ;;  %2340 = vmatprep.subr.bf16.mxu1 %v2963_v46 }
 0x45d   :  { %2310 = vmatpush1.bf16.msra.mxu0 %v2970_v52  ;;  %2342 = vmatpush1.bf16.msra.mxu1 %v2974_v56 }
 0x45e   :  { %2312 = vmatprep.subr.bf16.mxu0 %v2978_v60  ;;  %2344 = vmatprep.subr.bf16.mxu1 %v2982_v1 }
 0x461   :  { %2314 = vmatpush1.bf16.msra.mxu0 %v2989_v4  ;;  %2346 = vmatpush1.bf16.msra.mxu1 %v2993_v6 }
 0x462   :  { %2348 = vmatprep.subr.bf16.mxu0 %v2855_v17  ;;  %2380 = vmatprep.subr.bf16.mxu1 %v2857_v21 }
 0x517   :  { %v1217_v7 = vpop.f32.mrb[8].mxu0  ;;  %v1288_v9 = vpop.f32.mrb[8].mxu1 }
 0x518   :  { %v2483_v10 = vadd.f32 %v1217_v7, %v3045_v14  ;;  %v1219_v20 = vpop.f32.mrb[9].mxu0  ;;  %v1290_v23 = vpop.f32.mrb[9].mxu1  ;;  %v2499_v31 = vadd.f32 %v1288_v9, %v3051_v36 }
 0x519   :  { %v2484_v26 = vadd.f32 %v1219_v20, %v3047_v16  ;;  %v2500_v32 = vadd.f32 %v1290_v23, %v3054_v44 }
 0x51a   :  { %v1943_v27 = vmul.f32 -1.442695, %v2483_v10  ;;  %v1945_v37 = vmul.f32 -1.442695, %v2499_v31 }
 0x51b   :  { %v1944_v30 = vmul.f32 -1.442695, %v2484_v26 }
 0x51c   :  { %2612 = vpow2.f32 %v1943_v27 }
 0x51d   :  { %2614 = vpow2.f32 %v1944_v30 }
 0x51e   :  { %2616 = vtanh.f32 %v2500_v32 }
 0x51f   :  { %2618 = vpow2.f32 %v1945_v37 }
 0x526   :  { %v2613_v40 = vpop.eup %2612 }
 0x527   :  { %v1306_v41 = vadd.f32 1.0, %v2613_v40  ;;  %v2615_v45 = vpop.eup %2614 }
 0x528   :  { %v1307_v48 = vadd.f32 1.0, %v2615_v45  ;;  %v2617_v49 = vpop.eup %2616 }
 0x529   :  { %2620 = vrcp.f32 %v1306_v41  ;;  %v2619_v51 = vpop.eup %2618 }
 0x52a   :  { %2622 = vrcp.f32 %v1307_v48  ;;  %v1308_v59 = vadd.f32 1.0, %v2619_v51 }
 0x52c   :  { %2624 = vrcp.f32 %v1308_v59 }
 0x533   :  { %v2621_v53 = vpop.eup %2620 }
 0x534   :  { %v1317_v55 = vmul.f32 %v2621_v53, %v2617_v49  ;;  %v2623_v57 = vpop.eup %2622 }
 0x535   :  { %v1316_v62 = vmul.f32 %v2623_v57, %v3183_v3 }
 0x536   :  { %v2625_v12 = vpop.eup %2624 }
 0x537   :  { %v3225_v63 = vadd.f32 %v1317_v55, %v1316_v62 }
 0x539   :  { %2626 = vtanh.f32 %v3225_v63 }
 0x543   :  { %v2627_v13 = vpop.eup %2626 }
 0x544   :  { %v1320_v18 = vmul.f32 %v2627_v13, %v2625_v12 }
 0x546   :  { %1322 = vst [vmem:[#allocation8 + $0x20] sm:$0xff] %v1320_v18  ;;  %1395 = vmatmul.mubr.f32.vlgmr.msra.gmra.mrb[10].mxu0 %v1320_v18  ;;  %1466 = vmatmul.mubr.f32.vlgmr.msra.gmra.mrb[10].mxu1 %v1320_v18 }
 0x547   :  { %2350 = vmatpush1.bf16.msra.mxu0 %v2859_v22  ;;  %2382 = vmatpush1.bf16.msra.mxu1 %v2862_v25 }
 0x548   :  { %2352 = vmatprep.subr.bf16.mxu0 %v2866_v29  ;;  %2384 = vmatprep.subr.bf16.mxu1 %v2873_v34 }
 0x549   :  { %1573 = vmatprep.mubr.f32.mxu0 %v2773_v0  ;;  %1644 = vmatprep.mubr.f32.mxu1 %v2773_v0 }
 0x54b   :  { %2354 = vmatpush1.bf16.msra.mxu0 %v2875_v35  ;;  %2386 = vmatpush1.bf16.msra.mxu1 %v2879_v38 }
 0x54c   :  { %2356 = vmatprep.subr.bf16.mxu0 %v2883_v42  ;;  %2388 = vmatprep.subr.bf16.mxu1 %v2890_v47 }
 0x54f   :  { %2358 = vmatpush1.bf16.msra.mxu0 %v2894_v50  ;;  %2390 = vmatpush1.bf16.msra.mxu1 %v2898_v54 }
 0x550   :  { %2360 = vmatprep.subr.bf16.mxu0 %v2902_v58  ;;  %2392 = vmatprep.subr.bf16.mxu1 %v2906_v61 }
 0x553   :  { %2362 = vmatpush1.bf16.msra.mxu0 %v2913_v2  ;;  %2394 = vmatpush1.bf16.msra.mxu1 %v2917_v5 }
 0x554   :  { %2364 = vmatprep.subr.bf16.mxu0 %v2921_v8  ;;  %2396 = vmatprep.subr.bf16.mxu1 %v2925_v11 }
 0x557   :  { %2366 = vmatpush1.bf16.msra.mxu0 %v2932_v15  ;;  %2398 = vmatpush1.bf16.msra.mxu1 %v2936_v19 }
 0x558   :  { %2368 = vmatprep.subr.bf16.mxu0 %v2940_v24  ;;  %2400 = vmatprep.subr.bf16.mxu1 %v2944_v28 }
 0x55b   :  { %2370 = vmatpush1.bf16.msra.mxu0 %v2951_v33  ;;  %2402 = vmatpush1.bf16.msra.mxu1 %v2955_v39 }
 0x55c   :  { %2372 = vmatprep.subr.bf16.mxu0 %v2959_v43  ;;  %2404 = vmatprep.subr.bf16.mxu1 %v2963_v46 }
 0x55f   :  { %2374 = vmatpush1.bf16.msra.mxu0 %v2970_v52  ;;  %2406 = vmatpush1.bf16.msra.mxu1 %v2974_v56 }
 0x560   :  { %2376 = vmatprep.subr.bf16.mxu0 %v2978_v60  ;;  %2408 = vmatprep.subr.bf16.mxu1 %v2982_v1 }
 0x563   :  { %2378 = vmatpush1.bf16.msra.mxu0 %v2989_v4  ;;  %2410 = vmatpush1.bf16.msra.mxu1 %v2993_v6 }
 0x564   :  { %2412 = vmatprep.subr.bf16.mxu0 %v2855_v17  ;;  %2444 = vmatprep.subr.bf16.mxu1 %v2857_v21 }
 0x619   :  { %v1396_v3 = vpop.f32.mrb[10].mxu0  ;;  %v1467_v7 = vpop.f32.mrb[10].mxu1 }
 0x61a   :  { %v2485_v9 = vadd.f32 %v1396_v3, %v3045_v14  ;;  %v1398_v10 = vpop.f32.mrb[11].mxu0  ;;  %v1469_v20 = vpop.f32.mrb[11].mxu1  ;;  %v2501_v30 = vadd.f32 %v1467_v7, %v3051_v36 }
 0x61b   :  { %v2486_v23 = vadd.f32 %v1398_v10, %v3047_v16  ;;  %v2502_v31 = vadd.f32 %v1469_v20, %v3054_v44 }
 0x61c   :  { %v1946_v26 = vmul.f32 -1.442695, %v2485_v9  ;;  %v1948_v32 = vmul.f32 -1.442695, %v2501_v30 }
 0x61d   :  { %v1947_v27 = vmul.f32 -1.442695, %v2486_v23 }
 0x61e   :  { %2628 = vpow2.f32 %v1946_v26 }
 0x61f   :  { %2630 = vpow2.f32 %v1947_v27 }
 0x620   :  { %2632 = vtanh.f32 %v2502_v31 }
 0x621   :  { %2634 = vpow2.f32 %v1948_v32 }
 0x628   :  { %v2629_v17 = vpop.eup %2628 }
 0x629   :  { %v1485_v37 = vadd.f32 1.0, %v2629_v17  ;;  %v2631_v21 = vpop.eup %2630 }
 0x62a   :  { %v1486_v40 = vadd.f32 1.0, %v2631_v21  ;;  %v2633_v41 = vpop.eup %2632 }
 0x62b   :  { %2636 = vrcp.f32 %v1485_v37  ;;  %v2635_v45 = vpop.eup %2634 }
 0x62c   :  { %2638 = vrcp.f32 %v1486_v40  ;;  %v1487_v53 = vadd.f32 1.0, %v2635_v45 }
 0x62e   :  { %2640 = vrcp.f32 %v1487_v53 }
 0x635   :  { %v2637_v48 = vpop.eup %2636 }
 0x636   :  { %v1496_v49 = vmul.f32 %v2637_v48, %v2633_v41  ;;  %v2639_v51 = vpop.eup %2638 }
 0x637   :  { %v1495_v55 = vmul.f32 %v2639_v51, %v3225_v63 }
 0x638   :  { %v2641_v59 = vpop.eup %2640 }
 0x639   :  { %v3267_v57 = vadd.f32 %v1496_v49, %v1495_v55 }
 0x63b   :  { %2642 = vtanh.f32 %v3267_v57 }
 0x645   :  { %v2643_v62 = vpop.eup %2642 }
 0x646   :  { %v1499_v12 = vmul.f32 %v2643_v62, %v2641_v59 }
 0x648   :  { %1501 = vst [vmem:[#allocation8 + $0x28] sm:$0xff] %v1499_v12  ;;  %1574 = vmatmul.mubr.f32.vlgmr.msra.gmra.mrb[12].mxu0 %v1499_v12  ;;  %1645 = vmatmul.mubr.f32.vlgmr.msra.gmra.mrb[12].mxu1 %v1499_v12 }
 0x649   :  { %2414 = vmatpush1.bf16.msra.mxu0 %v2859_v22  ;;  %2446 = vmatpush1.bf16.msra.mxu1 %v2862_v25 }
 0x64a   :  { %2416 = vmatprep.subr.bf16.mxu0 %v2866_v29  ;;  %2448 = vmatprep.subr.bf16.mxu1 %v2873_v34 }
 0x64b   :  { %1752 = vmatprep.mubr.f32.mxu0 %v2773_v0  ;;  %1823 = vmatprep.mubr.f32.mxu1 %v2773_v0 }
 0x64d   :  { %2418 = vmatpush1.bf16.msra.mxu0 %v2875_v35  ;;  %2450 = vmatpush1.bf16.msra.mxu1 %v2879_v38 }
 0x64e   :  { %2420 = vmatprep.subr.bf16.mxu0 %v2883_v42  ;;  %2452 = vmatprep.subr.bf16.mxu1 %v2890_v47 }
 0x651   :  { %2422 = vmatpush1.bf16.msra.mxu0 %v2894_v50  ;;  %2454 = vmatpush1.bf16.msra.mxu1 %v2898_v54 }
 0x652   :  { %2424 = vmatprep.subr.bf16.mxu0 %v2902_v58  ;;  %2456 = vmatprep.subr.bf16.mxu1 %v2906_v61 }
 0x655   :  { %2426 = vmatpush1.bf16.msra.mxu0 %v2913_v2  ;;  %2458 = vmatpush1.bf16.msra.mxu1 %v2917_v5 }
 0x656   :  { %2428 = vmatprep.subr.bf16.mxu0 %v2921_v8  ;;  %2460 = vmatprep.subr.bf16.mxu1 %v2925_v11 }
 0x659   :  { %2430 = vmatpush1.bf16.msra.mxu0 %v2932_v15  ;;  %2462 = vmatpush1.bf16.msra.mxu1 %v2936_v19 }
 0x65a   :  { %2432 = vmatprep.subr.bf16.mxu0 %v2940_v24  ;;  %2464 = vmatprep.subr.bf16.mxu1 %v2944_v28 }
 0x65d   :  { %2434 = vmatpush1.bf16.msra.mxu0 %v2951_v33  ;;  %2466 = vmatpush1.bf16.msra.mxu1 %v2955_v39 }
 0x65e   :  { %2436 = vmatprep.subr.bf16.mxu0 %v2959_v43  ;;  %2468 = vmatprep.subr.bf16.mxu1 %v2963_v46 }
 0x661   :  { %2438 = vmatpush1.bf16.msra.mxu0 %v2970_v52  ;;  %2470 = vmatpush1.bf16.msra.mxu1 %v2974_v56 }
 0x662   :  { %2440 = vmatprep.subr.bf16.mxu0 %v2978_v60  ;;  %2472 = vmatprep.subr.bf16.mxu1 %v2982_v1 }
 0x665   :  { %2442 = vmatpush1.bf16.msra.mxu0 %v2989_v4  ;;  %2474 = vmatpush1.bf16.msra.mxu1 %v2993_v6 }
 0x71b   :  { %v1575_v0 = vpop.f32.mrb[12].mxu0  ;;  %v1646_v22 = vpop.f32.mrb[12].mxu1 }
 0x71c   :  { %v2487_v25 = vadd.f32 %v1575_v0, %v3045_v14  ;;  %v1577_v29 = vpop.f32.mrb[13].mxu0  ;;  %v1648_v34 = vpop.f32.mrb[13].mxu1  ;;  %v2503_v47 = vadd.f32 %v1646_v22, %v3051_v36 }
 0x71d   :  { %v2488_v35 = vadd.f32 %v1577_v29, %v3047_v16  ;;  %v2504_v50 = vadd.f32 %v1648_v34, %v3054_v44 }
 0x71e   :  { %v1949_v38 = vmul.f32 -1.442695, %v2487_v25  ;;  %v1951_v54 = vmul.f32 -1.442695, %v2503_v47 }
 0x71f   :  { %v1950_v42 = vmul.f32 -1.442695, %v2488_v35 }
 0x720   :  { %2644 = vpow2.f32 %v1949_v38 }
 0x721   :  { %2646 = vpow2.f32 %v1950_v42 }
 0x722   :  { %2648 = vtanh.f32 %v2504_v50 }
 0x723   :  { %2650 = vpow2.f32 %v1951_v54 }
 0x72a   :  { %v2645_v58 = vpop.eup %2644 }
 0x72b   :  { %v1664_v61 = vadd.f32 1.0, %v2645_v58  ;;  %v2647_v2 = vpop.eup %2646 }
 0x72c   :  { %v1665_v5 = vadd.f32 1.0, %v2647_v2  ;;  %v2649_v8 = vpop.eup %2648 }
 0x72d   :  { %2652 = vrcp.f32 %v1664_v61  ;;  %v2651_v11 = vpop.eup %2650 }
 0x72e   :  { %2654 = vrcp.f32 %v1665_v5  ;;  %v1666_v28 = vadd.f32 1.0, %v2651_v11 }
 0x730   :  { %2656 = vrcp.f32 %v1666_v28 }
 0x737   :  { %v2653_v15 = vpop.eup %2652 }
 0x738   :  { %v1675_v19 = vmul.f32 %v2653_v15, %v2649_v8  ;;  %v2655_v24 = vpop.eup %2654 }
 0x739   :  { %v1674_v33 = vmul.f32 %v2655_v24, %v3267_v57 }
 0x73a   :  { %v2657_v43 = vpop.eup %2656 }
 0x73b   :  { %v1676_v39 = vadd.f32 %v1675_v19, %v1674_v33 }
 0x73d   :  { %2658 = vtanh.f32 %v1676_v39 }
 0x747   :  { %v2659_v46 = vpop.eup %2658 }
 0x748   :  { %v1678_v52 = vmul.f32 %v2659_v46, %v2657_v43 }
 0x74a   :  { %1680 = vst [vmem:[#allocation8 + $0x30] sm:$0xff] %v1678_v52  ;;  %1753 = vmatmul.mubr.f32.vlgmr.msra.gmra.mrb[14].mxu0 %v1678_v52  ;;  %1824 = vmatmul.mubr.f32.vlgmr.msra.gmra.mrb[14].mxu1 %v1678_v52 }
 0x81d   :  { %v1754_v56 = vpop.f32.mrb[14].mxu0  ;;  %v1825_v60 = vpop.f32.mrb[14].mxu1 }
 0x81e   :  { %v2489_v1 = vadd.f32 %v1754_v56, %v3045_v14  ;;  %v1756_v4 = vpop.f32.mrb[15].mxu0  ;;  %v1827_v6 = vpop.f32.mrb[15].mxu1  ;;  %v2505_v3 = vadd.f32 %v1825_v60, %v3051_v36 }
 0x81f   :  { %v2490_v63 = vadd.f32 %v1756_v4, %v3047_v16  ;;  %v2506_v7 = vadd.f32 %v1827_v6, %v3054_v44 }
 0x820   :  { %v1952_v13 = vmul.f32 -1.442695, %v2489_v1  ;;  %v1954_v9 = vmul.f32 -1.442695, %v2505_v3 }
 0x821   :  { %v1953_v18 = vmul.f32 -1.442695, %v2490_v63 }
 0x822   :  { %2660 = vpow2.f32 %v1952_v13 }
 0x823   :  { %2662 = vpow2.f32 %v1953_v18 }
 0x824   :  { %2664 = vtanh.f32 %v2506_v7 }
 0x825   :  { %2666 = vpow2.f32 %v1954_v9 }
 0x82c   :  { %v2661_v10 = vpop.eup %2660 }
 0x82d   :  { %v1843_v20 = vadd.f32 1.0, %v2661_v10  ;;  %v2663_v23 = vpop.eup %2662 }
 0x82e   :  { %v1844_v14 = vadd.f32 1.0, %v2663_v23  ;;  %v2665_v26 = vpop.eup %2664 }
 0x82f   :  { %2668 = vrcp.f32 %v1843_v20  ;;  %v2667_v27 = vpop.eup %2666 }
 0x830   :  { %2670 = vrcp.f32 %v1844_v14  ;;  %v1845_v32 = vadd.f32 1.0, %v2667_v27 }
 0x832   :  { %2672 = vrcp.f32 %v1845_v32 }
 0x839   :  { %v2669_v16 = vpop.eup %2668 }
 0x83a   :  { %v1854_v30 = vmul.f32 %v2669_v16, %v2665_v26  ;;  %v2671_v31 = vpop.eup %2670 }
 0x83b   :  { %v1853_v17 = vmul.f32 %v2671_v31, %v1676_v39 }
 0x83c   :  { %v2673_v36 = vpop.eup %2672 }
 0x83d   :  { %v1855_v37 = vadd.f32 %v1854_v30, %v1853_v17 }
 0x83f   :  { %1863 = vst [vmem:[#allocation11] sm:$0xff] %v1855_v37  ;;  %2674 = vtanh.f32 %v1855_v37 }
 0x849   :  { %v2675_v44 = vpop.eup %2674 }
 0x84a   :  { %v1857_v21 = vmul.f32 %v2675_v44, %v2673_v36 }
 0x84c   :  { %1859 = vst [vmem:[#allocation8 + $0x38] sm:$0xff] %v1857_v21  ;;  %1862 = vst [vmem:[#allocation9] sm:$0xff] %v1857_v21 }
 0x84d   :  { %2709 = shalt.err (!%p2706_p12)
}
 0x84e   :  { %s2710_s25 = scalar_lea.hbm %s3366_s5, 128 }
 0x84f   :  { %p2711_p13 = scmp.ne.s32.totalorder %s3366_s5, %s2710_s25  ;;  %p2714_p0 = scmp.lt.u32.totalorder %s2710_s25, %s3366_s5 }
 0x851   :  { %p2716_p1 = pnand %p2714_p0, %p2711_p13 }
 0x853   :  { %2719 = shalt.err (!%p2716_p1)
}
 0x854   :  { %1885 = dma.vmem_to_hbm [thread:$0]  %s1883_s17, 128, %s3366_s5, [#allocation10]  }
 0x855   :  { %s2720_s7 = scalar_lea.vmem %s3311_s19, 1024  ;;  %p2725_p3 = scmp.lt.s32.totalorder %s3311_s19, %s3311_s19 }
 0x856   :  { %p2721_p2 = scmp.ne.s32.totalorder %s3311_s19, %s2720_s7  ;;  %p2726_p4 = scmp.lt.s32.totalorder %s2720_s7, %s2720_s7 }
 0x858   :  { %p2727_p5 = por %p2726_p4, %p2725_p3 }
 0x85a   :  { %p2728_p6 = pnand %p2727_p5, %p2721_p2 }
 0x85c   :  { %2731 = shalt.err (!%p2728_p6)
}
 0x85d   :  { %s2732_s10 = scalar_lea.hbm %s3365_s4, 1024 }
 0x85e   :  { %p2733_p7 = scmp.ne.s32.totalorder %s3365_s4, %s2732_s10  ;;  %p2736_p8 = scmp.lt.u32.totalorder %s2732_s10, %s3365_s4 }
 0x860   :  { %p2738_p9 = pnand %p2736_p8, %p2733_p7 }
 0x862   :  { %2741 = shalt.err (!%p2738_p9)
}
 0x863   :  { %s2777_s5 = smov 128   ;;  %s2778_s15 = smov 8  }
 0x864   :  { %1875 = dma.vmem_to_hbm [thread:$0]  %s3311_s19, 1024, %s3365_s4, [#allocation7], %s2777_s5, %s2777_s5, %s2778_s15  }
 0x865   :  { %s2742_s2 = scalar_lea.vmem %s3313_s21, 128  ;;  %p2747_p11 = scmp.lt.s32.totalorder %s3313_s21, %s3313_s21 }
 0x866   :  { %p2743_p10 = scmp.ne.s32.totalorder %s3313_s21, %s2742_s2  ;;  %p2748_p12 = scmp.lt.s32.totalorder %s2742_s2, %s2742_s2 }
 0x868   :  { %p2749_p13 = por %p2748_p12, %p2747_p11 }
 0x86a   :  { %p2750_p0 = pnand %p2749_p13, %p2743_p10 }
 0x86c   :  { %2753 = shalt.err (!%p2750_p0)
}
 0x86d   :  { %s2754_s18 = scalar_lea.hbm %s3367_s6, 128 }
 0x86e   :  { %p2755_p1 = scmp.ne.s32.totalorder %s3367_s6, %s2754_s18  ;;  %p2758_p2 = scmp.lt.u32.totalorder %s2754_s18, %s3367_s6 }
 0x870   :  { %p2760_p3 = pnand %p2758_p2, %p2755_p1 }
 0x872   :  { %2763 = shalt.err (!%p2760_p3)
}
 0x873   :  { %1895 = dma.vmem_to_hbm [thread:$0]  %s3313_s21, 128, %s3367_s6, [#allocation10]  }
 0x874   :  { %2766 = dma.done.wait [#allocation7], 1024  }
 0x875   :  { %2767 = vsyncadd [#allocation7], 4294966272 }
 0x876   :  { %2768 = dma.done.wait [#allocation10], 256  }
 0x877   :  { %2769 = vsyncadd [#allocation10], 4294967040 }
 0x878   :  { %1905 = vsyncpa [#allocation6], 1 }
 0x879   :  { %1906 = vsyncpa [#allocation7], 1 }
 0x87a   :  { %1907 = vsyncpa [#allocation10], 1 }

// kernel: tpu_custom_call.1
= control target key start
LH: loop header
LB: loop body
LE: loop exit
PB: predicated region body
PF: predicated region fallthrough
CT: control target
= control target key end

     0   :  { %12 = vsyncpa [#allocation6], 0  ;;  %s3361_s0 = inlined_call_operand.vmem [shape: f32[64,16], index: 0, kind: input, shape index: {}]   ;;  %s3362_s1 = inlined_call_operand.vmem [shape: f32[16,512], index: 1, kind: input, shape index: {}]   ;;  %s3363_s2 = inlined_call_operand.hbm [shape: f32[128,512], index: 2, kind: input, shape index: {}]   ;;  %s3364_s3 = inlined_call_operand.vmem [shape: f32[1,512], index: 3, kind: input, shape index: {}]   ;;  %s3365_s4 = inlined_call_operand.hbm [shape: f32[64,128], index: 4, kind: output, shape index: {0}]   ;;  %s3366_s5 = inlined_call_operand.hbm [shape: f32[8,128], index: 5, kind: output, shape index: {1}]   ;;  %s3367_s6 = inlined_call_operand.hbm [shape: f32[8,128], index: 6, kind: output, shape index: {2}]  }
   0x1   :  { %13 = vsyncpa [#allocation7], 0 }
   0x2   :  { %14 = vsyncpa [#allocation10], 0  ;;  %s2770_s21 = smov [#allocation5]   ;;  %s2676_s25 = scalar_lea.hbm %s3363_s2, 8192 }
   0x3   :  { %s24_s22 = sshll.u32 %s2770_s21, 4  ;;  %p2677_p0 = scmp.ne.s32.totalorder %s3363_s2, %s2676_s25  ;;  %s25_s22 = int_to_ptr.vmem [resolvable:$true] %s24_s22 }
   0x4   :  { %p2680_p1 = scmp.lt.u32.totalorder %s2676_s25, %s3363_s2 }
   0x6   :  { %p2682_p2 = pnand %p2680_p1, %p2677_p0 }
   0x8   :  { %2685 = shalt.err (!%p2682_p2)
}
   0x9   :  { %s2686_s30 = scalar_lea.vmem %s25_s22, 8192  ;;  %p2691_p4 = scmp.lt.s32.totalorder %s25_s22, %s25_s22 }
   0xa   :  { %p2687_p3 = scmp.ne.s32.totalorder %s25_s22, %s2686_s30  ;;  %p2692_p5 = scmp.lt.s32.totalorder %s2686_s30, %s2686_s30 }
   0xc   :  { %p2693_p6 = por %p2692_p5, %p2691_p4 }
   0xe   :  { %p2694_p7 = pnand %p2693_p6, %p2687_p3 }
  0x10   :  { %2697 = shalt.err (!%p2694_p7)
}
  0x11   :  { %s2771_s7 = smov 512   ;;  %s2772_s8 = smov 32  }
  0x12   :  { %30 = dma.hbm_to_vmem [thread:$0]  %s3363_s2, 8192, %s25_s22, [#allocation6], %s2771_s7, %s2771_s7, %s2772_s8  }
  0x13   :  { %2764 = dma.done.wait [#allocation6], 8192  }
  0x14   :  { %2765 = vsyncadd [#allocation6], 4294959104  ;;  %v2773_v0 = vmov 0.0   ;;  %v51_v1 = vld [vmem:[%s3362_s1 + $0x8] sm:$0xff]  ;;  %v53_v3 = vld [vmem:[%s3362_s1 + $0x18] sm:$0xff]  ;;  %vm80_vm0 = vcmask 130048  }
  0x15   :  { %169 = vmatprep.mubr.f32.mxu0 %v2773_v0  ;;  %282 = vmatprep.mubr.f32.mxu1 %v2773_v0  ;;  %v55_v2 = vld [vmem:[%s3362_s1 + $0x28] sm:$0xff]  ;;  %v57_v5 = vld [vmem:[%s3362_s1 + $0x38] sm:$0xff]  ;;  %v50_v6 = vld [vmem:[%s3362_s1] sm:$0xff]  ;;  %s2775_s18 = smov [#allocation8]   ;;  %s2776_s20 = smov [#allocation11]  }
  0x16   :  { %v1955_v4 = vpack.c.bf16 %v55_v2, %v51_v1  ;;  %v54_v7 = vld [vmem:[%s3362_s1 + $0x20] sm:$0xff]  ;;  %v1959_v8 = vpack.c.bf16 %v57_v5, %v53_v3  ;;  %v52_v10 = vld [vmem:[%s3362_s1 + $0x10] sm:$0xff]  ;;  %v364_v14 = vld [vmem:[#allocation5 + $0x8] sm:$0xff]  ;;  %s1869_s19 = sshll.u32 %s2775_s18, 4  ;;  %s1892_s21 = sshll.u32 %s2776_s20, 4  ;;  %s3311_s19 = int_to_ptr.vmem [resolvable:$true] %s1869_s19  ;;  %s3313_s21 = int_to_ptr.vmem [resolvable:$true] %s1892_s21 }
  0x17   :  { %v1957_v9 = vpack.c.bf16 %v54_v7, %v50_v6  ;;  %v56_v11 = vld [vmem:[%s3362_s1 + $0x30] sm:$0xff]  ;;  %v42_v12 = vld [vmem:[%s3361_s0] sm:$0xff]  ;;  %v368_v15 = vld [vmem:[#allocation5 + $0x28] sm:$0xff] }
  0x18   :  { %1956 = vmatprep.subr.bf16.mxu0 %v1955_v4  ;;  %v1961_v13 = vpack.c.bf16 %v56_v11, %v52_v10  ;;  %v366_v16 = vld [vmem:[#allocation5 + $0x18] sm:$0xff]  ;;  %1960 = vmatprep.subr.bf16.mxu1 %v1959_v8  ;;  %v2855_v17 = vpack.c.bf16 %v368_v15, %v364_v14  ;;  %v363_v19 = vld [vmem:[#allocation5] sm:$0xff]  ;;  %v365_v23 = vld [vmem:[#allocation5 + $0x10] sm:$0xff] }
  0x19   :  { %1958 = vmatpush1.bf16.msra.mxu0 %v1957_v9  ;;  %v370_v18 = vld [vmem:[#allocation5 + $0x38] sm:$0xff]  ;;  %v367_v20 = vld [vmem:[#allocation5 + $0x20] sm:$0xff]  ;;  %v369_v24 = vld [vmem:[#allocation5 + $0x30] sm:$0xff] }
  0x1a   :  { %1962 = vmatpush1.bf16.msra.mxu1 %v1961_v13  ;;  %v2857_v21 = vpack.c.bf16 %v370_v18, %v366_v16  ;;  %v2859_v22 = vpack.c.bf16 %v367_v20, %v363_v19  ;;  %1964 = vmatprep.subr.bf16.mxu0 %v2855_v17  ;;  %v2862_v25 = vpack.c.bf16 %v369_v24, %v365_v23  ;;  %v372_v26 = vld [vmem:[#allocation5 + $0x48] sm:$0xff]  ;;  %v374_v28 = vld [vmem:[#allocation5 + $0x58] sm:$0xff]  ;;  %v371_v31 = vld [vmem:[#allocation5 + $0x40] sm:$0xff] }
  0x1b   :  { %v376_v27 = vld [vmem:[#allocation5 + $0x68] sm:$0xff]  ;;  %v378_v30 = vld [vmem:[#allocation5 + $0x78] sm:$0xff]  ;;  %v375_v32 = vld [vmem:[#allocation5 + $0x60] sm:$0xff] }
  0x1c   :  { %1915 = vmatmul.mubr.msk.f32.vlgmr.msra.gmra.mrb[0].mxu0 %vm80_vm0, %v42_v12  ;;  %1996 = vmatprep.subr.bf16.mxu1 %v2857_v21  ;;  %v2866_v29 = vpack.c.bf16 %v376_v27, %v372_v26  ;;  %v43_v33 = vld [vmem:[%s3361_s0 + $0x8] sm:$0xff]  ;;  %v2873_v34 = vpack.c.bf16 %v378_v30, %v374_v28  ;;  %v2875_v35 = vpack.c.bf16 %v375_v32, %v371_v31  ;;  %v373_v36 = vld [vmem:[#allocation5 + $0x50] sm:$0xff]  ;;  %v382_v41 = vld [vmem:[#allocation5 + $0x98] sm:$0xff] }
  0x1d   :  { %1923 = vmatmul.mubr.msk.f32.vlgmr.msra.gmra.mrb[0].mxu1 %vm80_vm0, %v42_v12  ;;  %1966 = vmatpush1.bf16.msra.mxu0 %v2859_v22  ;;  %v377_v37 = vld [vmem:[#allocation5 + $0x70] sm:$0xff]  ;;  %v380_v39 = vld [vmem:[#allocation5 + $0x88] sm:$0xff]  ;;  %v386_v43 = vld [vmem:[#allocation5 + $0xb8] sm:$0xff] }
  0x1e   :  { %1998 = vmatpush1.bf16.msra.mxu1 %v2862_v25  ;;  %175 = vmatprep.mubr.f32.mxu0 %v2773_v0  ;;  %v2879_v38 = vpack.c.bf16 %v377_v37, %v373_v36  ;;  %v384_v40 = vld [vmem:[#allocation5 + $0xa8] sm:$0xff]  ;;  %v379_v44 = vld [vmem:[#allocation5 + $0x80] sm:$0xff]  ;;  %v44_v46 = vld [vmem:[%s3361_s0 + $0x10] sm:$0xff]  ;;  %v2890_v47 = vpack.c.bf16 %v386_v43, %v382_v41 }
  0x1f   :  { %288 = vmatprep.mubr.f32.mxu1 %v2773_v0  ;;  %1968 = vmatprep.subr.bf16.mxu0 %v2866_v29  ;;  %v2883_v42 = vpack.c.bf16 %v384_v40, %v380_v39  ;;  %v383_v45 = vld [vmem:[#allocation5 + $0xa0] sm:$0xff]  ;;  %v381_v48 = vld [vmem:[#allocation5 + $0x90] sm:$0xff]  ;;  %v388_v51 = vld [vmem:[#allocation5 + $0xc8] sm:$0xff] }
  0x20   :  { %1916 = vmatmul.mubr.msk.f32.gmra.mrb[2].mxu0 %vm80_vm0, %v43_v33  ;;  %2000 = vmatprep.subr.bf16.mxu1 %v2873_v34  ;;  %v385_v49 = vld [vmem:[#allocation5 + $0xb0] sm:$0xff]  ;;  %v2894_v50 = vpack.c.bf16 %v383_v45, %v379_v44  ;;  %v392_v52 = vld [vmem:[#allocation5 + $0xe8] sm:$0xff]  ;;  %v390_v53 = vld [vmem:[#allocation5 + $0xd8] sm:$0xff] }
  0x21   :  { %1924 = vmatmul.mubr.msk.f32.gmra.mrb[2].mxu1 %vm80_vm0, %v43_v33  ;;  %1970 = vmatpush1.bf16.msra.mxu0 %v2875_v35  ;;  %v2898_v54 = vpack.c.bf16 %v385_v49, %v381_v48  ;;  %v394_v55 = vld [vmem:[#allocation5 + $0xf8] sm:$0xff]  ;;  %v387_v56 = vld [vmem:[#allocation5 + $0xc0] sm:$0xff]  ;;  %v2902_v58 = vpack.c.bf16 %v392_v52, %v388_v51  ;;  %v389_v59 = vld [vmem:[#allocation5 + $0xd0] sm:$0xff] }
  0x22   :  { %2002 = vmatpush1.bf16.msra.mxu1 %v2879_v38  ;;  %181 = vmatprep.mubr.f32.mxu0 %v2773_v0  ;;  %v391_v57 = vld [vmem:[#allocation5 + $0xe0] sm:$0xff]  ;;  %v393_v60 = vld [vmem:[#allocation5 + $0xf0] sm:$0xff]  ;;  %v2906_v61 = vpack.c.bf16 %v394_v55, %v390_v53  ;;  %v396_v62 = vld [vmem:[#allocation5 + $0x108] sm:$0xff] }
  0x23   :  { %294 = vmatprep.mubr.f32.mxu1 %v2773_v0  ;;  %1972 = vmatprep.subr.bf16.mxu0 %v2883_v42  ;;  %v400_v63 = vld [vmem:[#allocation5 + $0x128] sm:$0xff]  ;;  %v45_v1 = vld [vmem:[%s3361_s0 + $0x18] sm:$0xff]  ;;  %v2913_v2 = vpack.c.bf16 %v391_v57, %v387_v56  ;;  %v2917_v5 = vpack.c.bf16 %v393_v60, %v389_v59  ;;  %v395_v6 = vld [vmem:[#allocation5 + $0x100] sm:$0xff] }
  0x24   :  { %1917 = vmatmul.mubr.msk.f32.gmra.mrb[4].mxu0 %vm80_vm0, %v44_v46  ;;  %2004 = vmatprep.subr.bf16.mxu1 %v2890_v47  ;;  %v398_v3 = vld [vmem:[#allocation5 + $0x118] sm:$0xff]  ;;  %v399_v7 = vld [vmem:[#allocation5 + $0x120] sm:$0xff]  ;;  %v2921_v8 = vpack.c.bf16 %v400_v63, %v396_v62  ;;  %v397_v9 = vld [vmem:[#allocation5 + $0x110] sm:$0xff] }
  0x25   :  { %1925 = vmatmul.mubr.msk.f32.gmra.mrb[4].mxu1 %vm80_vm0, %v44_v46  ;;  %1974 = vmatpush1.bf16.msra.mxu0 %v2894_v50  ;;  %v402_v4 = vld [vmem:[#allocation5 + $0x138] sm:$0xff]  ;;  %v401_v10 = vld [vmem:[#allocation5 + $0x130] sm:$0xff]  ;;  %v404_v12 = vld [vmem:[#allocation5 + $0x148] sm:$0xff]  ;;  %v2932_v15 = vpack.c.bf16 %v399_v7, %v395_v6  ;;  %v60_v7 = vlaneseq }
  0x26   :  { %2006 = vmatpush1.bf16.msra.mxu1 %v2898_v54  ;;  %187 = vmatprep.mubr.f32.mxu0 %v2773_v0  ;;  %v2925_v11 = vpack.c.bf16 %v402_v4, %v398_v3  ;;  %v408_v13 = vld [vmem:[#allocation5 + $0x168] sm:$0xff]  ;;  %v46_v14 = vld [vmem:[%s3361_s0 + $0x20] sm:$0xff]  ;;  %v406_v16 = vld [vmem:[#allocation5 + $0x158] sm:$0xff]  ;;  %v2936_v19 = vpack.c.bf16 %v401_v10, %v397_v9 }
  0x27   :  { %300 = vmatprep.mubr.f32.mxu1 %v2773_v0  ;;  %1976 = vmatprep.subr.bf16.mxu0 %v2902_v58  ;;  %v410_v18 = vld [vmem:[#allocation5 + $0x178] sm:$0xff]  ;;  %v403_v20 = vld [vmem:[#allocation5 + $0x140] sm:$0xff]  ;;  %v2940_v24 = vpack.c.bf16 %v408_v13, %v404_v12  ;;  %v405_v26 = vld [vmem:[#allocation5 + $0x150] sm:$0xff]  ;;  %v61_v9 = vshrl.u32 %v60_v7, 7 }
  0x28   :  { %1918 = vmatmul.mubr.msk.f32.gmra.mrb[6].mxu0 %vm80_vm0, %v45_v1  ;;  %2008 = vmatprep.subr.bf16.mxu1 %v2906_v61  ;;  %v407_v23 = vld [vmem:[#allocation5 + $0x160] sm:$0xff]  ;;  %v409_v27 = vld [vmem:[#allocation5 + $0x170] sm:$0xff]  ;;  %v2944_v28 = vpack.c.bf16 %v410_v18, %v406_v16  ;;  %v412_v30 = vld [vmem:[#allocation5 + $0x188] sm:$0xff] }
  0x29   :  { %1926 = vmatmul.mubr.msk.f32.gmra.mrb[6].mxu1 %vm80_vm0, %v45_v1  ;;  %1978 = vmatpush1.bf16.msra.mxu0 %v2913_v2  ;;  %v416_v31 = vld [vmem:[#allocation5 + $0x1a8] sm:$0xff]  ;;  %v2951_v33 = vpack.c.bf16 %v407_v23, %v403_v20  ;;  %v414_v36 = vld [vmem:[#allocation5 + $0x198] sm:$0xff]  ;;  %v2955_v39 = vpack.c.bf16 %v409_v27, %v405_v26  ;;  %v411_v40 = vld [vmem:[#allocation5 + $0x180] sm:$0xff]  ;;  %v62_v10 = vsub.s32 0, %v61_v9  ;;  %v66_v13 = vsub.s32 1, %v61_v9 }
  0x2a   :  { %2010 = vmatpush1.bf16.msra.mxu1 %v2917_v5  ;;  %193 = vmatprep.mubr.f32.mxu0 %v2773_v0  ;;  %v47_v32 = vld [vmem:[%s3361_s0 + $0x28] sm:$0xff]  ;;  %v418_v37 = vld [vmem:[#allocation5 + $0x1b8] sm:$0xff]  ;;  %v415_v41 = vld [vmem:[#allocation5 + $0x1a0] sm:$0xff]  ;;  %v2959_v43 = vpack.c.bf16 %v416_v31, %v412_v30  ;;  %v70_v20 = vsub.s32 2, %v61_v9 }
  0x2b   :  { %306 = vmatprep.mubr.f32.mxu1 %v2773_v0  ;;  %1980 = vmatprep.subr.bf16.mxu0 %v2921_v8  ;;  %v413_v44 = vld [vmem:[#allocation5 + $0x190] sm:$0xff]  ;;  %v2963_v46 = vpack.c.bf16 %v418_v37, %v414_v36  ;;  %v420_v48 = vld [vmem:[#allocation5 + $0x1c8] sm:$0xff]  ;;  %v2970_v52 = vpack.c.bf16 %v415_v41, %v411_v40  ;;  %v422_v53 = vld [vmem:[#allocation5 + $0x1d8] sm:$0xff]  ;;  %v74_v40 = vsub.s32 3, %v61_v9 }
  0x2c   :  { %1919 = vmatmul.mubr.msk.f32.gmra.mrb[8].mxu0 %vm80_vm0, %v46_v14  ;;  %2012 = vmatprep.subr.bf16.mxu1 %v2925_v11  ;;  %v417_v45 = vld [vmem:[#allocation5 + $0x1b0] sm:$0xff]  ;;  %v424_v49 = vld [vmem:[#allocation5 + $0x1e8] sm:$0xff]  ;;  %v426_v55 = vld [vmem:[#allocation5 + $0x1f8] sm:$0xff] }
  0x2d   :  { %1927 = vmatmul.mubr.msk.f32.gmra.mrb[8].mxu1 %vm80_vm0, %v46_v14  ;;  %1982 = vmatpush1.bf16.msra.mxu0 %v2932_v15  ;;  %v48_v51 = vld [vmem:[%s3361_s0 + $0x30] sm:$0xff]  ;;  %v2974_v56 = vpack.c.bf16 %v417_v45, %v413_v44  ;;  %v419_v57 = vld [vmem:[#allocation5 + $0x1c0] sm:$0xff]  ;;  %v2978_v60 = vpack.c.bf16 %v424_v49, %v420_v48  ;;  %v2982_v1 = vpack.c.bf16 %v426_v55, %v422_v53  ;;  %v49_v3 = vld [vmem:[%s3361_s0 + $0x38] sm:$0xff] }
  0x2e   :  { %2014 = vmatpush1.bf16.msra.mxu1 %v2936_v19  ;;  %199 = vmatprep.mubr.f32.mxu0 %v2773_v0  ;;  %v423_v59 = vld [vmem:[#allocation5 + $0x1e0] sm:$0xff]  ;;  %v421_v62 = vld [vmem:[#allocation5 + $0x1d0] sm:$0xff] }
  0x2f   :  { %312 = vmatprep.mubr.f32.mxu1 %v2773_v0  ;;  %1984 = vmatprep.subr.bf16.mxu0 %v2940_v24  ;;  %v425_v63 = vld [vmem:[#allocation5 + $0x1f0] sm:$0xff]  ;;  %v2989_v4 = vpack.c.bf16 %v423_v59, %v419_v57  ;;  %v58_v12 = vld [vmem:[%s3364_s3] sm:$0xf]  ;;  %s2774_s3 = smov [#allocation9]  }
  0x30   :  { %1920 = vmatmul.mubr.msk.f32.gmra.mrb[10].mxu0 %vm80_vm0, %v47_v32  ;;  %2016 = vmatprep.subr.bf16.mxu1 %v2944_v28  ;;  %v2993_v6 = vpack.c.bf16 %v425_v63, %v421_v62  ;;  %v3045_v14 = vrot.slane %v58_v12, %v62_v10  ;;  %v3047_v16 = vrot.slane %v58_v12, %v66_v13  ;;  %s1882_s17 = sshll.u32 %s2774_s3, 4  ;;  %s1883_s17 = int_to_ptr.vmem [resolvable:$true] %s1882_s17 }
  0x31   :  { %1928 = vmatmul.mubr.msk.f32.gmra.mrb[10].mxu1 %vm80_vm0, %v47_v32  ;;  %1986 = vmatpush1.bf16.msra.mxu0 %v2951_v33  ;;  %v3051_v36 = vrot.slane %v58_v12, %v70_v20  ;;  %v3054_v44 = vrot.slane %v58_v12, %v74_v40  ;;  %s2698_s22 = scalar_lea.vmem %s1883_s17, 128  ;;  %p2703_p9 = scmp.lt.s32.totalorder %s1883_s17, %s1883_s17 }
  0x32   :  { %2018 = vmatpush1.bf16.msra.mxu1 %v2955_v39  ;;  %205 = vmatprep.mubr.f32.mxu0 %v2773_v0  ;;  %p2699_p8 = scmp.ne.s32.totalorder %s1883_s17, %s2698_s22  ;;  %p2704_p10 = scmp.lt.s32.totalorder %s2698_s22, %s2698_s22 }
  0x33   :  { %318 = vmatprep.mubr.f32.mxu1 %v2773_v0  ;;  %1988 = vmatprep.subr.bf16.mxu0 %v2959_v43 }
  0x34   :  { %1921 = vmatmul.mubr.msk.f32.gmra.mrb[12].mxu0 %vm80_vm0, %v48_v51  ;;  %2020 = vmatprep.subr.bf16.mxu1 %v2963_v46  ;;  %p2705_p11 = por %p2704_p10, %p2703_p9 }
  0x35   :  { %1929 = vmatmul.mubr.msk.f32.gmra.mrb[12].mxu1 %vm80_vm0, %v48_v51  ;;  %1990 = vmatpush1.bf16.msra.mxu0 %v2970_v52 }
  0x36   :  { %2022 = vmatpush1.bf16.msra.mxu1 %v2974_v56  ;;  %211 = vmatprep.mubr.f32.mxu0 %v2773_v0  ;;  %p2706_p12 = pnand %p2705_p11, %p2699_p8 }
  0x37   :  { %324 = vmatprep.mubr.f32.mxu1 %v2773_v0  ;;  %1992 = vmatprep.subr.bf16.mxu0 %v2978_v60 }
  0x38   :  { %1922 = vmatmul.mubr.msk.f32.gmra.mrb[14].mxu0 %vm80_vm0, %v49_v3  ;;  %2024 = vmatprep.subr.bf16.mxu1 %v2982_v1 }
  0x39   :  { %1930 = vmatmul.mubr.msk.f32.gmra.mrb[14].mxu1 %vm80_vm0, %v49_v3  ;;  %1994 = vmatpush1.bf16.msra.mxu0 %v2989_v4 }
  0x3a   :  { %2026 = vmatpush1.bf16.msra.mxu1 %v2993_v6  ;;  %500 = vmatprep.mubr.f32.mxu0 %v2773_v0 }
  0x3b   :  { %571 = vmatprep.mubr.f32.mxu1 %v2773_v0  ;;  %2028 = vmatprep.subr.bf16.mxu0 %v2855_v17 }
  0x3c   :  { %501 = vmatmul.mubr.f32.vlgmr.msra.gmra.mrb[0].mxu0 %v2773_v0  ;;  %2060 = vmatprep.subr.bf16.mxu1 %v2857_v21 }
  0x3d   :  { %572 = vmatmul.mubr.f32.vlgmr.msra.gmra.mrb[0].mxu1 %v2773_v0  ;;  %2030 = vmatpush1.bf16.msra.mxu0 %v2859_v22 }
  0x3e   :  { %2062 = vmatpush1.bf16.msra.mxu1 %v2862_v25  ;;  %2032 = vmatprep.subr.bf16.mxu0 %v2866_v29 }
  0x3f   :  { %2064 = vmatprep.subr.bf16.mxu1 %v2873_v34  ;;  %678 = vmatprep.mubr.f32.mxu0 %v2773_v0 }
  0x40   :  { %749 = vmatprep.mubr.f32.mxu1 %v2773_v0 }
  0x41   :  { %2034 = vmatpush1.bf16.msra.mxu0 %v2875_v35 }
  0x42   :  { %2066 = vmatpush1.bf16.msra.mxu1 %v2879_v38  ;;  %2036 = vmatprep.subr.bf16.mxu0 %v2883_v42 }
  0x43   :  { %2068 = vmatprep.subr.bf16.mxu1 %v2890_v47 }
  0x45   :  { %2038 = vmatpush1.bf16.msra.mxu0 %v2894_v50 }
  0x46   :  { %2070 = vmatpush1.bf16.msra.mxu1 %v2898_v54  ;;  %2040 = vmatprep.subr.bf16.mxu0 %v2902_v58 }
  0x47   :  { %2072 = vmatprep.subr.bf16.mxu1 %v2906_v61 }
  0x49   :  { %2042 = vmatpush1.bf16.msra.mxu0 %v2913_v2 }
  0x4a   :  { %2074 = vmatpush1.bf16.msra.mxu1 %v2917_v5  ;;  %2044 = vmatprep.subr.bf16.mxu0 %v2921_v8 }
  0x4b   :  { %2076 = vmatprep.subr.bf16.mxu1 %v2925_v11 }
  0x4d   :  { %2046 = vmatpush1.bf16.msra.mxu0 %v2932_v15 }
  0x4e   :  { %2078 = vmatpush1.bf16.msra.mxu1 %v2936_v19  ;;  %2048 = vmatprep.subr.bf16.mxu0 %v2940_v24 }
  0x4f   :  { %2080 = vmatprep.subr.bf16.mxu1 %v2944_v28 }
  0x51   :  { %2050 = vmatpush1.bf16.msra.mxu0 %v2951_v33 }
  0x52   :  { %2082 = vmatpush1.bf16.msra.mxu1 %v2955_v39  ;;  %2052 = vmatprep.subr.bf16.mxu0 %v2959_v43 }
  0x53   :  { %2084 = vmatprep.subr.bf16.mxu1 %v2963_v46 }
  0x55   :  { %2054 = vmatpush1.bf16.msra.mxu0 %v2970_v52 }
  0x56   :  { %2086 = vmatpush1.bf16.msra.mxu1 %v2974_v56  ;;  %2056 = vmatprep.subr.bf16.mxu0 %v2978_v60 }
  0x57   :  { %2088 = vmatprep.subr.bf16.mxu1 %v2982_v1 }
  0x59   :  { %2058 = vmatpush1.bf16.msra.mxu0 %v2989_v4 }
  0x5a   :  { %2090 = vmatpush1.bf16.msra.mxu1 %v2993_v6  ;;  %2092 = vmatprep.subr.bf16.mxu0 %v2855_v17 }
  0x5b   :  { %2124 = vmatprep.subr.bf16.mxu1 %v2857_v21 }
 0x10f   :  { %v502_v18 = vpop.f32.mrb[0].mxu0 }
 0x110   :  { %v2475_v23 = vadd.f32 %v502_v18, %v3045_v14  ;;  %v573_v26 = vpop.f32.mrb[0].mxu1  ;;  %v504_v27 = vpop.f32.mrb[1].mxu0 }
 0x111   :  { %v2476_v30 = vadd.f32 %v504_v27, %v3047_v16  ;;  %v575_v31 = vpop.f32.mrb[1].mxu1  ;;  %v2491_v41 = vadd.f32 %v573_v26, %v3051_v36 }
 0x112   :  { %v1931_v32 = vmul.f32 -1.442695, %v2475_v23  ;;  %v2492_v48 = vadd.f32 %v575_v31, %v3054_v44 }
 0x113   :  { %v1932_v37 = vmul.f32 -1.442695, %v2476_v30  ;;  %v1933_v45 = vmul.f32 -1.442695, %v2491_v41 }
 0x114   :  { %2548 = vpow2.f32 %v1931_v32 }
 0x115   :  { %2550 = vpow2.f32 %v1932_v37 }
 0x116   :  { %2552 = vpow2.f32 %v1933_v45 }
 0x117   :  { %2554 = vtanh.f32 %v2492_v48 }
 0x11e   :  { %v2549_v49 = vpop.eup %2548 }
 0x11f   :  { %v591_v51 = vadd.f32 1.0, %v2549_v49  ;;  %v2551_v53 = vpop.eup %2550 }
 0x120   :  { %v592_v55 = vadd.f32 1.0, %v2551_v53  ;;  %v2553_v57 = vpop.eup %2552 }
 0x121   :  { %2556 = vrcp.f32 %v591_v51  ;;  %v2555_v59 = vpop.eup %2554  ;;  %v593_v7 = vadd.f32 1.0, %v2553_v57 }
 0x122   :  { %2558 = vrcp.f32 %v592_v55 }
 0x123   :  { %2560 = vrcp.f32 %v593_v7 }
 0x12b   :  { %v2557_v62 = vpop.eup %2556 }
 0x12c   :  { %v602_v63 = vmul.f32 %v2557_v62, %v2555_v59  ;;  %v2559_v3 = vpop.eup %2558 }
 0x12d   :  { %v601_v9 = vmul.f32 0.0, %v2559_v3  ;;  %v2561_v12 = vpop.eup %2560 }
 0x12f   :  { %v3057_v10 = vadd.f32 %v602_v63, %v601_v9 }
 0x131   :  { %2562 = vtanh.f32 %v3057_v10 }
 0x13b   :  { %v2563_v13 = vpop.eup %2562 }
 0x13c   :  { %v605_v18 = vmul.f32 %v2563_v13, %v2561_v12 }
 0x13e   :  { %606 = vst [vmem:[#allocation8] sm:$0xff] %v605_v18  ;;  %679 = vmatmul.mubr.f32.vlgmr.msra.gmra.mrb[2].mxu0 %v605_v18  ;;  %750 = vmatmul.mubr.f32.vlgmr.msra.gmra.mrb[2].mxu1 %v605_v18 }
 0x13f   :  { %2094 = vmatpush1.bf16.msra.mxu0 %v2859_v22  ;;  %2126 = vmatpush1.bf16.msra.mxu1 %v2862_v25 }
 0x140   :  { %2096 = vmatprep.subr.bf16.mxu0 %v2866_v29  ;;  %2128 = vmatprep.subr.bf16.mxu1 %v2873_v34 }
 0x141   :  { %857 = vmatprep.mubr.f32.mxu0 %v2773_v0  ;;  %928 = vmatprep.mubr.f32.mxu1 %v2773_v0 }
 0x143   :  { %2098 = vmatpush1.bf16.msra.mxu0 %v2875_v35  ;;  %2130 = vmatpush1.bf16.msra.mxu1 %v2879_v38 }
 0x144   :  { %2100 = vmatprep.subr.bf16.mxu0 %v2883_v42  ;;  %2132 = vmatprep.subr.bf16.mxu1 %v2890_v47 }
 0x147   :  { %2102 = vmatpush1.bf16.msra.mxu0 %v2894_v50  ;;  %2134 = vmatpush1.bf16.msra.mxu1 %v2898_v54 }
 0x148   :  { %2104 = vmatprep.subr.bf16.mxu0 %v2902_v58  ;;  %2136 = vmatprep.subr.bf16.mxu1 %v2906_v61 }
 0x14b   :  { %2106 = vmatpush1.bf16.msra.mxu0 %v2913_v2  ;;  %2138 = vmatpush1.bf16.msra.mxu1 %v2917_v5 }
 0x14c   :  { %2108 = vmatprep.subr.bf16.mxu0 %v2921_v8  ;;  %2140 = vmatprep.subr.bf16.mxu1 %v2925_v11 }
 0x14f   :  { %2110 = vmatpush1.bf16.msra.mxu0 %v2932_v15  ;;  %2142 = vmatpush1.bf16.msra.mxu1 %v2936_v19 }
 0x150   :  { %2112 = vmatprep.subr.bf16.mxu0 %v2940_v24  ;;  %2144 = vmatprep.subr.bf16.mxu1 %v2944_v28 }
 0x153   :  { %2114 = vmatpush1.bf16.msra.mxu0 %v2951_v33  ;;  %2146 = vmatpush1.bf16.msra.mxu1 %v2955_v39 }
 0x154   :  { %2116 = vmatprep.subr.bf16.mxu0 %v2959_v43  ;;  %2148 = vmatprep.subr.bf16.mxu1 %v2963_v46 }
 0x157   :  { %2118 = vmatpush1.bf16.msra.mxu0 %v2970_v52  ;;  %2150 = vmatpush1.bf16.msra.mxu1 %v2974_v56 }
 0x158   :  { %2120 = vmatprep.subr.bf16.mxu0 %v2978_v60  ;;  %2152 = vmatprep.subr.bf16.mxu1 %v2982_v1 }
 0x15b   :  { %2122 = vmatpush1.bf16.msra.mxu0 %v2989_v4  ;;  %2154 = vmatpush1.bf16.msra.mxu1 %v2993_v6 }
 0x15c   :  { %2156 = vmatprep.subr.bf16.mxu0 %v2855_v17  ;;  %2188 = vmatprep.subr.bf16.mxu1 %v2857_v21 }
 0x211   :  { %v680_v20 = vpop.f32.mrb[2].mxu0  ;;  %v751_v23 = vpop.f32.mrb[2].mxu1 }
 0x212   :  { %v2477_v26 = vadd.f32 %v680_v20, %v3045_v14  ;;  %v682_v27 = vpop.f32.mrb[3].mxu0  ;;  %v753_v30 = vpop.f32.mrb[3].mxu1  ;;  %v2493_v40 = vadd.f32 %v751_v23, %v3051_v36 }
 0x213   :  { %v2478_v31 = vadd.f32 %v682_v27, %v3047_v16  ;;  %v2494_v41 = vadd.f32 %v753_v30, %v3054_v44 }
 0x214   :  { %v1934_v32 = vmul.f32 -1.442695, %v2477_v26  ;;  %v1936_v45 = vmul.f32 -1.442695, %v2493_v40 }
 0x215   :  { %v1935_v37 = vmul.f32 -1.442695, %v2478_v31 }
 0x216   :  { %2564 = vpow2.f32 %v1934_v32 }
 0x217   :  { %2566 = vpow2.f32 %v1935_v37 }
 0x218   :  { %2568 = vtanh.f32 %v2494_v41 }
 0x219   :  { %2570 = vpow2.f32 %v1936_v45 }
 0x220   :  { %v2565_v48 = vpop.eup %2564 }
 0x221   :  { %v769_v49 = vadd.f32 1.0, %v2565_v48  ;;  %v2567_v51 = vpop.eup %2566 }
 0x222   :  { %v770_v53 = vadd.f32 1.0, %v2567_v51  ;;  %v2569_v55 = vpop.eup %2568 }
 0x223   :  { %2572 = vrcp.f32 %v769_v49  ;;  %v2571_v57 = vpop.eup %2570 }
 0x224   :  { %2574 = vrcp.f32 %v770_v53  ;;  %v771_v3 = vadd.f32 1.0, %v2571_v57 }
 0x226   :  { %2576 = vrcp.f32 %v771_v3 }
 0x22d   :  { %v2573_v59 = vpop.eup %2572 }
 0x22e   :  { %v780_v62 = vmul.f32 %v2573_v59, %v2569_v55  ;;  %v2575_v63 = vpop.eup %2574 }
 0x22f   :  { %v779_v7 = vmul.f32 %v2575_v63, %v3057_v10 }
 0x230   :  { %v2577_v12 = vpop.eup %2576 }
 0x231   :  { %v3099_v9 = vadd.f32 %v780_v62, %v779_v7 }
 0x233   :  { %2578 = vtanh.f32 %v3099_v9 }
 0x23d   :  { %v2579_v13 = vpop.eup %2578 }
 0x23e   :  { %v783_v18 = vmul.f32 %v2579_v13, %v2577_v12 }
 0x240   :  { %785 = vst [vmem:[#allocation8 + $0x8] sm:$0xff] %v783_v18  ;;  %858 = vmatmul.mubr.f32.vlgmr.msra.gmra.mrb[4].mxu0 %v783_v18  ;;  %929 = vmatmul.mubr.f32.vlgmr.msra.gmra.mrb[4].mxu1 %v783_v18 }
 0x241   :  { %2158 = vmatpush1.bf16.msra.mxu0 %v2859_v22  ;;  %2190 = vmatpush1.bf16.msra.mxu1 %v2862_v25 }
 0x242   :  { %2160 = vmatprep.subr.bf16.mxu0 %v2866_v29  ;;  %2192 = vmatprep.subr.bf16.mxu1 %v2873_v34 }
 0x243   :  { %1036 = vmatprep.mubr.f32.mxu0 %v2773_v0  ;;  %1107 = vmatprep.mubr.f32.mxu1 %v2773_v0 }
 0x245   :  { %2162 = vmatpush1.bf16.msra.mxu0 %v2875_v35  ;;  %2194 = vmatpush1.bf16.msra.mxu1 %v2879_v38 }
 0x246   :  { %2164 = vmatprep.subr.bf16.mxu0 %v2883_v42  ;;  %2196 = vmatprep.subr.bf16.mxu1 %v2890_v47 }
 0x249   :  { %2166 = vmatpush1.bf16.msra.mxu0 %v2894_v50  ;;  %2198 = vmatpush1.bf16.msra.mxu1 %v2898_v54 }
 0x24a   :  { %2168 = vmatprep.subr.bf16.mxu0 %v2902_v58  ;;  %2200 = vmatprep.subr.bf16.mxu1 %v2906_v61 }
 0x24d   :  { %2170 = vmatpush1.bf16.msra.mxu0 %v2913_v2  ;;  %2202 = vmatpush1.bf16.msra.mxu1 %v2917_v5 }
 0x24e   :  { %2172 = vmatprep.subr.bf16.mxu0 %v2921_v8  ;;  %2204 = vmatprep.subr.bf16.mxu1 %v2925_v11 }
 0x251   :  { %2174 = vmatpush1.bf16.msra.mxu0 %v2932_v15  ;;  %2206 = vmatpush1.bf16.msra.mxu1 %v2936_v19 }
 0x252   :  { %2176 = vmatprep.subr.bf16.mxu0 %v2940_v24  ;;  %2208 = vmatprep.subr.bf16.mxu1 %v2944_v28 }
 0x255   :  { %2178 = vmatpush1.bf16.msra.mxu0 %v2951_v33  ;;  %2210 = vmatpush1.bf16.msra.mxu1 %v2955_v39 }
 0x256   :  { %2180 = vmatprep.subr.bf16.mxu0 %v2959_v43  ;;  %2212 = vmatprep.subr.bf16.mxu1 %v2963_v46 }
 0x259   :  { %2182 = vmatpush1.bf16.msra.mxu0 %v2970_v52  ;;  %2214 = vmatpush1.bf16.msra.mxu1 %v2974_v56 }
 0x25a   :  { %2184 = vmatprep.subr.bf16.mxu0 %v2978_v60  ;;  %2216 = vmatprep.subr.bf16.mxu1 %v2982_v1 }
 0x25d   :  { %2186 = vmatpush1.bf16.msra.mxu0 %v2989_v4  ;;  %2218 = vmatpush1.bf16.msra.mxu1 %v2993_v6 }
 0x25e   :  { %2220 = vmatprep.subr.bf16.mxu0 %v2855_v17  ;;  %2252 = vmatprep.subr.bf16.mxu1 %v2857_v21 }
 0x313   :  { %v859_v10 = vpop.f32.mrb[4].mxu0  ;;  %v930_v20 = vpop.f32.mrb[4].mxu1 }
 0x314   :  { %v2479_v23 = vadd.f32 %v859_v10, %v3045_v14  ;;  %v861_v26 = vpop.f32.mrb[5].mxu0  ;;  %v932_v27 = vpop.f32.mrb[5].mxu1  ;;  %v2495_v37 = vadd.f32 %v930_v20, %v3051_v36 }
 0x315   :  { %v2480_v30 = vadd.f32 %v861_v26, %v3047_v16  ;;  %v2496_v40 = vadd.f32 %v932_v27, %v3054_v44 }
 0x316   :  { %v1937_v31 = vmul.f32 -1.442695, %v2479_v23  ;;  %v1939_v41 = vmul.f32 -1.442695, %v2495_v37 }
 0x317   :  { %v1938_v32 = vmul.f32 -1.442695, %v2480_v30 }
 0x318   :  { %2580 = vpow2.f32 %v1937_v31 }
 0x319   :  { %2582 = vpow2.f32 %v1938_v32 }
 0x31a   :  { %2584 = vtanh.f32 %v2496_v40 }
 0x31b   :  { %2586 = vpow2.f32 %v1939_v41 }
 0x322   :  { %v2581_v45 = vpop.eup %2580 }
 0x323   :  { %v948_v48 = vadd.f32 1.0, %v2581_v45  ;;  %v2583_v49 = vpop.eup %2582 }
 0x324   :  { %v949_v51 = vadd.f32 1.0, %v2583_v49  ;;  %v2585_v53 = vpop.eup %2584 }
 0x325   :  { %2588 = vrcp.f32 %v948_v48  ;;  %v2587_v55 = vpop.eup %2586 }
 0x326   :  { %2590 = vrcp.f32 %v949_v51  ;;  %v950_v63 = vadd.f32 1.0, %v2587_v55 }
 0x328   :  { %2592 = vrcp.f32 %v950_v63 }
 0x32f   :  { %v2589_v57 = vpop.eup %2588 }
 0x330   :  { %v959_v59 = vmul.f32 %v2589_v57, %v2585_v53  ;;  %v2591_v62 = vpop.eup %2590 }
 0x331   :  { %v958_v3 = vmul.f32 %v2591_v62, %v3099_v9 }
 0x332   :  { %v2593_v12 = vpop.eup %2592 }
 0x333   :  { %v3141_v7 = vadd.f32 %v959_v59, %v958_v3 }
 0x335   :  { %2594 = vtanh.f32 %v3141_v7 }
 0x33f   :  { %v2595_v13 = vpop.eup %2594 }
 0x340   :  { %v962_v18 = vmul.f32 %v2595_v13, %v2593_v12 }
 0x342   :  { %964 = vst [vmem:[#allocation8 + $0x10] sm:$0xff] %v962_v18  ;;  %1037 = vmatmul.mubr.f32.vlgmr.msra.gmra.mrb[6].mxu0 %v962_v18  ;;  %1108 = vmatmul.mubr.f32.vlgmr.msra.gmra.mrb[6].mxu1 %v962_v18 }
 0x343   :  { %2222 = vmatpush1.bf16.msra.mxu0 %v2859_v22  ;;  %2254 = vmatpush1.bf16.msra.mxu1 %v2862_v25 }
 0x344   :  { %2224 = vmatprep.subr.bf16.mxu0 %v2866_v29  ;;  %2256 = vmatprep.subr.bf16.mxu1 %v2873_v34 }
 0x345   :  { %1215 = vmatprep.mubr.f32.mxu0 %v2773_v0  ;;  %1286 = vmatprep.mubr.f32.mxu1 %v2773_v0 }
 0x347   :  { %2226 = vmatpush1.bf16.msra.mxu0 %v2875_v35  ;;  %2258 = vmatpush1.bf16.msra.mxu1 %v2879_v38 }
 0x348   :  { %2228 = vmatprep.subr.bf16.mxu0 %v2883_v42  ;;  %2260 = vmatprep.subr.bf16.mxu1 %v2890_v47 }
 0x34b   :  { %2230 = vmatpush1.bf16.msra.mxu0 %v2894_v50  ;;  %2262 = vmatpush1.bf16.msra.mxu1 %v2898_v54 }
 0x34c   :  { %2232 = vmatprep.subr.bf16.mxu0 %v2902_v58  ;;  %2264 = vmatprep.subr.bf16.mxu1 %v2906_v61 }
 0x34f   :  { %2234 = vmatpush1.bf16.msra.mxu0 %v2913_v2  ;;  %2266 = vmatpush1.bf16.msra.mxu1 %v2917_v5 }
 0x350   :  { %2236 = vmatprep.subr.bf16.mxu0 %v2921_v8  ;;  %2268 = vmatprep.subr.bf16.mxu1 %v2925_v11 }
 0x353   :  { %2238 = vmatpush1.bf16.msra.mxu0 %v2932_v15  ;;  %2270 = vmatpush1.bf16.msra.mxu1 %v2936_v19 }
 0x354   :  { %2240 = vmatprep.subr.bf16.mxu0 %v2940_v24  ;;  %2272 = vmatprep.subr.bf16.mxu1 %v2944_v28 }
 0x357   :  { %2242 = vmatpush1.bf16.msra.mxu0 %v2951_v33  ;;  %2274 = vmatpush1.bf16.msra.mxu1 %v2955_v39 }
 0x358   :  { %2244 = vmatprep.subr.bf16.mxu0 %v2959_v43  ;;  %2276 = vmatprep.subr.bf16.mxu1 %v2963_v46 }
 0x35b   :  { %2246 = vmatpush1.bf16.msra.mxu0 %v2970_v52  ;;  %2278 = vmatpush1.bf16.msra.mxu1 %v2974_v56 }
 0x35c   :  { %2248 = vmatprep.subr.bf16.mxu0 %v2978_v60  ;;  %2280 = vmatprep.subr.bf16.mxu1 %v2982_v1 }
 0x35f   :  { %2250 = vmatpush1.bf16.msra.mxu0 %v2989_v4  ;;  %2282 = vmatpush1.bf16.msra.mxu1 %v2993_v6 }
 0x360   :  { %2284 = vmatprep.subr.bf16.mxu0 %v2855_v17  ;;  %2316 = vmatprep.subr.bf16.mxu1 %v2857_v21 }
 0x415   :  { %v1038_v9 = vpop.f32.mrb[6].mxu0  ;;  %v1109_v10 = vpop.f32.mrb[6].mxu1 }
 0x416   :  { %v2481_v20 = vadd.f32 %v1038_v9, %v3045_v14  ;;  %v1040_v23 = vpop.f32.mrb[7].mxu0  ;;  %v1111_v26 = vpop.f32.mrb[7].mxu1  ;;  %v2497_v32 = vadd.f32 %v1109_v10, %v3051_v36 }
 0x417   :  { %v2482_v27 = vadd.f32 %v1040_v23, %v3047_v16  ;;  %v2498_v37 = vadd.f32 %v1111_v26, %v3054_v44 }
 0x418   :  { %v1940_v30 = vmul.f32 -1.442695, %v2481_v20  ;;  %v1942_v40 = vmul.f32 -1.442695, %v2497_v32 }
 0x419   :  { %v1941_v31 = vmul.f32 -1.442695, %v2482_v27 }
 0x41a   :  { %2596 = vpow2.f32 %v1940_v30 }
 0x41b   :  { %2598 = vpow2.f32 %v1941_v31 }
 0x41c   :  { %2600 = vtanh.f32 %v2498_v37 }
 0x41d   :  { %2602 = vpow2.f32 %v1942_v40 }
 0x424   :  { %v2597_v41 = vpop.eup %2596 }
 0x425   :  { %v1127_v45 = vadd.f32 1.0, %v2597_v41  ;;  %v2599_v48 = vpop.eup %2598 }
 0x426   :  { %v1128_v49 = vadd.f32 1.0, %v2599_v48  ;;  %v2601_v51 = vpop.eup %2600 }
 0x427   :  { %2604 = vrcp.f32 %v1127_v45  ;;  %v2603_v53 = vpop.eup %2602 }
 0x428   :  { %2606 = vrcp.f32 %v1128_v49  ;;  %v1129_v62 = vadd.f32 1.0, %v2603_v53 }
 0x42a   :  { %2608 = vrcp.f32 %v1129_v62 }
 0x431   :  { %v2605_v55 = vpop.eup %2604 }
 0x432   :  { %v1138_v57 = vmul.f32 %v2605_v55, %v2601_v51  ;;  %v2607_v59 = vpop.eup %2606 }
 0x433   :  { %v1137_v63 = vmul.f32 %v2607_v59, %v3141_v7 }
 0x434   :  { %v2609_v12 = vpop.eup %2608 }
 0x435   :  { %v3183_v3 = vadd.f32 %v1138_v57, %v1137_v63 }
 0x437   :  { %2610 = vtanh.f32 %v3183_v3 }
 0x441   :  { %v2611_v13 = vpop.eup %2610 }
 0x442   :  { %v1141_v18 = vmul.f32 %v2611_v13, %v2609_v12 }
 0x444   :  { %1143 = vst [vmem:[#allocation8 + $0x18] sm:$0xff] %v1141_v18  ;;  %1216 = vmatmul.mubr.f32.vlgmr.msra.gmra.mrb[8].mxu0 %v1141_v18  ;;  %1287 = vmatmul.mubr.f32.vlgmr.msra.gmra.mrb[8].mxu1 %v1141_v18 }
 0x445   :  { %2286 = vmatpush1.bf16.msra.mxu0 %v2859_v22  ;;  %2318 = vmatpush1.bf16.msra.mxu1 %v2862_v25 }
 0x446   :  { %2288 = vmatprep.subr.bf16.mxu0 %v2866_v29  ;;  %2320 = vmatprep.subr.bf16.mxu1 %v2873_v34 }
 0x447   :  { %1394 = vmatprep.mubr.f32.mxu0 %v2773_v0  ;;  %1465 = vmatprep.mubr.f32.mxu1 %v2773_v0 }
 0x449   :  { %2290 = vmatpush1.bf16.msra.mxu0 %v2875_v35  ;;  %2322 = vmatpush1.bf16.msra.mxu1 %v2879_v38 }
 0x44a   :  { %2292 = vmatprep.subr.bf16.mxu0 %v2883_v42  ;;  %2324 = vmatprep.subr.bf16.mxu1 %v2890_v47 }
 0x44d   :  { %2294 = vmatpush1.bf16.msra.mxu0 %v2894_v50  ;;  %2326 = vmatpush1.bf16.msra.mxu1 %v2898_v54 }
 0x44e   :  { %2296 = vmatprep.subr.bf16.mxu0 %v2902_v58  ;;  %2328 = vmatprep.subr.bf16.mxu1 %v2906_v61 }
 0x451   :  { %2298 = vmatpush1.bf16.msra.mxu0 %v2913_v2  ;;  %2330 = vmatpush1.bf16.msra.mxu1 %v2917_v5 }
 0x452   :  { %2300 = vmatprep.subr.bf16.mxu0 %v2921_v8  ;;  %2332 = vmatprep.subr.bf16.mxu1 %v2925_v11 }
 0x455   :  { %2302 = vmatpush1.bf16.msra.mxu0 %v2932_v15  ;;  %2334 = vmatpush1.bf16.msra.mxu1 %v2936_v19 }
 0x456   :  { %2304 = vmatprep.subr.bf16.mxu0 %v2940_v24  ;;  %2336 = vmatprep.subr.bf16.mxu1 %v2944_v28 }
 0x459   :  { %2306 = vmatpush1.bf16.msra.mxu0 %v2951_v33  ;;  %2338 = vmatpush1.bf16.msra.mxu1 %v2955_v39 }
 0x45a   :  { %2308 = vmatprep.subr.bf16.mxu0 %v2959_v43  ;;  %2340 = vmatprep.subr.bf16.mxu1 %v2963_v46 }
 0x45d   :  { %2310 = vmatpush1.bf16.msra.mxu0 %v2970_v52  ;;  %2342 = vmatpush1.bf16.msra.mxu1 %v2974_v56 }
 0x45e   :  { %2312 = vmatprep.subr.bf16.mxu0 %v2978_v60  ;;  %2344 = vmatprep.subr.bf16.mxu1 %v2982_v1 }
 0x461   :  { %2314 = vmatpush1.bf16.msra.mxu0 %v2989_v4  ;;  %2346 = vmatpush1.bf16.msra.mxu1 %v2993_v6 }
 0x462   :  { %2348 = vmatprep.subr.bf16.mxu0 %v2855_v17  ;;  %2380 = vmatprep.subr.bf16.mxu1 %v2857_v21 }
 0x517   :  { %v1217_v7 = vpop.f32.mrb[8].mxu0  ;;  %v1288_v9 = vpop.f32.mrb[8].mxu1 }
 0x518   :  { %v2483_v10 = vadd.f32 %v1217_v7, %v3045_v14  ;;  %v1219_v20 = vpop.f32.mrb[9].mxu0  ;;  %v1290_v23 = vpop.f32.mrb[9].mxu1  ;;  %v2499_v31 = vadd.f32 %v1288_v9, %v3051_v36 }
 0x519   :  { %v2484_v26 = vadd.f32 %v1219_v20, %v3047_v16  ;;  %v2500_v32 = vadd.f32 %v1290_v23, %v3054_v44 }
 0x51a   :  { %v1943_v27 = vmul.f32 -1.442695, %v2483_v10  ;;  %v1945_v37 = vmul.f32 -1.442695, %v2499_v31 }
 0x51b   :  { %v1944_v30 = vmul.f32 -1.442695, %v2484_v26 }
 0x51c   :  { %2612 = vpow2.f32 %v1943_v27 }
 0x51d   :  { %2614 = vpow2.f32 %v1944_v30 }
 0x51e   :  { %2616 = vtanh.f32 %v2500_v32 }
 0x51f   :  { %2618 = vpow2.f32 %v1945_v37 }
 0x526   :  { %v2613_v40 = vpop.eup %2612 }
 0x527   :  { %v1306_v41 = vadd.f32 1.0, %v2613_v40  ;;  %v2615_v45 = vpop.eup %2614 }
 0x528   :  { %v1307_v48 = vadd.f32 1.0, %v2615_v45  ;;  %v2617_v49 = vpop.eup %2616 }
 0x529   :  { %2620 = vrcp.f32 %v1306_v41  ;;  %v2619_v51 = vpop.eup %2618 }
 0x52a   :  { %2622 = vrcp.f32 %v1307_v48  ;;  %v1308_v59 = vadd.f32 1.0, %v2619_v51 }
 0x52c   :  { %2624 = vrcp.f32 %v1308_v59 }
 0x533   :  { %v2621_v53 = vpop.eup %2620 }
 0x534   :  { %v1317_v55 = vmul.f32 %v2621_v53, %v2617_v49  ;;  %v2623_v57 = vpop.eup %2622 }
 0x535   :  { %v1316_v62 = vmul.f32 %v2623_v57, %v3183_v3 }
 0x536   :  { %v2625_v12 = vpop.eup %2624 }
 0x537   :  { %v3225_v63 = vadd.f32 %v1317_v55, %v1316_v62 }
 0x539   :  { %2626 = vtanh.f32 %v3225_v63 }
 0x543   :  { %v2627_v13 = vpop.eup %2626 }
 0x544   :  { %v1320_v18 = vmul.f32 %v2627_v13, %v2625_v12 }
 0x546   :  { %1322 = vst [vmem:[#allocation8 + $0x20] sm:$0xff] %v1320_v18  ;;  %1395 = vmatmul.mubr.f32.vlgmr.msra.gmra.mrb[10].mxu0 %v1320_v18  ;;  %1466 = vmatmul.mubr.f32.vlgmr.msra.gmra.mrb[10].mxu1 %v1320_v18 }
 0x547   :  { %2350 = vmatpush1.bf16.msra.mxu0 %v2859_v22  ;;  %2382 = vmatpush1.bf16.msra.mxu1 %v2862_v25 }
 0x548   :  { %2352 = vmatprep.subr.bf16.mxu0 %v2866_v29  ;;  %2384 = vmatprep.subr.bf16.mxu1 %v2873_v34 }
 0x549   :  { %1573 = vmatprep.mubr.f32.mxu0 %v2773_v0  ;;  %1644 = vmatprep.mubr.f32.mxu1 %v2773_v0 }
 0x54b   :  { %2354 = vmatpush1.bf16.msra.mxu0 %v2875_v35  ;;  %2386 = vmatpush1.bf16.msra.mxu1 %v2879_v38 }
 0x54c   :  { %2356 = vmatprep.subr.bf16.mxu0 %v2883_v42  ;;  %2388 = vmatprep.subr.bf16.mxu1 %v2890_v47 }
 0x54f   :  { %2358 = vmatpush1.bf16.msra.mxu0 %v2894_v50  ;;  %2390 = vmatpush1.bf16.msra.mxu1 %v2898_v54 }
 0x550   :  { %2360 = vmatprep.subr.bf16.mxu0 %v2902_v58  ;;  %2392 = vmatprep.subr.bf16.mxu1 %v2906_v61 }
 0x553   :  { %2362 = vmatpush1.bf16.msra.mxu0 %v2913_v2  ;;  %2394 = vmatpush1.bf16.msra.mxu1 %v2917_v5 }
 0x554   :  { %2364 = vmatprep.subr.bf16.mxu0 %v2921_v8  ;;  %2396 = vmatprep.subr.bf16.mxu1 %v2925_v11 }
 0x557   :  { %2366 = vmatpush1.bf16.msra.mxu0 %v2932_v15  ;;  %2398 = vmatpush1.bf16.msra.mxu1 %v2936_v19 }
 0x558   :  { %2368 = vmatprep.subr.bf16.mxu0 %v2940_v24  ;;  %2400 = vmatprep.subr.bf16.mxu1 %v2944_v28 }
 0x55b   :  { %2370 = vmatpush1.bf16.msra.mxu0 %v2951_v33  ;;  %2402 = vmatpush1.bf16.msra.mxu1 %v2955_v39 }
 0x55c   :  { %2372 = vmatprep.subr.bf16.mxu0 %v2959_v43  ;;  %2404 = vmatprep.subr.bf16.mxu1 %v2963_v46 }
 0x55f   :  { %2374 = vmatpush1.bf16.msra.mxu0 %v2970_v52  ;;  %2406 = vmatpush1.bf16.msra.mxu1 %v2974_v56 }
 0x560   :  { %2376 = vmatprep.subr.bf16.mxu0 %v2978_v60  ;;  %2408 = vmatprep.subr.bf16.mxu1 %v2982_v1 }
 0x563   :  { %2378 = vmatpush1.bf16.msra.mxu0 %v2989_v4  ;;  %2410 = vmatpush1.bf16.msra.mxu1 %v2993_v6 }
 0x564   :  { %2412 = vmatprep.subr.bf16.mxu0 %v2855_v17  ;;  %2444 = vmatprep.subr.bf16.mxu1 %v2857_v21 }
 0x619   :  { %v1396_v3 = vpop.f32.mrb[10].mxu0  ;;  %v1467_v7 = vpop.f32.mrb[10].mxu1 }
 0x61a   :  { %v2485_v9 = vadd.f32 %v1396_v3, %v3045_v14  ;;  %v1398_v10 = vpop.f32.mrb[11].mxu0  ;;  %v1469_v20 = vpop.f32.mrb[11].mxu1  ;;  %v2501_v30 = vadd.f32 %v1467_v7, %v3051_v36 }
 0x61b   :  { %v2486_v23 = vadd.f32 %v1398_v10, %v3047_v16  ;;  %v2502_v31 = vadd.f32 %v1469_v20, %v3054_v44 }
 0x61c   :  { %v1946_v26 = vmul.f32 -1.442695, %v2485_v9  ;;  %v1948_v32 = vmul.f32 -1.442695, %v2501_v30 }
 0x61d   :  { %v1947_v27 = vmul.f32 -1.442695, %v2486_v23 }
 0x61e   :  { %2628 = vpow2.f32 %v1946_v26 }
 0x61f   :  { %2630 = vpow2.f32 %v1947_v27 }
 0x620   :  { %2632 = vtanh.f32 %v2502_v31 }
 0x621   :  { %2634 = vpow2.f32 %v1948_v32 }
 0x628   :  { %v2629_v17 = vpop.eup %2628 }
 0x629   :  { %v1485_v37 = vadd.f32 1.0, %v2629_v17  ;;  %v2631_v21 = vpop.eup %2630 }
 0x62a   :  { %v1486_v40 = vadd.f32 1.0, %v2631_v21  ;;  %v2633_v41 = vpop.eup %2632 }
 0x62b   :  { %2636 = vrcp.f32 %v1485_v37  ;;  %v2635_v45 = vpop.eup %2634 }
 0x62c   :  { %2638 = vrcp.f32 %v1486_v40  ;;  %v1487_v53 = vadd.f32 1.0, %v2635_v45 }
 0x62e   :  { %2640 = vrcp.f32 %v1487_v53 }
 0x635   :  { %v2637_v48 = vpop.eup %2636 }
 0x636   :  { %v1496_v49 = vmul.f32 %v2637_v48, %v2633_v41  ;;  %v2639_v51 = vpop.eup %2638 }
 0x637   :  { %v1495_v55 = vmul.f32 %v2639_v51, %v3225_v63 }
 0x638   :  { %v2641_v59 = vpop.eup %2640 }
 0x639   :  { %v3267_v57 = vadd.f32 %v1496_v49, %v1495_v55 }
 0x63b   :  { %2642 = vtanh.f32 %v3267_v57 }
 0x645   :  { %v2643_v62 = vpop.eup %2642 }
 0x646   :  { %v1499_v12 = vmul.f32 %v2643_v62, %v2641_v59 }
 0x648   :  { %1501 = vst [vmem:[#allocation8 + $0x28] sm:$0xff] %v1499_v12  ;;  %1574 = vmatmul.mubr.f32.vlgmr.msra.gmra.mrb[12].mxu0 %v1499_v12  ;;  %1645 = vmatmul.mubr.f32.vlgmr.msra.gmra.mrb[12].mxu1 %v1499_v12 }
 0x649   :  { %2414 = vmatpush1.bf16.msra.mxu0 %v2859_v22  ;;  %2446 = vmatpush1.bf16.msra.mxu1 %v2862_v25 }
 0x64a   :  { %2416 = vmatprep.subr.bf16.mxu0 %v2866_v29  ;;  %2448 = vmatprep.subr.bf16.mxu1 %v2873_v34 }
 0x64b   :  { %1752 = vmatprep.mubr.f32.mxu0 %v2773_v0  ;;  %1823 = vmatprep.mubr.f32.mxu1 %v2773_v0 }
 0x64d   :  { %2418 = vmatpush1.bf16.msra.mxu0 %v2875_v35  ;;  %2450 = vmatpush1.bf16.msra.mxu1 %v2879_v38 }
 0x64e   :  { %2420 = vmatprep.subr.bf16.mxu0 %v2883_v42  ;;  %2452 = vmatprep.subr.bf16.mxu1 %v2890_v47 }
 0x651   :  { %2422 = vmatpush1.bf16.msra.mxu0 %v2894_v50  ;;  %2454 = vmatpush1.bf16.msra.mxu1 %v2898_v54 }
 0x652   :  { %2424 = vmatprep.subr.bf16.mxu0 %v2902_v58  ;;  %2456 = vmatprep.subr.bf16.mxu1 %v2906_v61 }
 0x655   :  { %2426 = vmatpush1.bf16.msra.mxu0 %v2913_v2  ;;  %2458 = vmatpush1.bf16.msra.mxu1 %v2917_v5 }
 0x656   :  { %2428 = vmatprep.subr.bf16.mxu0 %v2921_v8  ;;  %2460 = vmatprep.subr.bf16.mxu1 %v2925_v11 }
 0x659   :  { %2430 = vmatpush1.bf16.msra.mxu0 %v2932_v15  ;;  %2462 = vmatpush1.bf16.msra.mxu1 %v2936_v19 }
 0x65a   :  { %2432 = vmatprep.subr.bf16.mxu0 %v2940_v24  ;;  %2464 = vmatprep.subr.bf16.mxu1 %v2944_v28 }
 0x65d   :  { %2434 = vmatpush1.bf16.msra.mxu0 %v2951_v33  ;;  %2466 = vmatpush1.bf16.msra.mxu1 %v2955_v39 }
 0x65e   :  { %2436 = vmatprep.subr.bf16.mxu0 %v2959_v43  ;;  %2468 = vmatprep.subr.bf16.mxu1 %v2963_v46 }
 0x661   :  { %2438 = vmatpush1.bf16.msra.mxu0 %v2970_v52  ;;  %2470 = vmatpush1.bf16.msra.mxu1 %v2974_v56 }
 0x662   :  { %2440 = vmatprep.subr.bf16.mxu0 %v2978_v60  ;;  %2472 = vmatprep.subr.bf16.mxu1 %v2982_v1 }
 0x665   :  { %2442 = vmatpush1.bf16.msra.mxu0 %v2989_v4  ;;  %2474 = vmatpush1.bf16.msra.mxu1 %v2993_v6 }
 0x71b   :  { %v1575_v0 = vpop.f32.mrb[12].mxu0  ;;  %v1646_v22 = vpop.f32.mrb[12].mxu1 }
 0x71c   :  { %v2487_v25 = vadd.f32 %v1575_v0, %v3045_v14  ;;  %v1577_v29 = vpop.f32.mrb[13].mxu0  ;;  %v1648_v34 = vpop.f32.mrb[13].mxu1  ;;  %v2503_v47 = vadd.f32 %v1646_v22, %v3051_v36 }
 0x71d   :  { %v2488_v35 = vadd.f32 %v1577_v29, %v3047_v16  ;;  %v2504_v50 = vadd.f32 %v1648_v34, %v3054_v44 }
 0x71e   :  { %v1949_v38 = vmul.f32 -1.442695, %v2487_v25  ;;  %v1951_v54 = vmul.f32 -1.442695, %v2503_v47 }
 0x71f   :  { %v1950_v42 = vmul.f32 -1.442695, %v2488_v35 }
 0x720   :  { %2644 = vpow2.f32 %v1949_v38 }
 0x721   :  { %2646 = vpow2.f32 %v1950_v42 }
 0x722   :  { %2648 = vtanh.f32 %v2504_v50 }
 0x723   :  { %2650 = vpow2.f32 %v1951_v54 }
 0x72a   :  { %v2645_v58 = vpop.eup %2644 }
 0x72b   :  { %v1664_v61 = vadd.f32 1.0, %v2645_v58  ;;  %v2647_v2 = vpop.eup %2646 }
 0x72c   :  { %v1665_v5 = vadd.f32 1.0, %v2647_v2  ;;  %v2649_v8 = vpop.eup %2648 }
 0x72d   :  { %2652 = vrcp.f32 %v1664_v61  ;;  %v2651_v11 = vpop.eup %2650 }
 0x72e   :  { %2654 = vrcp.f32 %v1665_v5  ;;  %v1666_v28 = vadd.f32 1.0, %v2651_v11 }
 0x730   :  { %2656 = vrcp.f32 %v1666_v28 }
 0x737   :  { %v2653_v15 = vpop.eup %2652 }
 0x738   :  { %v1675_v19 = vmul.f32 %v2653_v15, %v2649_v8  ;;  %v2655_v24 = vpop.eup %2654 }
 0x739   :  { %v1674_v33 = vmul.f32 %v2655_v24, %v3267_v57 }
 0x73a   :  { %v2657_v43 = vpop.eup %2656 }
 0x73b   :  { %v1676_v39 = vadd.f32 %v1675_v19, %v1674_v33 }
 0x73d   :  { %2658 = vtanh.f32 %v1676_v39 }
 0x747   :  { %v2659_v46 = vpop.eup %2658 }
 0x748   :  { %v1678_v52 = vmul.f32 %v2659_v46, %v2657_v43 }
 0x74a   :  { %1680 = vst [vmem:[#allocation8 + $0x30] sm:$0xff] %v1678_v52  ;;  %1753 = vmatmul.mubr.f32.vlgmr.msra.gmra.mrb[14].mxu0 %v1678_v52  ;;  %1824 = vmatmul.mubr.f32.vlgmr.msra.gmra.mrb[14].mxu1 %v1678_v52 }
 0x81d   :  { %v1754_v56 = vpop.f32.mrb[14].mxu0  ;;  %v1825_v60 = vpop.f32.mrb[14].mxu1 }
 0x81e   :  { %v2489_v1 = vadd.f32 %v1754_v56, %v3045_v14  ;;  %v1756_v4 = vpop.f32.mrb[15].mxu0  ;;  %v1827_v6 = vpop.f32.mrb[15].mxu1  ;;  %v2505_v3 = vadd.f32 %v1825_v60, %v3051_v36 }
 0x81f   :  { %v2490_v63 = vadd.f32 %v1756_v4, %v3047_v16  ;;  %v2506_v7 = vadd.f32 %v1827_v6, %v3054_v44 }
 0x820   :  { %v1952_v13 = vmul.f32 -1.442695, %v2489_v1  ;;  %v1954_v9 = vmul.f32 -1.442695, %v2505_v3 }
 0x821   :  { %v1953_v18 = vmul.f32 -1.442695, %v2490_v63 }
 0x822   :  { %2660 = vpow2.f32 %v1952_v13 }
 0x823   :  { %2662 = vpow2.f32 %v1953_v18 }
 0x824   :  { %2664 = vtanh.f32 %v2506_v7 }
 0x825   :  { %2666 = vpow2.f32 %v1954_v9 }
 0x82c   :  { %v2661_v10 = vpop.eup %2660 }
 0x82d   :  { %v1843_v20 = vadd.f32 1.0, %v2661_v10  ;;  %v2663_v23 = vpop.eup %2662 }
 0x82e   :  { %v1844_v14 = vadd.f32 1.0, %v2663_v23  ;;  %v2665_v26 = vpop.eup %2664 }
 0x82f   :  { %2668 = vrcp.f32 %v1843_v20  ;;  %v2667_v27 = vpop.eup %2666 }
 0x830   :  { %2670 = vrcp.f32 %v1844_v14  ;;  %v1845_v32 = vadd.f32 1.0, %v2667_v27 }
 0x832   :  { %2672 = vrcp.f32 %v1845_v32 }
 0x839   :  { %v2669_v16 = vpop.eup %2668 }
 0x83a   :  { %v1854_v30 = vmul.f32 %v2669_v16, %v2665_v26  ;;  %v2671_v31 = vpop.eup %2670 }
 0x83b   :  { %v1853_v17 = vmul.f32 %v2671_v31, %v1676_v39 }
 0x83c   :  { %v2673_v36 = vpop.eup %2672 }
 0x83d   :  { %v1855_v37 = vadd.f32 %v1854_v30, %v1853_v17 }
 0x83f   :  { %1863 = vst [vmem:[#allocation11] sm:$0xff] %v1855_v37  ;;  %2674 = vtanh.f32 %v1855_v37 }
 0x849   :  { %v2675_v44 = vpop.eup %2674 }
 0x84a   :  { %v1857_v21 = vmul.f32 %v2675_v44, %v2673_v36 }
 0x84c   :  { %1859 = vst [vmem:[#allocation8 + $0x38] sm:$0xff] %v1857_v21  ;;  %1862 = vst [vmem:[#allocation9] sm:$0xff] %v1857_v21 }
 0x84d   :  { %2709 = shalt.err (!%p2706_p12)
}
 0x84e   :  { %s2710_s25 = scalar_lea.hbm %s3366_s5, 128 }
 0x84f   :  { %p2711_p13 = scmp.ne.s32.totalorder %s3366_s5, %s2710_s25  ;;  %p2714_p0 = scmp.lt.u32.totalorder %s2710_s25, %s3366_s5 }
 0x851   :  { %p2716_p1 = pnand %p2714_p0, %p2711_p13 }
 0x853   :  { %2719 = shalt.err (!%p2716_p1)
}
 0x854   :  { %1885 = dma.vmem_to_hbm [thread:$0]  %s1883_s17, 128, %s3366_s5, [#allocation10]  }
 0x855   :  { %s2720_s7 = scalar_lea.vmem %s3311_s19, 1024  ;;  %p2725_p3 = scmp.lt.s32.totalorder %s3311_s19, %s3311_s19 }
 0x856   :  { %p2721_p2 = scmp.ne.s32.totalorder %s3311_s19, %s2720_s7  ;;  %p2726_p4 = scmp.lt.s32.totalorder %s2720_s7, %s2720_s7 }
 0x858   :  { %p2727_p5 = por %p2726_p4, %p2725_p3 }
 0x85a   :  { %p2728_p6 = pnand %p2727_p5, %p2721_p2 }
 0x85c   :  { %2731 = shalt.err (!%p2728_p6)
}
 0x85d   :  { %s2732_s10 = scalar_lea.hbm %s3365_s4, 1024 }
 0x85e   :  { %p2733_p7 = scmp.ne.s32.totalorder %s3365_s4, %s2732_s10  ;;  %p2736_p8 = scmp.lt.u32.totalorder %s2732_s10, %s3365_s4 }
 0x860   :  { %p2738_p9 = pnand %p2736_p8, %p2733_p7 }
 0x862   :  { %2741 = shalt.err (!%p2738_p9)
}
 0x863   :  { %s2777_s5 = smov 128   ;;  %s2778_s15 = smov 8  }
 0x864   :  { %1875 = dma.vmem_to_hbm [thread:$0]  %s3311_s19, 1024, %s3365_s4, [#allocation7], %s2777_s5, %s2777_s5, %s2778_s15  }
 0x865   :  { %s2742_s2 = scalar_lea.vmem %s3313_s21, 128  ;;  %p2747_p11 = scmp.lt.s32.totalorder %s3313_s21, %s3313_s21 }
 0x866   :  { %p2743_p10 = scmp.ne.s32.totalorder %s3313_s21, %s2742_s2  ;;  %p2748_p12 = scmp.lt.s32.totalorder %s2742_s2, %s2742_s2 }
 0x868   :  { %p2749_p13 = por %p2748_p12, %p2747_p11 }
 0x86a   :  { %p2750_p0 = pnand %p2749_p13, %p2743_p10 }
 0x86c   :  { %2753 = shalt.err (!%p2750_p0)
}
 0x86d   :  { %s2754_s18 = scalar_lea.hbm %s3367_s6, 128 }
 0x86e   :  { %p2755_p1 = scmp.ne.s32.totalorder %s3367_s6, %s2754_s18  ;;  %p2758_p2 = scmp.lt.u32.totalorder %s2754_s18, %s3367_s6 }
 0x870   :  { %p2760_p3 = pnand %p2758_p2, %p2755_p1 }
 0x872   :  { %2763 = shalt.err (!%p2760_p3)
}
 0x873   :  { %1895 = dma.vmem_to_hbm [thread:$0]  %s3313_s21, 128, %s3367_s6, [#allocation10]  }
 0x874   :  { %2766 = dma.done.wait [#allocation7], 1024  }
 0x875   :  { %2767 = vsyncadd [#allocation7], 4294966272 }
 0x876   :  { %2768 = dma.done.wait [#allocation10], 256  }
 0x877   :  { %2769 = vsyncadd [#allocation10], 4294967040 }
 0x878   :  { %1905 = vsyncpa [#allocation6], 1 }
 0x879   :  { %1906 = vsyncpa [#allocation7], 1 }
 0x87a   :  { %1907 = vsyncpa [#allocation10], 1 }

</bundles_post_ra>
